<compile_context>
chip_gen: v7x
topology: tpu7x:2x2x1
jax: 0.10.0
libtpu: 0.0.40
codegen_flags: <defaults>
</compile_context>

<pallas_src>
import jax
import jax.numpy as jnp
from jax.experimental import pallas as pl
from jax.experimental.pallas import tpu as pltpu

IN_DIM = 28 * 28      # 784
HID = 512
OUT_DIM = 10
OUT_PAD = 128         # lane-dense padded output width
TB_MIN = 128          # keeps every block (8,128)/(16,128)-tile aligned
TB_MAX = 512          # fits v5e 16 MiB scoped VMEM & v7x 32 MiB scoped comfortably


def mlp_kernel(x_ref, w1_ref, b1_ref, w2_ref, b2_ref, w3_ref, b3_ref, o_ref):
    # Layer 1: f32 tile cast to bf16 on the VPU, (TB,784)bf16 @ (784,512)bf16 -> f32.
    x = x_ref[...].astype(jnp.bfloat16)
    h1 = jnp.dot(x, w1_ref[...], preferred_element_type=jnp.float32)
    h1 = jnp.maximum(h1 + b1_ref[...], 0.0)
    # Layer 2
    h2 = jnp.dot(h1.astype(jnp.bfloat16), w2_ref[...],
                 preferred_element_type=jnp.float32)
    h2 = jnp.maximum(h2 + b2_ref[...], 0.0)
    # Layer 3 (padded to 128 lanes, no activation); store as bf16.
    h3 = jnp.dot(h2.astype(jnp.bfloat16), w3_ref[...],
                 preferred_element_type=jnp.float32) + b3_ref[...]
    o_ref[...] = h3.astype(o_ref.dtype)


def _choose_tb(B):
    """Batch tile: as large as possible (<=512) while keeping >=2 grid steps
    when the batch allows it, so v7x megacore ('parallel') actually shards."""
    half = -(-B // 2)                                   # cdiv(B, 2)
    half_rounded = -(-half // TB_MIN) * TB_MIN          # round up to 128
    return max(TB_MIN, min(TB_MAX, half_rounded))


@jax.jit
def neural_network_forward(x_nchw, params):
    """Forward pass matching the PyTorch module. x_nchw: (B, 1, 28, 28) float32."""
    w1, b1, w2, b2, w3, b3 = params   # w*: bf16 (in,out); b*: f32 (1,out); w3/b3 padded
    B = x_nchw.shape[0]

    # nn.Flatten(): flatten everything after the batch dim (row-major, free reshape).
    x = x_nchw.reshape(B, -1)         # (B, 784) f32 -- cast to bf16 happens in-kernel

    TB = _choose_tb(B)
    n_tiles = pl.cdiv(B, TB)          # ragged last tile handled by Pallas masking

    def const2(shape):                # VMEM-resident, single-buffered constants
        return pl.BlockSpec(shape, lambda i: (0, 0), pipeline_mode=pl.Buffered(1))

    B_eff = n_tiles * TB
    flops = 2 * B_eff * (IN_DIM * HID + HID * HID + HID * OUT_PAD)
    bytes_accessed = (
        (IN_DIM * HID + HID * HID + HID * OUT_PAD) * 2          # bf16 weights
        + (2 * HID + OUT_PAD) * 4                               # f32 biases
        + B_eff * IN_DIM * 4                                    # f32 x
        + B_eff * OUT_PAD * 2                                   # bf16 out
    )

    out = pl.pallas_call(
        mlp_kernel,
        out_shape=jax.ShapeDtypeStruct((B, OUT_PAD), jnp.bfloat16),
        grid_spec=pltpu.PrefetchScalarGridSpec(
            num_scalar_prefetch=0,
            grid=(n_tiles,),
            in_specs=[
                pl.BlockSpec((TB, IN_DIM), lambda i: (i, 0)),   # x tile (pipelined)
                const2((IN_DIM, HID)),                          # w1
                const2((1, HID)),                               # b1
                const2((HID, HID)),                             # w2
                const2((1, HID)),                               # b2
                const2((HID, OUT_PAD)),                         # w3 (padded)
                const2((1, OUT_PAD)),                           # b3 (padded)
            ],
            out_specs=pl.BlockSpec((TB, OUT_PAD), lambda i: (i, 0)),
        ),
        compiler_params=pltpu.CompilerParams(
            dimension_semantics=("parallel",),                  # 2x on v7x megacore
            vmem_limit_bytes=32 * 1024 * 1024,
        ),
        cost_estimate=pl.CostEstimate(
            flops=flops, transcendentals=0, bytes_accessed=bytes_accessed),
    )(x, w1, b1, w2, b2, w3, b3)

    return out[:, :OUT_DIM]           # bf16 logits


def init_params(key):
    """Deterministic synthetic params with PyTorch nn.Linear init/shapes.
    Weights kept transposed (in, out) and cast to bf16; biases as (1, out) f32.
    Final layer zero-padded from 10 to 128 output lanes."""
    ks = jax.random.split(key, 6)

    def lin(kw, kb, fan_in, fan_out):
        bound = 1.0 / jnp.sqrt(fan_in)
        w = jax.random.uniform(kw, (fan_in, fan_out), jnp.float32, -bound, bound)
        b = jax.random.uniform(kb, (1, fan_out), jnp.float32, -bound, bound)
        return w.astype(jnp.bfloat16), b

    w1, b1 = lin(ks[0], ks[1], IN_DIM, HID)
    w2, b2 = lin(ks[2], ks[3], HID, HID)
    w3, b3 = lin(ks[4], ks[5], HID, OUT_DIM)
    # Zero-pad last layer to a lane-dense 128-wide output.
    w3 = jnp.pad(w3, ((0, 0), (0, OUT_PAD - OUT_DIM)))
    b3 = jnp.pad(b3, ((0, 0), (0, OUT_PAD - OUT_DIM)))
    return (w1, b1, w2, b2, w3, b3)


def reference_forward(x_nchw, params):
    """Plain-JAX reference using the same bf16 weight/activation quantization."""
    w1, b1, w2, b2, w3, b3 = params
    x = x_nchw.reshape(x_nchw.shape[0], -1).astype(jnp.bfloat16)
    h1 = jnp.maximum(jnp.dot(x, w1, preferred_element_type=jnp.float32) + b1, 0.0)
    h2 = jnp.maximum(
        jnp.dot(h1.astype(jnp.bfloat16), w2, preferred_element_type=jnp.float32) + b2,
        0.0)
    logits = jnp.dot(h2.astype(jnp.bfloat16), w3,
                     preferred_element_type=jnp.float32) + b3
    return logits[:, :OUT_DIM]        # f32 reference logits


if __name__ == "__main__":
    key = jax.random.PRNGKey(0)
    k_x, k_p = jax.random.split(key)

    # B=200 is not a multiple of the chosen tile (TB=128 -> 2 grid steps):
    # exercises both the >=2-step megacore path and the ragged last-tile masking.
    B = 200
    x = jax.random.normal(k_x, (B, 1, 28, 28), dtype=jnp.float32)
    params = init_params(k_p)

    logits = neural_network_forward(x, params)
    logits = jax.block_until_ready(logits)

    ref = reference_forward(x, params)
    assert logits.shape == (B, OUT_DIM)
    # bf16 output rounding => loosened tolerance vs the f32 reference.
    err = jnp.max(jnp.abs(logits.astype(jnp.float32) - ref))
    assert jnp.allclose(logits.astype(jnp.float32), ref, atol=3e-2, rtol=3e-2), float(err)

    print("KERNEL_OK")
</pallas_src>

<mosaic_0001>
module attributes {stable_mosaic.version = 11 : i64} {
  func.func @mlp_kernel(%arg0: i32, %arg1: memref<128x784xf32, #tpu.memory_space<vmem>>, %arg2: memref<784x512xbf16, #tpu.memory_space<vmem>>, %arg3: memref<1x512xf32, #tpu.memory_space<vmem>>, %arg4: memref<512x512xbf16, #tpu.memory_space<vmem>>, %arg5: memref<1x512xf32, #tpu.memory_space<vmem>>, %arg6: memref<512x128xbf16, #tpu.memory_space<vmem>>, %arg7: memref<1x128xf32, #tpu.memory_space<vmem>>, %arg8: memref<128x128xbf16, #tpu.memory_space<vmem>>) attributes {dimension_semantics = [#tpu.dimension_semantics<parallel>], iteration_bounds = array<i64: 2>, scalar_prefetch = 0 : i64, scratch_operands = 0 : i64, tpu.core_type = #tpu.core_type<tc>, window_params = [{transform_indices = @transform_0, window_bounds = array<i64: 128, 784>}, {pipeline_mode = #tpu.pipeline_mode<synchronous>, transform_indices = @transform_1, window_bounds = array<i64: 784, 512>}, {pipeline_mode = #tpu.pipeline_mode<synchronous>, transform_indices = @transform_2, window_bounds = array<i64: 1, 512>}, {pipeline_mode = #tpu.pipeline_mode<synchronous>, transform_indices = @transform_3, window_bounds = array<i64: 512, 512>}, {pipeline_mode = #tpu.pipeline_mode<synchronous>, transform_indices = @transform_4, window_bounds = array<i64: 1, 512>}, {pipeline_mode = #tpu.pipeline_mode<synchronous>, transform_indices = @transform_5, window_bounds = array<i64: 512, 128>}, {pipeline_mode = #tpu.pipeline_mode<synchronous>, transform_indices = @transform_6, window_bounds = array<i64: 1, 128>}, {transform_indices = @transform_7, window_bounds = array<i64: 128, 128>}]} {
    %c0 = arith.constant 0 : index
    %c0_0 = arith.constant 0 : index
    %0 = vector.load %arg1[%c0, %c0_0] : memref<128x784xf32, #tpu.memory_space<vmem>>, vector<128x784xf32>
    %1 = arith.truncf %0 : vector<128x784xf32> to vector<128x784xbf16>
    %c0_1 = arith.constant 0 : index
    %c0_2 = arith.constant 0 : index
    %2 = vector.load %arg2[%c0_1, %c0_2] : memref<784x512xbf16, #tpu.memory_space<vmem>>, vector<784x512xbf16>
    %cst = arith.constant dense<0.000000e+00> : vector<128x512xf32>
    %3 = tpu.matmul %1, %2, %cst {dimension_numbers = #tpu.dot_dimension_numbers<[1], [0], [0], [1], [0, 0, 1, 1], [], []>} : vector<128x784xbf16>, vector<784x512xbf16>, vector<128x512xf32> -> vector<128x512xf32>
    %c0_3 = arith.constant 0 : index
    %c0_4 = arith.constant 0 : index
    %4 = vector.load %arg3[%c0_3, %c0_4] : memref<1x512xf32, #tpu.memory_space<vmem>>, vector<1x512xf32>
    %5 = vector.broadcast %4 : vector<1x512xf32> to vector<128x512xf32>
    %6 = arith.addf %3, %5 : vector<128x512xf32>
    %cst_5 = arith.constant 0.000000e+00 : f32
    %7 = vector.broadcast %cst_5 : f32 to vector<128x512xf32>
    %8 = arith.maximumf %6, %7 : vector<128x512xf32>
    %9 = arith.truncf %8 : vector<128x512xf32> to vector<128x512xbf16>
    %c0_6 = arith.constant 0 : index
    %c0_7 = arith.constant 0 : index
    %10 = vector.load %arg4[%c0_6, %c0_7] : memref<512x512xbf16, #tpu.memory_space<vmem>>, vector<512x512xbf16>
    %cst_8 = arith.constant dense<0.000000e+00> : vector<128x512xf32>
    %11 = tpu.matmul %9, %10, %cst_8 {dimension_numbers = #tpu.dot_dimension_numbers<[1], [0], [0], [1], [0, 0, 1, 1], [], []>} : vector<128x512xbf16>, vector<512x512xbf16>, vector<128x512xf32> -> vector<128x512xf32>
    %c0_9 = arith.constant 0 : index
    %c0_10 = arith.constant 0 : index
    %12 = vector.load %arg5[%c0_9, %c0_10] : memref<1x512xf32, #tpu.memory_space<vmem>>, vector<1x512xf32>
    %13 = vector.broadcast %12 : vector<1x512xf32> to vector<128x512xf32>
    %14 = arith.addf %11, %13 : vector<128x512xf32>
    %cst_11 = arith.constant 0.000000e+00 : f32
    %15 = vector.broadcast %cst_11 : f32 to vector<128x512xf32>
    %16 = arith.maximumf %14, %15 : vector<128x512xf32>
    %17 = arith.truncf %16 : vector<128x512xf32> to vector<128x512xbf16>
    %c0_12 = arith.constant 0 : index
    %c0_13 = arith.constant 0 : index
    %18 = vector.load %arg6[%c0_12, %c0_13] : memref<512x128xbf16, #tpu.memory_space<vmem>>, vector<512x128xbf16>
    %cst_14 = arith.constant dense<0.000000e+00> : vector<128x128xf32>
    %19 = tpu.matmul %17, %18, %cst_14 {dimension_numbers = #tpu.dot_dimension_numbers<[1], [0], [0], [1], [0, 0, 1, 1], [], []>} : vector<128x512xbf16>, vector<512x128xbf16>, vector<128x128xf32> -> vector<128x128xf32>
    %c0_15 = arith.constant 0 : index
    %c0_16 = arith.constant 0 : index
    %20 = vector.load %arg7[%c0_15, %c0_16] : memref<1x128xf32, #tpu.memory_space<vmem>>, vector<1x128xf32>
    %21 = vector.broadcast %20 : vector<1x128xf32> to vector<128x128xf32>
    %22 = arith.addf %19, %21 : vector<128x128xf32>
    %23 = arith.truncf %22 : vector<128x128xf32> to vector<128x128xbf16>
    %c0_17 = arith.constant 0 : index
    %c0_18 = arith.constant 0 : index
    %24 = vector.load %arg8[%c0_17, %c0_18] : memref<128x128xbf16, #tpu.memory_space<vmem>>, vector<128x128xbf16>
    tpu.vector_store %arg8[%c0_17, %c0_18], %23 {strides = array<i32>} : memref<128x128xbf16, #tpu.memory_space<vmem>>, vector<128x128xbf16>,
    return
  }
  func.func @transform_0(%arg0: i32) -> (i32, i32) {
    %c0_i32 = arith.constant 0 : i32
    %c0_i32_0 = arith.constant 0 : i32
    return %arg0, %c0_i32 : i32, i32
  }
  func.func @transform_1(%arg0: i32) -> (i32, i32) {
    %c0_i32 = arith.constant 0 : i32
    %c0_i32_0 = arith.constant 0 : i32
    %c0_i32_1 = arith.constant 0 : i32
    return %c0_i32, %c0_i32_0 : i32, i32
  }
  func.func @transform_2(%arg0: i32) -> (i32, i32) {
    %c0_i32 = arith.constant 0 : i32
    %c0_i32_0 = arith.constant 0 : i32
    %c0_i32_1 = arith.constant 0 : i32
    return %c0_i32, %c0_i32_0 : i32, i32
  }
  func.func @transform_3(%arg0: i32) -> (i32, i32) {
    %c0_i32 = arith.constant 0 : i32
    %c0_i32_0 = arith.constant 0 : i32
    %c0_i32_1 = arith.constant 0 : i32
    return %c0_i32, %c0_i32_0 : i32, i32
  }
  func.func @transform_4(%arg0: i32) -> (i32, i32) {
    %c0_i32 = arith.constant 0 : i32
    %c0_i32_0 = arith.constant 0 : i32
    %c0_i32_1 = arith.constant 0 : i32
    return %c0_i32, %c0_i32_0 : i32, i32
  }
  func.func @transform_5(%arg0: i32) -> (i32, i32) {
    %c0_i32 = arith.constant 0 : i32
    %c0_i32_0 = arith.constant 0 : i32
    %c0_i32_1 = arith.constant 0 : i32
    return %c0_i32, %c0_i32_0 : i32, i32
  }
  func.func @transform_6(%arg0: i32) -> (i32, i32) {
    %c0_i32 = arith.constant 0 : i32
    %c0_i32_0 = arith.constant 0 : i32
    %c0_i32_1 = arith.constant 0 : i32
    return %c0_i32, %c0_i32_0 : i32, i32
  }
  func.func @transform_7(%arg0: i32) -> (i32, i32) {
    %c0_i32 = arith.constant 0 : i32
    %c0_i32_0 = arith.constant 0 : i32
    return %arg0, %c0_i32 : i32, i32
  }
}

</mosaic_0001>

<bundles_post_ra>
// kernel: neural_network_forward.1
= control target key start
LH: loop header
LB: loop body
LE: loop exit
PB: predicated region body
PF: predicated region fallthrough
CT: control target
= control target key end

     0   :  { %s6577_s24 = smov 0   ;;  %s6579_s25 = smov 0   ;;  %s8199_s0 = inlined_call_operand.vmem [shape: f32[200,784], index: 0, kind: input, shape index: {}]   ;;  %s8200_s1 = inlined_call_operand.vmem [shape: bf16[784,512], index: 1, kind: input, shape index: {}]   ;;  %s8201_s2 = inlined_call_operand.vmem [shape: f32[1,512], index: 2, kind: input, shape index: {}]   ;;  %s8202_s3 = inlined_call_operand.vmem [shape: bf16[512,512], index: 3, kind: input, shape index: {}]   ;;  %s8203_s4 = inlined_call_operand.vmem [shape: f32[1,512], index: 4, kind: input, shape index: {}]   ;;  %s8204_s5 = inlined_call_operand.vmem [shape: bf16[512,128], index: 5, kind: input, shape index: {}]   ;;  %s8205_s6 = inlined_call_operand.vmem [shape: f32[1,128], index: 6, kind: input, shape index: {}]   ;;  %s8206_s7 = inlined_call_operand.vmem [shape: bf16[200,128], index: 7, kind: output, shape index: {}]  }
   0x1   :  { %s6581_s26 = smov 0  }
   0x2 LB: > { %s6590_s27 = sadd.s32 4294967295, %s6502_s26   ;;  %s6592_s28 = sadd.s32 1, %s6502_s26   ;;  %s6502_s26 = sphi %s6581_s26, %s8213_s26   ;;  %s6498_s25 = sphi %s6579_s25, %s8212_s25   ;;  %s6494_s24 = sphi %s6577_s24, %s8211_s24  }
   0x3   : > { %s173_s29 = ssub.s32 %s6502_s26, %s6592_s28  ;;  %s176_s30 = sadd.s32 1, %s6498_s25 }
   0x4   : > { %p174_p0 = scmp.eq.s32.totalorder %s173_s29, 0  ;;  %p186_p1 = scmp.ne.s32.totalorder %s6498_s25, %s6494_s24 }
   0x5   : > { %p187_p2 = scmp.eq.s32.totalorder %s6590_s27, 1  ;;  %p4852_p3 = scmp.ge.s32.totalorder %s6502_s26, 1 }
   0x6   : > { %s6600_s8 = scalar_select %p174_p0, %s6498_s25, %s176_s30  }
   0x7   : > { %p6602_p4 = por %p187_p2, %p186_p1  ;;  %p249_p5 = scmp.lt.s32.totalorder %s6502_s26, 3 }
   0x9   : > { %p250_p6 = pnand %p4852_p3, %p249_p5 }
   0xa   : > { %v5930_v0 = vld [vmem:[%s8200_s1 + $0x4] ss:$16 sps:$4 sm:$0xff] (!%p250_p6)   ;;  %v5932_v1 = vld [vmem:[%s8200_s1 + $0xc] ss:$16 sps:$4 sm:$0xff] (!%p250_p6)   ;;  %v5934_v2 = vld [vmem:[%s8200_s1] ss:$16 sps:$4 sm:$0xff] (!%p250_p6)  }
   0xb   : > { %253 = sbr.rel (%p250_p6) target bundleno = 1114 (0x45a), region = 48  ;;  %1700 = vmatprep.subr.bf16.mxu0 (!%p250_p6), %v5930_v0  ;;  %v5935_v3 = vld [vmem:[%s8200_s1 + $0x8] ss:$16 sps:$4 sm:$0xff] (!%p250_p6)   ;;  %2152 = vmatprep.subr.bf16.mxu1 (!%p250_p6), %v5932_v1  ;;  %v5936_v4 = vld [vmem:[%s8200_s1 + $0x24] ss:$16 sps:$4 sm:$0xff] (!%p250_p6)   ;;  %s6694_s17 = sshll.u32 (!%p250_p6), %s6590_s27, 4 }
   0xc   : > { %1701 = vmatpush1.bf16.msra.mxu0 (!%p250_p6), %v5934_v2  ;;  %2153 = vmatpush1.bf16.msra.mxu1 (!%p250_p6), %v5935_v3  ;;  %v5938_v5 = vld [vmem:[%s8200_s1 + $0x2c] ss:$16 sps:$4 sm:$0xff] (!%p250_p6)   ;;  %v5940_v6 = vld [vmem:[%s8200_s1 + $0x20] ss:$16 sps:$4 sm:$0xff] (!%p250_p6)   ;;  %v5941_v7 = vld [vmem:[%s8200_s1 + $0x28] ss:$16 sps:$4 sm:$0xff] (!%p250_p6)  }
   0xd   : > { %1702 = vmatprep.subr.bf16.mxu0 (!%p250_p6), %v5936_v4  ;;  %2154 = vmatprep.subr.bf16.mxu1 (!%p250_p6), %v5938_v5  ;;  %v5942_v8 = vld [vmem:[%s8200_s1 + $0x44] ss:$16 sps:$4 sm:$0xff] (!%p250_p6)   ;;  %v5944_v9 = vld [vmem:[%s8200_s1 + $0x4c] ss:$16 sps:$4 sm:$0xff] (!%p250_p6)   ;;  %v5946_v10 = vld [vmem:[%s8200_s1 + $0x40] ss:$16 sps:$4 sm:$0xff] (!%p250_p6)  }
   0xe   : > { %v5947_v11 = vld [vmem:[%s8200_s1 + $0x48] ss:$16 sps:$4 sm:$0xff] (!%p250_p6)   ;;  %v5948_v12 = vld [vmem:[%s8200_s1 + $0x64] ss:$16 sps:$4 sm:$0xff] (!%p250_p6)   ;;  %v5950_v13 = vld [vmem:[%s8200_s1 + $0x6c] ss:$16 sps:$4 sm:$0xff] (!%p250_p6)  }
   0xf   : > { %v5952_v14 = vld [vmem:[%s8200_s1 + $0x60] ss:$16 sps:$4 sm:$0xff] (!%p250_p6)   ;;  %v5953_v15 = vld [vmem:[%s8200_s1 + $0x68] ss:$16 sps:$4 sm:$0xff] (!%p250_p6)   ;;  %v5954_v16 = vld [vmem:[%s8200_s1 + $0x84] ss:$16 sps:$4 sm:$0xff] (!%p250_p6)  }
  0x10   : > { %1703 = vmatpush1.bf16.msra.mxu0 (!%p250_p6), %v5940_v6  ;;  %2155 = vmatpush1.bf16.msra.mxu1 (!%p250_p6), %v5941_v7  ;;  %v5956_v17 = vld [vmem:[%s8200_s1 + $0x8c] ss:$16 sps:$4 sm:$0xff] (!%p250_p6)   ;;  %v5958_v18 = vld [vmem:[%s8200_s1 + $0x80] ss:$16 sps:$4 sm:$0xff] (!%p250_p6)   ;;  %v5959_v19 = vld [vmem:[%s8200_s1 + $0x88] ss:$16 sps:$4 sm:$0xff] (!%p250_p6)  }
  0x11   : > { %1704 = vmatprep.subr.bf16.mxu0 (!%p250_p6), %v5942_v8  ;;  %2156 = vmatprep.subr.bf16.mxu1 (!%p250_p6), %v5944_v9  ;;  %v5960_v20 = vld [vmem:[%s8200_s1 + $0xa4] ss:$16 sps:$4 sm:$0xff] (!%p250_p6)   ;;  %v5962_v21 = vld [vmem:[%s8200_s1 + $0xac] ss:$16 sps:$4 sm:$0xff] (!%p250_p6)   ;;  %v5964_v22 = vld [vmem:[%s8200_s1 + $0xa0] ss:$16 sps:$4 sm:$0xff] (!%p250_p6)  }
  0x12   : > { %v5965_v23 = vld [vmem:[%s8200_s1 + $0xa8] ss:$16 sps:$4 sm:$0xff]   ;;  %v5966_v24 = vld [vmem:[%s8200_s1 + $0xc4] ss:$16 sps:$4 sm:$0xff]   ;;  %v5968_v25 = vld [vmem:[%s8200_s1 + $0xcc] ss:$16 sps:$4 sm:$0xff]  }
  0x13   : > { %v5970_v26 = vld [vmem:[%s8200_s1 + $0xc0] ss:$16 sps:$4 sm:$0xff]   ;;  %v5971_v27 = vld [vmem:[%s8200_s1 + $0xc8] ss:$16 sps:$4 sm:$0xff]   ;;  %v5972_v28 = vld [vmem:[%s8200_s1 + $0xe4] ss:$16 sps:$4 sm:$0xff]  }
  0x14   : > { %1705 = vmatpush1.bf16.msra.mxu0 %v5946_v10  ;;  %2157 = vmatpush1.bf16.msra.mxu1 %v5947_v11  ;;  %v5974_v29 = vld [vmem:[%s8200_s1 + $0xec] ss:$16 sps:$4 sm:$0xff]   ;;  %v5976_v30 = vld [vmem:[%s8200_s1 + $0xe0] ss:$16 sps:$4 sm:$0xff]   ;;  %p292_p7 = scmp.lt.s32.totalorder %s6694_s17, 24  ;;  %vm1675_vm0 = vcmask 130048  }
  0x15   : > { %1706 = vmatprep.subr.bf16.mxu0 %v5948_v12  ;;  %2158 = vmatprep.subr.bf16.mxu1 %v5950_v13  ;;  %v5977_v31 = vld [vmem:[%s8200_s1 + $0xe8] ss:$16 sps:$4 sm:$0xff]   ;;  %v5978_v32 = vld [vmem:[%s8200_s1 + $0x104] ss:$16 sps:$4 sm:$0xff]   ;;  %v5980_v33 = vld [vmem:[%s8200_s1 + $0x10c] ss:$16 sps:$4 sm:$0xff]  }
  0x16   : > { %v5982_v34 = vld [vmem:[%s8200_s1 + $0x100] ss:$16 sps:$4 sm:$0xff]   ;;  %v5983_v35 = vld [vmem:[%s8200_s1 + $0x108] ss:$16 sps:$4 sm:$0xff]   ;;  %s293_s15 = scalar_select %p292_p7, %s6694_s17, 24 }
  0x17   : > { %v5984_v36 = vld [vmem:[%s8200_s1 + $0x124] ss:$16 sps:$4 sm:$0xff]   ;;  %v5986_v37 = vld [vmem:[%s8200_s1 + $0x12c] ss:$16 sps:$4 sm:$0xff]   ;;  %v5988_v38 = vld [vmem:[%s8200_s1 + $0x120] ss:$16 sps:$4 sm:$0xff]  }
  0x18   : > { %1707 = vmatpush1.bf16.msra.mxu0 %v5952_v14  ;;  %2159 = vmatpush1.bf16.msra.mxu1 %v5953_v15  ;;  %s5840_s23 = smul.u32 56, %s293_s15  ;;  %v5989_v39 = vld [vmem:[%s8200_s1 + $0x128] ss:$16 sps:$4 sm:$0xff]   ;;  %v5990_v40 = vld [vmem:[%s8200_s1 + $0x144] ss:$16 sps:$4 sm:$0xff]   ;;  %s283_s22 = sand.u32 1, %s6494_s24  }
  0x19   : > { %1708 = vmatprep.subr.bf16.mxu0 %v5954_v16  ;;  %2160 = vmatprep.subr.bf16.mxu1 %v5956_v17  ;;  %v5992_v41 = vld [vmem:[%s8200_s1 + $0x14c] ss:$16 sps:$4 sm:$0xff]   ;;  %v5994_v42 = vld [vmem:[%s8200_s1 + $0x140] ss:$16 sps:$4 sm:$0xff]   ;;  %v5995_v43 = vld [vmem:[%s8200_s1 + $0x148] ss:$16 sps:$4 sm:$0xff]  }
  0x1a   : > { %s6746_s20 = scalar_lea.vmem %s8199_s0, %s5840_s23  ;;  %v5996_v44 = vld [vmem:[%s8200_s1 + $0x164] ss:$16 sps:$4 sm:$0xff]   ;;  %v5998_v45 = vld [vmem:[%s8200_s1 + $0x16c] ss:$16 sps:$4 sm:$0xff]   ;;  %v6000_v47 = vld [vmem:[%s8200_s1 + $0x160] ss:$16 sps:$4 sm:$0xff]  }
  0x1b   : > { %v310_v46 = vld [vmem:[%s6746_s20 + $0x8] sm:$0xff]  ;;  %v317_v49 = vld [vmem:[%s6746_s20 + $0x40] sm:$0xff]  ;;  %v316_v4 = vld [vmem:[%s6746_s20 + $0x38] sm:$0xff]  ;;  %s4853_s26 = sshll.u32 %s283_s22, 6  ;;  %s4583_s29 = ssub.s32 (%p6602_p4), 25, %s6694_s17 }
  0x1c   : > { %1709 = vmatpush1.bf16.msra.mxu0 %v5958_v18  ;;  %2161 = vmatpush1.bf16.msra.mxu1 %v5959_v19  ;;  %v6001_v48 = vld [vmem:[%s8200_s1 + $0x168] ss:$16 sps:$4 sm:$0xff]   ;;  %v6002_v50 = vld [vmem:[%s8200_s1 + $0x184] ss:$16 sps:$4 sm:$0xff]   ;;  %v422_v51 = vpack.c.bf16 %v317_v49, %v310_v46  ;;  %v6004_v52 = vld [vmem:[%s8200_s1 + $0x18c] ss:$16 sps:$4 sm:$0xff]  }
  0x1d   : > { %1710 = vmatprep.subr.bf16.mxu0 %v5960_v20  ;;  %2162 = vmatprep.subr.bf16.mxu1 %v5962_v21  ;;  %v6006_v53 = vld [vmem:[%s8200_s1 + $0x180] ss:$16 sps:$4 sm:$0xff]   ;;  %v6007_v54 = vld [vmem:[%s8200_s1 + $0x188] ss:$16 sps:$4 sm:$0xff]   ;;  %v6008_v55 = vld [vmem:[%s8200_s1 + $0x1a4] ss:$16 sps:$4 sm:$0xff]  }
  0x1e   : > { %1732 = vmatprep.mubr.bf16.mxu0 %v422_v51  ;;  %2184 = vmatprep.mubr.bf16.mxu1 %v422_v51  ;;  %v6010_v56 = vld [vmem:[%s8200_s1 + $0x1ac] ss:$16 sps:$4 sm:$0xff]   ;;  %v6012_v57 = vld [vmem:[%s8200_s1 + $0x1a0] ss:$16 sps:$4 sm:$0xff]   ;;  %v6013_v58 = vld [vmem:[%s8200_s1 + $0x1a8] ss:$16 sps:$4 sm:$0xff]  }
  0x1f   : > { %v6014_v59 = vld [vmem:[%s8200_s1 + $0x1c4] ss:$16 sps:$4 sm:$0xff]   ;;  %v6016_v60 = vld [vmem:[%s8200_s1 + $0x1cc] ss:$16 sps:$4 sm:$0xff]   ;;  %v6018_v61 = vld [vmem:[%s8200_s1 + $0x1c0] ss:$16 sps:$4 sm:$0xff]  }
  0x20   : > { %1711 = vmatpush1.bf16.msra.mxu0 %v5964_v22  ;;  %2163 = vmatpush1.bf16.msra.mxu1 %v5965_v23  ;;  %v6019_v62 = vld [vmem:[%s8200_s1 + $0x1c8] ss:$16 sps:$4 sm:$0xff]   ;;  %v6020_v63 = vld [vmem:[%s8200_s1 + $0x1e4] ss:$16 sps:$4 sm:$0xff]   ;;  %v6022_v0 = vld [vmem:[%s8200_s1 + $0x1ec] ss:$16 sps:$4 sm:$0xff]  }
  0x21   : > { %1712 = vmatprep.subr.bf16.mxu0 %v5966_v24  ;;  %2164 = vmatprep.subr.bf16.mxu1 %v5968_v25  ;;  %v6024_v1 = vld [vmem:[%s8200_s1 + $0x1e0] ss:$16 sps:$4 sm:$0xff]   ;;  %v6025_v2 = vld [vmem:[%s8200_s1 + $0x1e8] ss:$16 sps:$4 sm:$0xff]   ;;  %v6028_v5 = vld [vmem:[%s8200_s1 + $0x204] ss:$16 sps:$4 sm:$0xff]  }
  0x22   : > { %v309_v3 = vld [vmem:[%s6746_s20] sm:$0xff]  ;;  %v6031_v6 = vld [vmem:[%s8200_s1 + $0x20c] ss:$16 sps:$4 sm:$0xff]   ;;  %v6029_v9 = vld [vmem:[%s8200_s1 + $0x208] ss:$16 sps:$4 sm:$0xff]   ;;  %s8072_s24 = scalar_lea.vmem [#allocation2], %s4853_s26  }
  0x23   : > { %v6026_v7 = vld [vmem:[%s8200_s1 + $0x200] ss:$16 sps:$4 sm:$0xff]   ;;  %v421_v8 = vpack.c.bf16 %v316_v4, %v309_v3  ;;  %v324_v10 = vld [vmem:[%s6746_s20 + $0x78] sm:$0xff]  ;;  %v6034_v12 = vld [vmem:[%s8200_s1 + $0x224] ss:$16 sps:$4 sm:$0xff]   ;;  %s5278_s30 = sshll.u32 (%p6602_p4), %s6590_s27, 6 }
  0x24   : > { %1713 = vmatpush1.bf16.msra.mxu0 %v5970_v26  ;;  %2165 = vmatpush1.bf16.msra.mxu1 %v5971_v27  ;;  %v331_v11 = vld [vmem:[%s6746_s20 + $0xb0] sm:$0xff]  ;;  %v6037_v13 = vld [vmem:[%s8200_s1 + $0x22c] ss:$16 sps:$4 sm:$0xff]   ;;  %v6035_v16 = vld [vmem:[%s8200_s1 + $0x228] ss:$16 sps:$4 sm:$0xff]   ;;  %p4584_p8 = scmp.lt.s32.totalorder (%p6602_p4), %s4583_s29, 16  ;;  %s8103_s11 = scalar_lea.vmem (%p6602_p4), %s8206_s7, %s5278_s30  }
  0x25   : > { %1714 = vmatprep.subr.bf16.mxu0 %v5972_v28  ;;  %2166 = vmatprep.subr.bf16.mxu1 %v5974_v29  ;;  %v6032_v14 = vld [vmem:[%s8200_s1 + $0x220] ss:$16 sps:$4 sm:$0xff]   ;;  %v429_v15 = vpack.c.bf16 %v331_v11, %v324_v10  ;;  %v330_v18 = vld [vmem:[%s6746_s20 + $0xa8] sm:$0xff]  ;;  %v6040_v19 = vld [vmem:[%s8200_s1 + $0x244] ss:$16 sps:$4 sm:$0xff]  }
  0x26   : > { %v323_v17 = vld [vmem:[%s6746_s20 + $0x70] sm:$0xff]  ;;  %v6043_v20 = vld [vmem:[%s8200_s1 + $0x24c] ss:$16 sps:$4 sm:$0xff]   ;;  %v6041_v22 = vld [vmem:[%s8200_s1 + $0x248] ss:$16 sps:$4 sm:$0xff]  }
  0x27   : > { %v6038_v21 = vld [vmem:[%s8200_s1 + $0x240] ss:$16 sps:$4 sm:$0xff]   ;;  %v428_v23 = vpack.c.bf16 %v330_v18, %v323_v17  ;;  %v338_v24 = vld [vmem:[%s6746_s20 + $0xe8] sm:$0xff]  ;;  %v6046_v26 = vld [vmem:[%s8200_s1 + $0x264] ss:$16 sps:$4 sm:$0xff]  }
  0x28   : > { %1715 = vmatpush1.bf16.msra.mxu0 %v5976_v30  ;;  %2167 = vmatpush1.bf16.msra.mxu1 %v5977_v31  ;;  %v345_v25 = vld [vmem:[%s6746_s20 + $0x120] sm:$0xff]  ;;  %v6049_v27 = vld [vmem:[%s8200_s1 + $0x26c] ss:$16 sps:$4 sm:$0xff]   ;;  %v6047_v30 = vld [vmem:[%s8200_s1 + $0x268] ss:$16 sps:$4 sm:$0xff]  }
  0x29   : > { %1716 = vmatprep.subr.bf16.mxu0 %v5978_v32  ;;  %2168 = vmatprep.subr.bf16.mxu1 %v5980_v33  ;;  %v436_v28 = vpack.c.bf16 %v345_v25, %v338_v24  ;;  %v6044_v29 = vld [vmem:[%s8200_s1 + $0x260] ss:$16 sps:$4 sm:$0xff]   ;;  %v344_v32 = vld [vmem:[%s6746_s20 + $0x118] sm:$0xff]  ;;  %v6052_v33 = vld [vmem:[%s8200_s1 + $0x284] ss:$16 sps:$4 sm:$0xff]  }
  0x2a   : > { %v337_v31 = vld [vmem:[%s6746_s20 + $0xe0] sm:$0xff]  ;;  %v358_v46 = vld [vmem:[%s6746_s20 + $0x188] sm:$0xff]  ;;  %v400_v24 = vld [vmem:[%s6746_s20 + $0x2d8] sm:$0xff] }
  0x2b   : > { %v6062_v49 = vld [vmem:[%s8200_s1 + $0x2c0] ss:$16 sps:$4 sm:$0xff]   ;;  %v366_v51 = vld [vmem:[%s6746_s20 + $0x1c8] sm:$0xff]  ;;  %v6082_v4 = vld [vmem:[%s8200_s1 + $0x324] ss:$16 sps:$4 sm:$0xff]  }
  0x2c   : > { %1717 = vmatpush1.bf16.msra.mxu0 %v5982_v34  ;;  %2169 = vmatpush1.bf16.msra.mxu1 %v5983_v35  ;;  %v6055_v34 = vld [vmem:[%s8200_s1 + $0x28c] ss:$16 sps:$4 sm:$0xff]   ;;  %v6050_v35 = vld [vmem:[%s8200_s1 + $0x280] ss:$16 sps:$4 sm:$0xff]   ;;  %v6077_v3 = vld [vmem:[%s8200_s1 + $0x308] ss:$16 sps:$4 sm:$0xff]  }
  0x2d   : > { %1718 = vmatprep.subr.bf16.mxu0 %v5984_v36  ;;  %2170 = vmatprep.subr.bf16.mxu1 %v5986_v37  ;;  %v6053_v36 = vld [vmem:[%s8200_s1 + $0x288] ss:$16 sps:$4 sm:$0xff]   ;;  %v435_v37 = vpack.c.bf16 %v344_v32, %v337_v31  ;;  %v6088_v11 = vld [vmem:[%s8200_s1 + $0x344] ss:$16 sps:$4 sm:$0xff]  }
  0x2e   : > { %v386_v10 = vld [vmem:[%s6746_s20 + $0x268] sm:$0xff]  ;;  %v401_v17 = vld [vmem:[%s6746_s20 + $0x2e0] sm:$0xff]  ;;  %v415_v31 = vld [vmem:[%s6746_s20 + $0x350] sm:$0xff] }
  0x2f   : > { %v6094_v18 = vld [vmem:[%s8200_s1 + $0x364] ss:$16 sps:$4 sm:$0xff]  }
  0x30   : > { %1719 = vmatpush1.bf16.msra.mxu0 %v5988_v38  ;;  %2171 = vmatpush1.bf16.msra.mxu1 %v5989_v39  ;;  %v352_v38 = vld [vmem:[%s6746_s20 + $0x158] sm:$0xff]  ;;  %v359_v39 = vld [vmem:[%s6746_s20 + $0x190] sm:$0xff] }
  0x31   : > { %1720 = vmatprep.subr.bf16.mxu0 %v5990_v40  ;;  %2172 = vmatprep.subr.bf16.mxu1 %v5992_v41  ;;  %v6058_v40 = vld [vmem:[%s8200_s1 + $0x2a4] ss:$16 sps:$4 sm:$0xff]   ;;  %v6061_v41 = vld [vmem:[%s8200_s1 + $0x2ac] ss:$16 sps:$4 sm:$0xff]  }
  0x32   : > { %v6100_v25 = vld [vmem:[%s8200_s1 + $0x384] ss:$16 sps:$4 sm:$0xff]  }
  0x33   : > { %v6106_v32 = vld [vmem:[%s8200_s1 + $0x3a4] ss:$16 sps:$4 sm:$0xff]  }
  0x34   : > { %1721 = vmatpush1.bf16.msra.mxu0 %v5994_v42  ;;  %2173 = vmatpush1.bf16.msra.mxu1 %v5995_v43  ;;  %v6056_v42 = vld [vmem:[%s8200_s1 + $0x2a0] ss:$16 sps:$4 sm:$0xff]   ;;  %v443_v43 = vpack.c.bf16 %v359_v39, %v352_v38  ;;  %v414_v38 = vld [vmem:[%s6746_s20 + $0x348] sm:$0xff]  ;;  %v6112_v39 = vld [vmem:[%s8200_s1 + $0x3c4] ss:$16 sps:$4 sm:$0xff]  }
  0x35   : > { %1722 = vmatprep.subr.bf16.mxu0 %v5996_v44  ;;  %2174 = vmatprep.subr.bf16.mxu1 %v5998_v45  ;;  %v6059_v44 = vld [vmem:[%s8200_s1 + $0x2a8] ss:$16 sps:$4 sm:$0xff]   ;;  %v351_v45 = vld [vmem:[%s6746_s20 + $0x150] sm:$0xff] }
  0x38   : > { %1723 = vmatpush1.bf16.msra.mxu0 %v6000_v47  ;;  %2175 = vmatpush1.bf16.msra.mxu1 %v6001_v48  ;;  %v6064_v47 = vld [vmem:[%s8200_s1 + $0x2c4] ss:$16 sps:$4 sm:$0xff]   ;;  %v6067_v48 = vld [vmem:[%s8200_s1 + $0x2cc] ss:$16 sps:$4 sm:$0xff]  }
  0x39   : > { %1724 = vmatprep.subr.bf16.mxu0 %v6002_v50  ;;  %2176 = vmatprep.subr.bf16.mxu1 %v6004_v52  ;;  %v442_v50 = vpack.c.bf16 %v358_v46, %v351_v45  ;;  %v373_v52 = vld [vmem:[%s6746_s20 + $0x200] sm:$0xff]  ;;  %v319_v45 = vld [vmem:[%s6746_s20 + $0x50] sm:$0xff] }
  0x3a   : > { %v6118_v46 = vld [vmem:[%s8200_s1 + $0x3e4] ss:$16 sps:$4 sm:$0xff]  }
  0x3c   : > { %1725 = vmatpush1.bf16.msra.mxu0 %v6006_v53  ;;  %2177 = vmatpush1.bf16.msra.mxu1 %v6007_v54  ;;  %v6065_v53 = vld [vmem:[%s8200_s1 + $0x2c8] ss:$16 sps:$4 sm:$0xff]   ;;  %v6070_v54 = vld [vmem:[%s8200_s1 + $0x2e4] ss:$16 sps:$4 sm:$0xff]  }
  0x3d   : > { %1726 = vmatprep.subr.bf16.mxu0 %v6008_v55  ;;  %2178 = vmatprep.subr.bf16.mxu1 %v6010_v56  ;;  %v6073_v55 = vld [vmem:[%s8200_s1 + $0x2ec] ss:$16 sps:$4 sm:$0xff]   ;;  %v6068_v56 = vld [vmem:[%s8200_s1 + $0x2e0] ss:$16 sps:$4 sm:$0xff]  }
  0x40   : > { %1727 = vmatpush1.bf16.msra.mxu0 %v6012_v57  ;;  %2179 = vmatpush1.bf16.msra.mxu1 %v6013_v58  ;;  %v6071_v57 = vld [vmem:[%s8200_s1 + $0x2e8] ss:$16 sps:$4 sm:$0xff]   ;;  %v450_v58 = vpack.c.bf16 %v373_v52, %v366_v51  ;;  %v311_v51 = vld [vmem:[%s6746_s20 + $0x10] sm:$0xff] }
  0x41   : > { %1728 = vmatprep.subr.bf16.mxu0 %v6014_v59  ;;  %2180 = vmatprep.subr.bf16.mxu1 %v6016_v60  ;;  %v365_v59 = vld [vmem:[%s6746_s20 + $0x1c0] sm:$0xff]  ;;  %v372_v60 = vld [vmem:[%s6746_s20 + $0x1f8] sm:$0xff]  ;;  %v318_v52 = vld [vmem:[%s6746_s20 + $0x48] sm:$0xff] }
  0x44   : > { %1729 = vmatpush1.bf16.msra.mxu0 %v6018_v61  ;;  %2181 = vmatpush1.bf16.msra.mxu1 %v6019_v62  ;;  %v6076_v61 = vld [vmem:[%s8200_s1 + $0x304] ss:$16 sps:$4 sm:$0xff]   ;;  %v6079_v62 = vld [vmem:[%s8200_s1 + $0x30c] ss:$16 sps:$4 sm:$0xff]  }
  0x45   : > { %1730 = vmatprep.subr.bf16.mxu0 %v6020_v63  ;;  %2182 = vmatprep.subr.bf16.mxu1 %v6022_v0  ;;  %v449_v63 = vpack.c.bf16 %v372_v60, %v365_v59  ;;  %v380_v0 = vld [vmem:[%s6746_s20 + $0x238] sm:$0xff]  ;;  %v6130_v60 = vld [vmem:[%s8200_s1 + $0x424] ss:$16 sps:$4 sm:$0xff]  }
  0x46   : > { %v6125_v59 = vld [vmem:[%s8200_s1 + $0x408] ss:$16 sps:$4 sm:$0xff]  }
  0x48   : > { %1731 = vmatpush1.bf16.msra.mxu0 %v6024_v1  ;;  %2183 = vmatpush1.bf16.msra.mxu1 %v6025_v2  ;;  %v387_v1 = vld [vmem:[%s6746_s20 + $0x270] sm:$0xff] }
  0x49   : > { %1813 = vmatprep.subr.bf16.mxu0 %v6028_v5  ;;  %2265 = vmatprep.subr.bf16.mxu1 %v6031_v6  ;;  %v6074_v2 = vld [vmem:[%s8200_s1 + $0x300] ss:$16 sps:$4 sm:$0xff]   ;;  %v6085_v5 = vld [vmem:[%s8200_s1 + $0x32c] ss:$16 sps:$4 sm:$0xff]  }
  0x4a   : > { %v6080_v6 = vld [vmem:[%s8200_s1 + $0x320] ss:$16 sps:$4 sm:$0xff]  }
  0x4b   : > { %1733 = vmatmul.mubr.bf16.vlgmr.msra.gmra.mrb[0].mxu0 %v421_v8  ;;  %2185 = vmatmul.mubr.bf16.vlgmr.msra.gmra.mrb[0].mxu1 %v421_v8  ;;  %v457_v8 = vpack.c.bf16 %v387_v1, %v380_v0  ;;  %v325_v1 = vld [vmem:[%s6746_s20 + $0x80] sm:$0xff] }
  0x4c   : > { %1814 = vmatpush1.bf16.msra.mxu0 %v6026_v7  ;;  %2266 = vmatpush1.bf16.msra.mxu1 %v6029_v9  ;;  %v6083_v7 = vld [vmem:[%s8200_s1 + $0x328] ss:$16 sps:$4 sm:$0xff]   ;;  %v379_v9 = vld [vmem:[%s6746_s20 + $0x230] sm:$0xff] }
  0x4d   : > { %1815 = vmatprep.subr.bf16.mxu0 %v6034_v12  ;;  %2267 = vmatprep.subr.bf16.mxu1 %v6037_v13  ;;  %v6091_v12 = vld [vmem:[%s8200_s1 + $0x34c] ss:$16 sps:$4 sm:$0xff]   ;;  %v6086_v13 = vld [vmem:[%s8200_s1 + $0x340] ss:$16 sps:$4 sm:$0xff]  }
  0x4e   : > { %1742 = vmatprep.mubr.bf16.mxu0 %v429_v15  ;;  %2194 = vmatprep.mubr.bf16.mxu1 %v429_v15  ;;  %v6089_v15 = vld [vmem:[%s8200_s1 + $0x348] ss:$16 sps:$4 sm:$0xff]  }
  0x50   : > { %1816 = vmatpush1.bf16.msra.mxu0 %v6032_v14  ;;  %2268 = vmatpush1.bf16.msra.mxu1 %v6035_v16  ;;  %v456_v14 = vpack.c.bf16 %v386_v10, %v379_v9  ;;  %v394_v16 = vld [vmem:[%s6746_s20 + $0x2a8] sm:$0xff]  ;;  %v6142_v10 = vld [vmem:[%s8200_s1 + $0x464] ss:$16 sps:$4 sm:$0xff]  }
  0x51   : > { %1817 = vmatprep.subr.bf16.mxu0 %v6040_v19  ;;  %2269 = vmatprep.subr.bf16.mxu1 %v6043_v20  ;;  %v6097_v19 = vld [vmem:[%s8200_s1 + $0x36c] ss:$16 sps:$4 sm:$0xff]   ;;  %v6092_v20 = vld [vmem:[%s8200_s1 + $0x360] ss:$16 sps:$4 sm:$0xff]   ;;  %v6137_v9 = vld [vmem:[%s8200_s1 + $0x448] ss:$16 sps:$4 sm:$0xff]  }
  0x53   : > { %1743 = vmatmul.mubr.bf16.gmra.mrb[4].mxu0 %v428_v23  ;;  %2195 = vmatmul.mubr.bf16.gmra.mrb[4].mxu1 %v428_v23  ;;  %v393_v23 = vld [vmem:[%s6746_s20 + $0x2a0] sm:$0xff] }
  0x54   : > { %1818 = vmatpush1.bf16.msra.mxu0 %v6038_v21  ;;  %2270 = vmatpush1.bf16.msra.mxu1 %v6041_v22  ;;  %v464_v21 = vpack.c.bf16 %v401_v17, %v394_v16  ;;  %v6095_v22 = vld [vmem:[%s8200_s1 + $0x368] ss:$16 sps:$4 sm:$0xff]   ;;  %v6148_v17 = vld [vmem:[%s8200_s1 + $0x484] ss:$16 sps:$4 sm:$0xff]  }
  0x55   : > { %1819 = vmatprep.subr.bf16.mxu0 %v6046_v26  ;;  %2271 = vmatprep.subr.bf16.mxu1 %v6049_v27  ;;  %v6103_v26 = vld [vmem:[%s8200_s1 + $0x38c] ss:$16 sps:$4 sm:$0xff]   ;;  %v6098_v27 = vld [vmem:[%s8200_s1 + $0x380] ss:$16 sps:$4 sm:$0xff]  }
  0x56   : > { %1752 = vmatprep.mubr.bf16.mxu0 %v436_v28  ;;  %2204 = vmatprep.mubr.bf16.mxu1 %v436_v28  ;;  %v6101_v28 = vld [vmem:[%s8200_s1 + $0x388] ss:$16 sps:$4 sm:$0xff]  }
  0x57   : > { %v346_v16 = vld [vmem:[%s6746_s20 + $0x128] sm:$0xff] }
  0x58   : > { %1820 = vmatpush1.bf16.msra.mxu0 %v6044_v29  ;;  %2272 = vmatpush1.bf16.msra.mxu1 %v6047_v30  ;;  %v463_v29 = vpack.c.bf16 %v400_v24, %v393_v23  ;;  %v408_v30 = vld [vmem:[%s6746_s20 + $0x318] sm:$0xff]  ;;  %v361_v23 = vld [vmem:[%s6746_s20 + $0x1a0] sm:$0xff] }
  0x59   : > { %1821 = vmatprep.subr.bf16.mxu0 %v6052_v33  ;;  %2273 = vmatprep.subr.bf16.mxu1 %v6055_v34  ;;  %v6109_v33 = vld [vmem:[%s8200_s1 + $0x3ac] ss:$16 sps:$4 sm:$0xff]   ;;  %v471_v34 = vpack.c.bf16 %v415_v31, %v408_v30  ;;  %v6154_v24 = vld [vmem:[%s8200_s1 + $0x4a4] ss:$16 sps:$4 sm:$0xff]  }
  0x5a   : > { %v360_v30 = vld [vmem:[%s6746_s20 + $0x198] sm:$0xff]  ;;  %v6160_v31 = vld [vmem:[%s8200_s1 + $0x4c4] ss:$16 sps:$4 sm:$0xff]  }
  0x5b   : > { %1753 = vmatmul.mubr.bf16.gmra.mrb[8].mxu0 %v435_v37  ;;  %2205 = vmatmul.mubr.bf16.gmra.mrb[8].mxu1 %v435_v37  ;;  %v407_v37 = vld [vmem:[%s6746_s20 + $0x310] sm:$0xff] }
  0x5c   : > { %1822 = vmatpush1.bf16.msra.mxu0 %v6050_v35  ;;  %2274 = vmatpush1.bf16.msra.mxu1 %v6053_v36  ;;  %v6104_v35 = vld [vmem:[%s8200_s1 + $0x3a0] ss:$16 sps:$4 sm:$0xff]   ;;  %v6107_v36 = vld [vmem:[%s8200_s1 + $0x3a8] ss:$16 sps:$4 sm:$0xff]  }
  0x5d   : > { %1823 = vmatprep.subr.bf16.mxu0 %v6058_v40  ;;  %2275 = vmatprep.subr.bf16.mxu1 %v6061_v41  ;;  %v6115_v40 = vld [vmem:[%s8200_s1 + $0x3cc] ss:$16 sps:$4 sm:$0xff]   ;;  %v6110_v41 = vld [vmem:[%s8200_s1 + $0x3c0] ss:$16 sps:$4 sm:$0xff]  }
  0x5e   : > { %1762 = vmatprep.mubr.bf16.mxu0 %v443_v43  ;;  %2214 = vmatprep.mubr.bf16.mxu1 %v443_v43  ;;  %v470_v43 = vpack.c.bf16 %v414_v38, %v407_v37  ;;  %v6161_v37 = vld [vmem:[%s8200_s1 + $0x4c8] ss:$16 sps:$4 sm:$0xff]   ;;  %v6166_v38 = vld [vmem:[%s8200_s1 + $0x4e4] ss:$16 sps:$4 sm:$0xff]  }
  0x60   : > { %1824 = vmatpush1.bf16.msra.mxu0 %v6056_v42  ;;  %2276 = vmatpush1.bf16.msra.mxu1 %v6059_v44  ;;  %v6113_v42 = vld [vmem:[%s8200_s1 + $0x3c8] ss:$16 sps:$4 sm:$0xff]  }
  0x61   : > { %1825 = vmatprep.subr.bf16.mxu0 %v6064_v47  ;;  %2277 = vmatprep.subr.bf16.mxu1 %v6067_v48  ;;  %v312_v44 = vld [vmem:[%s6746_s20 + $0x18] sm:$0xff]  ;;  %v6116_v48 = vld [vmem:[%s8200_s1 + $0x3e0] ss:$16 sps:$4 sm:$0xff]  }
  0x62   : > { %v6121_v47 = vld [vmem:[%s8200_s1 + $0x3ec] ss:$16 sps:$4 sm:$0xff]  }
  0x63   : > { %1763 = vmatmul.mubr.bf16.gmra.mrb[12].mxu0 %v442_v50  ;;  %2215 = vmatmul.mubr.bf16.gmra.mrb[12].mxu1 %v442_v50  ;;  %v6119_v50 = vld [vmem:[%s8200_s1 + $0x3e8] ss:$16 sps:$4 sm:$0xff]  }
  0x64   : > { %1826 = vmatpush1.bf16.msra.mxu0 %v6062_v49  ;;  %2278 = vmatpush1.bf16.msra.mxu1 %v6065_v53  ;;  %v424_v49 = vpack.c.bf16 %v319_v45, %v312_v44  ;;  %v6124_v53 = vld [vmem:[%s8200_s1 + $0x404] ss:$16 sps:$4 sm:$0xff]   ;;  %v374_v44 = vld [vmem:[%s6746_s20 + $0x208] sm:$0xff] }
  0x65   : > { %1827 = vmatprep.subr.bf16.mxu0 %v6070_v54  ;;  %2279 = vmatprep.subr.bf16.mxu1 %v6073_v55  ;;  %v6127_v54 = vld [vmem:[%s8200_s1 + $0x40c] ss:$16 sps:$4 sm:$0xff]   ;;  %v6122_v55 = vld [vmem:[%s8200_s1 + $0x400] ss:$16 sps:$4 sm:$0xff]   ;;  %v6172_v45 = vld [vmem:[%s8200_s1 + $0x504] ss:$16 sps:$4 sm:$0xff]  }
  0x66   : > { %1772 = vmatprep.mubr.bf16.mxu0 %v450_v58  ;;  %2224 = vmatprep.mubr.bf16.mxu1 %v450_v58  ;;  %v333_v58 = vld [vmem:[%s6746_s20 + $0xc0] sm:$0xff] }
  0x68   : > { %1828 = vmatpush1.bf16.msra.mxu0 %v6068_v56  ;;  %2280 = vmatpush1.bf16.msra.mxu1 %v6071_v57  ;;  %v423_v56 = vpack.c.bf16 %v318_v52, %v311_v51  ;;  %v326_v57 = vld [vmem:[%s6746_s20 + $0x88] sm:$0xff]  ;;  %v6178_v52 = vld [vmem:[%s8200_s1 + $0x524] ss:$16 sps:$4 sm:$0xff]  }
  0x69   : > { %1829 = vmatprep.subr.bf16.mxu0 %v6076_v61  ;;  %2281 = vmatprep.subr.bf16.mxu1 %v6079_v62  ;;  %v6133_v61 = vld [vmem:[%s8200_s1 + $0x42c] ss:$16 sps:$4 sm:$0xff]   ;;  %v6128_v62 = vld [vmem:[%s8200_s1 + $0x420] ss:$16 sps:$4 sm:$0xff]   ;;  %v431_v0 = vpack.c.bf16 %v333_v58, %v326_v57  ;;  %v6173_v51 = vld [vmem:[%s8200_s1 + $0x508] ss:$16 sps:$4 sm:$0xff]  }
  0x6a   : > { %v381_v57 = vld [vmem:[%s6746_s20 + $0x240] sm:$0xff]  ;;  %v388_v58 = vld [vmem:[%s6746_s20 + $0x278] sm:$0xff] }
  0x6b   : > { %1773 = vmatmul.mubr.bf16.gmra.mrb[16].mxu0 %v449_v63  ;;  %2225 = vmatmul.mubr.bf16.gmra.mrb[16].mxu1 %v449_v63  ;;  %v6131_v63 = vld [vmem:[%s8200_s1 + $0x428] ss:$16 sps:$4 sm:$0xff]  }
  0x6c   : > { %1830 = vmatpush1.bf16.msra.mxu0 %v6074_v2  ;;  %2282 = vmatpush1.bf16.msra.mxu1 %v6077_v3  ;;  %v332_v2 = vld [vmem:[%s6746_s20 + $0xb8] sm:$0xff]  ;;  %v6136_v3 = vld [vmem:[%s8200_s1 + $0x444] ss:$16 sps:$4 sm:$0xff]  }
  0x6d   : > { %1831 = vmatprep.subr.bf16.mxu0 %v6082_v4  ;;  %2283 = vmatprep.subr.bf16.mxu1 %v6085_v5  ;;  %v6139_v4 = vld [vmem:[%s8200_s1 + $0x44c] ss:$16 sps:$4 sm:$0xff]   ;;  %v430_v5 = vpack.c.bf16 %v332_v2, %v325_v1  ;;  %v458_v1 = vpack.c.bf16 %v388_v58, %v381_v57  ;;  %v6190_v2 = vld [vmem:[%s8200_s1 + $0x564] ss:$16 sps:$4 sm:$0xff]  }
  0x6e   : > { %1782 = vmatprep.mubr.bf16.mxu0 %v457_v8  ;;  %2234 = vmatprep.mubr.bf16.mxu1 %v457_v8  ;;  %v6134_v8 = vld [vmem:[%s8200_s1 + $0x440] ss:$16 sps:$4 sm:$0xff]  }
  0x70   : > { %1832 = vmatpush1.bf16.msra.mxu0 %v6080_v6  ;;  %2284 = vmatpush1.bf16.msra.mxu1 %v6083_v7  ;;  %v340_v6 = vld [vmem:[%s6746_s20 + $0xf8] sm:$0xff]  ;;  %v347_v7 = vld [vmem:[%s6746_s20 + $0x130] sm:$0xff] }
  0x71   : > { %1833 = vmatprep.subr.bf16.mxu0 %v6088_v11  ;;  %2285 = vmatprep.subr.bf16.mxu1 %v6091_v12  ;;  %v6145_v11 = vld [vmem:[%s8200_s1 + $0x46c] ss:$16 sps:$4 sm:$0xff]   ;;  %v6140_v12 = vld [vmem:[%s8200_s1 + $0x460] ss:$16 sps:$4 sm:$0xff]  }
  0x73   : > { %1783 = vmatmul.mubr.bf16.gmra.mrb[20].mxu0 %v456_v14  ;;  %2235 = vmatmul.mubr.bf16.gmra.mrb[20].mxu1 %v456_v14  ;;  %v438_v14 = vpack.c.bf16 %v347_v7, %v340_v6  ;;  %v395_v7 = vld [vmem:[%s6746_s20 + $0x2b0] sm:$0xff] }
  0x74   : > { %1834 = vmatpush1.bf16.msra.mxu0 %v6086_v13  ;;  %2286 = vmatpush1.bf16.msra.mxu1 %v6089_v15  ;;  %v6143_v13 = vld [vmem:[%s8200_s1 + $0x468] ss:$16 sps:$4 sm:$0xff]   ;;  %v339_v15 = vld [vmem:[%s6746_s20 + $0xf0] sm:$0xff] }
  0x75   : > { %1835 = vmatprep.subr.bf16.mxu0 %v6094_v18  ;;  %2287 = vmatprep.subr.bf16.mxu1 %v6097_v19  ;;  %v6151_v18 = vld [vmem:[%s8200_s1 + $0x48c] ss:$16 sps:$4 sm:$0xff]   ;;  %v6146_v19 = vld [vmem:[%s8200_s1 + $0x480] ss:$16 sps:$4 sm:$0xff]  }
  0x76   : > { %1792 = vmatprep.mubr.bf16.mxu0 %v464_v21  ;;  %2244 = vmatprep.mubr.bf16.mxu1 %v464_v21  ;;  %v6149_v21 = vld [vmem:[%s8200_s1 + $0x488] ss:$16 sps:$4 sm:$0xff]  }
  0x78   : > { %1836 = vmatpush1.bf16.msra.mxu0 %v6092_v20  ;;  %2288 = vmatpush1.bf16.msra.mxu1 %v6095_v22  ;;  %v437_v20 = vpack.c.bf16 %v346_v16, %v339_v15  ;;  %v354_v22 = vld [vmem:[%s6746_s20 + $0x168] sm:$0xff]  ;;  %v6202_v16 = vld [vmem:[%s8200_s1 + $0x5a4] ss:$16 sps:$4 sm:$0xff]  }
  0x79   : > { %1837 = vmatprep.subr.bf16.mxu0 %v6100_v25  ;;  %2289 = vmatprep.subr.bf16.mxu1 %v6103_v26  ;;  %v6157_v25 = vld [vmem:[%s8200_s1 + $0x4ac] ss:$16 sps:$4 sm:$0xff]   ;;  %v6152_v26 = vld [vmem:[%s8200_s1 + $0x4a0] ss:$16 sps:$4 sm:$0xff]  }
  0x7b   : > { %1793 = vmatmul.mubr.bf16.gmra.mrb[24].mxu0 %v463_v29  ;;  %2245 = vmatmul.mubr.bf16.gmra.mrb[24].mxu1 %v463_v29  ;;  %v353_v29 = vld [vmem:[%s6746_s20 + $0x160] sm:$0xff] }
  0x7c   : > { %1838 = vmatpush1.bf16.msra.mxu0 %v6098_v27  ;;  %2290 = vmatpush1.bf16.msra.mxu1 %v6101_v28  ;;  %v445_v27 = vpack.c.bf16 %v361_v23, %v354_v22  ;;  %v6155_v28 = vld [vmem:[%s8200_s1 + $0x4a8] ss:$16 sps:$4 sm:$0xff]   ;;  %v6208_v23 = vld [vmem:[%s8200_s1 + $0x5c4] ss:$16 sps:$4 sm:$0xff]  }
  0x7d   : > { %1839 = vmatprep.subr.bf16.mxu0 %v6106_v32  ;;  %2291 = vmatprep.subr.bf16.mxu1 %v6109_v33  ;;  %v6163_v32 = vld [vmem:[%s8200_s1 + $0x4cc] ss:$16 sps:$4 sm:$0xff]   ;;  %v444_v33 = vpack.c.bf16 %v360_v30, %v353_v29  ;;  %v6214_v30 = vld [vmem:[%s8200_s1 + $0x5e4] ss:$16 sps:$4 sm:$0xff]  }
  0x7e   : > { %1802 = vmatprep.mubr.bf16.mxu0 %v471_v34  ;;  %2254 = vmatprep.mubr.bf16.mxu1 %v471_v34  ;;  %v368_v34 = vld [vmem:[%s6746_s20 + $0x1d8] sm:$0xff] }
  0x7f   : > { %v416_v22 = vld [vmem:[%s6746_s20 + $0x358] sm:$0xff] }
  0x80   : > { %1840 = vmatpush1.bf16.msra.mxu0 %v6104_v35  ;;  %2292 = vmatpush1.bf16.msra.mxu1 %v6107_v36  ;;  %v375_v35 = vld [vmem:[%s6746_s20 + $0x210] sm:$0xff] }
  0x81   : > { %1841 = vmatprep.subr.bf16.mxu0 %v6112_v39  ;;  %2293 = vmatprep.subr.bf16.mxu1 %v6115_v40  ;;  %v6158_v36 = vld [vmem:[%s8200_s1 + $0x4c0] ss:$16 sps:$4 sm:$0xff]   ;;  %v6169_v39 = vld [vmem:[%s8200_s1 + $0x4ec] ss:$16 sps:$4 sm:$0xff]   ;;  %v452_v40 = vpack.c.bf16 %v375_v35, %v368_v34  ;;  %v6215_v34 = vld [vmem:[%s8200_s1 + $0x5e8] ss:$16 sps:$4 sm:$0xff]  }
  0x82   : > { %v313_v35 = vld [vmem:[%s6746_s20 + $0x20] sm:$0xff] }
  0x83   : > { %1803 = vmatmul.mubr.bf16.gmra.mrb[28].mxu0 %v470_v43  ;;  %2255 = vmatmul.mubr.bf16.gmra.mrb[28].mxu1 %v470_v43  ;;  %v367_v43 = vld [vmem:[%s6746_s20 + $0x1d0] sm:$0xff] }
  0x84   : > { %1842 = vmatpush1.bf16.msra.mxu0 %v6110_v41  ;;  %2294 = vmatpush1.bf16.msra.mxu1 %v6113_v42  ;;  %v6164_v41 = vld [vmem:[%s8200_s1 + $0x4e0] ss:$16 sps:$4 sm:$0xff]   ;;  %v6167_v42 = vld [vmem:[%s8200_s1 + $0x4e8] ss:$16 sps:$4 sm:$0xff]  }
  0x85   : > { %1843 = vmatprep.subr.bf16.mxu0 %v6118_v46  ;;  %2295 = vmatprep.subr.bf16.mxu1 %v6121_v47  ;;  %v6175_v46 = vld [vmem:[%s8200_s1 + $0x50c] ss:$16 sps:$4 sm:$0xff]   ;;  %v451_v47 = vpack.c.bf16 %v374_v44, %v367_v43  ;;  %v6221_v44 = vld [vmem:[%s8200_s1 + $0x608] ss:$16 sps:$4 sm:$0xff]  }
  0x86   : > { %1845 = vmatprep.mubr.bf16.mxu0 %v424_v49  ;;  %2297 = vmatprep.mubr.bf16.mxu1 %v424_v49  ;;  %v389_v49 = vld [vmem:[%s6746_s20 + $0x280] sm:$0xff] }
  0x88   : > { %1844 = vmatpush1.bf16.msra.mxu0 %v6116_v48  ;;  %2296 = vmatpush1.bf16.msra.mxu1 %v6119_v50  ;;  %v382_v48 = vld [vmem:[%s6746_s20 + $0x248] sm:$0xff]  ;;  %v6170_v50 = vld [vmem:[%s8200_s1 + $0x500] ss:$16 sps:$4 sm:$0xff]  }
  0x89   : > { %1926 = vmatprep.subr.bf16.mxu0 %v6124_v53  ;;  %2378 = vmatprep.subr.bf16.mxu1 %v6127_v54  ;;  %v6181_v53 = vld [vmem:[%s8200_s1 + $0x52c] ss:$16 sps:$4 sm:$0xff]   ;;  %v459_v54 = vpack.c.bf16 %v389_v49, %v382_v48 }
  0x8a   : > { %v334_v48 = vld [vmem:[%s6746_s20 + $0xc8] sm:$0xff] }
  0x8b   : > { %1846 = vmatmul.mubr.bf16.vlgmr.msra.gmra.mrb[0].mxu0 %v423_v56  ;;  %2298 = vmatmul.mubr.bf16.vlgmr.msra.gmra.mrb[0].mxu1 %v423_v56  ;;  %v6179_v56 = vld [vmem:[%s8200_s1 + $0x528] ss:$16 sps:$4 sm:$0xff]  }
  0x8c   : > { %1927 = vmatpush1.bf16.msra.mxu0 %v6122_v55  ;;  %2379 = vmatpush1.bf16.msra.mxu1 %v6125_v59  ;;  %v6176_v55 = vld [vmem:[%s8200_s1 + $0x520] ss:$16 sps:$4 sm:$0xff]   ;;  %v6184_v59 = vld [vmem:[%s8200_s1 + $0x544] ss:$16 sps:$4 sm:$0xff]   ;;  %v342_v49 = vld [vmem:[%s6746_s20 + $0x108] sm:$0xff] }
  0x8d   : > { %1928 = vmatprep.subr.bf16.mxu0 %v6130_v60  ;;  %2380 = vmatprep.subr.bf16.mxu1 %v6133_v61  ;;  %v6187_v60 = vld [vmem:[%s8200_s1 + $0x54c] ss:$16 sps:$4 sm:$0xff]   ;;  %v6182_v61 = vld [vmem:[%s8200_s1 + $0x540] ss:$16 sps:$4 sm:$0xff]  }
  0x8e   : > { %1855 = vmatprep.mubr.bf16.mxu0 %v431_v0  ;;  %2307 = vmatprep.mubr.bf16.mxu1 %v431_v0  ;;  %v403_v0 = vld [vmem:[%s6746_s20 + $0x2f0] sm:$0xff] }
  0x90   : > { %1929 = vmatpush1.bf16.msra.mxu0 %v6128_v62  ;;  %2381 = vmatpush1.bf16.msra.mxu1 %v6131_v63  ;;  %v6185_v62 = vld [vmem:[%s8200_s1 + $0x548] ss:$16 sps:$4 sm:$0xff]  }
  0x91   : > { %1930 = vmatprep.subr.bf16.mxu0 %v6136_v3  ;;  %2382 = vmatprep.subr.bf16.mxu1 %v6139_v4  ;;  %v396_v63 = vld [vmem:[%s6746_s20 + $0x2b8] sm:$0xff]  ;;  %v6188_v4 = vld [vmem:[%s8200_s1 + $0x560] ss:$16 sps:$4 sm:$0xff]  }
  0x92   : > { %v6193_v3 = vld [vmem:[%s8200_s1 + $0x56c] ss:$16 sps:$4 sm:$0xff]   ;;  %v466_v6 = vpack.c.bf16 %v403_v0, %v396_v63 }
  0x93   : > { %1856 = vmatmul.mubr.bf16.gmra.mrb[4].mxu0 %v430_v5  ;;  %2308 = vmatmul.mubr.bf16.gmra.mrb[4].mxu1 %v430_v5  ;;  %v6191_v5 = vld [vmem:[%s8200_s1 + $0x568] ss:$16 sps:$4 sm:$0xff]  }
  0x94   : > { %1931 = vmatpush1.bf16.msra.mxu0 %v6134_v8  ;;  %2383 = vmatpush1.bf16.msra.mxu1 %v6137_v9  ;;  %v402_v8 = vld [vmem:[%s6746_s20 + $0x2e8] sm:$0xff]  ;;  %v6196_v9 = vld [vmem:[%s8200_s1 + $0x584] ss:$16 sps:$4 sm:$0xff]  }
  0x95   : > { %1932 = vmatprep.subr.bf16.mxu0 %v6142_v10  ;;  %2384 = vmatprep.subr.bf16.mxu1 %v6145_v11  ;;  %v6199_v10 = vld [vmem:[%s8200_s1 + $0x58c] ss:$16 sps:$4 sm:$0xff]   ;;  %v465_v15 = vpack.c.bf16 %v402_v8, %v395_v7  ;;  %v383_v7 = vld [vmem:[%s6746_s20 + $0x250] sm:$0xff] }
  0x96   : > { %1865 = vmatprep.mubr.bf16.mxu0 %v438_v14  ;;  %2317 = vmatprep.mubr.bf16.mxu1 %v438_v14  ;;  %v410_v11 = vld [vmem:[%s6746_s20 + $0x328] sm:$0xff] }
  0x97   : > { %v6197_v14 = vld [vmem:[%s8200_s1 + $0x588] ss:$16 sps:$4 sm:$0xff]  }
  0x98   : > { %1933 = vmatpush1.bf16.msra.mxu0 %v6140_v12  ;;  %2385 = vmatpush1.bf16.msra.mxu1 %v6143_v13  ;;  %v417_v12 = vld [vmem:[%s6746_s20 + $0x360] sm:$0xff]  ;;  %v390_v8 = vld [vmem:[%s6746_s20 + $0x288] sm:$0xff] }
  0x99   : > { %1934 = vmatprep.subr.bf16.mxu0 %v6148_v17  ;;  %2386 = vmatprep.subr.bf16.mxu1 %v6151_v18  ;;  %v6194_v13 = vld [vmem:[%s8200_s1 + $0x580] ss:$16 sps:$4 sm:$0xff]   ;;  %v6205_v17 = vld [vmem:[%s8200_s1 + $0x5ac] ss:$16 sps:$4 sm:$0xff]  }
  0x9a   : > { %v6200_v18 = vld [vmem:[%s8200_s1 + $0x5a0] ss:$16 sps:$4 sm:$0xff]  }
  0x9b   : > { %1866 = vmatmul.mubr.bf16.gmra.mrb[8].mxu0 %v437_v20  ;;  %2318 = vmatmul.mubr.bf16.gmra.mrb[8].mxu1 %v437_v20  ;;  %v473_v20 = vpack.c.bf16 %v417_v12, %v410_v11  ;;  %v460_v11 = vpack.c.bf16 %v390_v8, %v383_v7  ;;  %v6275_v7 = vld [vmem:[%s8202_s3 + $0x108] ss:$16 sps:$4 sm:$0xff]   ;;  %v6280_v8 = vld [vmem:[%s8202_s3 + $0x124] ss:$16 sps:$4 sm:$0xff]  }
  0x9c   : > { %1935 = vmatpush1.bf16.msra.mxu0 %v6146_v19  ;;  %2387 = vmatpush1.bf16.msra.mxu1 %v6149_v21  ;;  %v6203_v19 = vld [vmem:[%s8200_s1 + $0x5a8] ss:$16 sps:$4 sm:$0xff]   ;;  %v409_v21 = vld [vmem:[%s6746_s20 + $0x320] sm:$0xff] }
  0x9d   : > { %1936 = vmatprep.subr.bf16.mxu0 %v6154_v24  ;;  %2388 = vmatprep.subr.bf16.mxu1 %v6157_v25  ;;  %v6211_v24 = vld [vmem:[%s8200_s1 + $0x5cc] ss:$16 sps:$4 sm:$0xff]   ;;  %v472_v29 = vpack.c.bf16 %v416_v22, %v409_v21  ;;  %v6536_v22 = vmov 0  }
  0x9e   : > { %1875 = vmatprep.mubr.bf16.mxu0 %v445_v27  ;;  %2327 = vmatprep.mubr.bf16.mxu1 %v445_v27  ;;  %v314_v25 = vld [vmem:[%s6746_s20 + $0x28] sm:$0xff]  ;;  %v6206_v27 = vld [vmem:[%s8200_s1 + $0x5c0] ss:$16 sps:$4 sm:$0xff]  }
  0xa0   : > { %1937 = vmatpush1.bf16.msra.mxu0 %v6152_v26  ;;  %2389 = vmatpush1.bf16.msra.mxu1 %v6155_v28  ;;  %v321_v26 = vld [vmem:[%s6746_s20 + $0x60] sm:$0xff]  ;;  %v6209_v28 = vld [vmem:[%s8200_s1 + $0x5c8] ss:$16 sps:$4 sm:$0xff]  }
  0xa1   : > { %1938 = vmatprep.subr.bf16.mxu0 %v6160_v31  ;;  %2390 = vmatprep.subr.bf16.mxu1 %v6163_v32  ;;  %v6217_v31 = vld [vmem:[%s8200_s1 + $0x5ec] ss:$16 sps:$4 sm:$0xff]   ;;  %v426_v32 = vpack.c.bf16 %v321_v26, %v314_v25  ;;  %v6224_v26 = vld [vmem:[%s8202_s3] ss:$16 sps:$4 sm:$0xff]  }
  0xa3   : > { %1876 = vmatmul.mubr.bf16.gmra.mrb[12].mxu0 %v444_v33  ;;  %2328 = vmatmul.mubr.bf16.gmra.mrb[12].mxu1 %v444_v33  ;;  %v6212_v33 = vld [vmem:[%s8200_s1 + $0x5e0] ss:$16 sps:$4 sm:$0xff]  }
  0xa4   : > { %1939 = vmatpush1.bf16.msra.mxu0 %v6158_v36  ;;  %2391 = vmatpush1.bf16.msra.mxu1 %v6161_v37  ;;  %v320_v36 = vld [vmem:[%s6746_s20 + $0x58] sm:$0xff]  ;;  %v6220_v37 = vld [vmem:[%s8200_s1 + $0x604] ss:$16 sps:$4 sm:$0xff]  }
  0xa5   : > { %1940 = vmatprep.subr.bf16.mxu0 %v6166_v38  ;;  %2392 = vmatprep.subr.bf16.mxu1 %v6169_v39  ;;  %v328_v38 = vld [vmem:[%s6746_s20 + $0x98] sm:$0xff]  ;;  %v335_v39 = vld [vmem:[%s6746_s20 + $0xd0] sm:$0xff] }
  0xa6   : > { %1885 = vmatprep.mubr.bf16.mxu0 %v452_v40  ;;  %2337 = vmatprep.mubr.bf16.mxu1 %v452_v40  ;;  %v6223_v40 = vld [vmem:[%s8200_s1 + $0x60c] ss:$16 sps:$4 sm:$0xff]   ;;  %v433_v43 = vpack.c.bf16 %v335_v39, %v328_v38  ;;  %v6239_v38 = vld [vmem:[%s8202_s3 + $0x48] ss:$16 sps:$4 sm:$0xff]   ;;  %v6244_v39 = vld [vmem:[%s8202_s3 + $0x64] ss:$16 sps:$4 sm:$0xff]  }
  0xa8   : > { %1941 = vmatpush1.bf16.msra.mxu0 %v6164_v41  ;;  %2393 = vmatpush1.bf16.msra.mxu1 %v6167_v42  ;;  %v425_v41 = vpack.c.bf16 %v320_v36, %v313_v35  ;;  %v6218_v42 = vld [vmem:[%s8200_s1 + $0x600] ss:$16 sps:$4 sm:$0xff]   ;;  %v6241_v35 = vld [vmem:[%s8202_s3 + $0x4c] ss:$16 sps:$4 sm:$0xff]  }
  0xa9   : > { %1942 = vmatprep.subr.bf16.mxu0 %v6172_v45  ;;  %2394 = vmatprep.subr.bf16.mxu1 %v6175_v46  ;;  %v6226_v45 = vld [vmem:[%s8202_s3 + $0x4] ss:$16 sps:$4 sm:$0xff]   ;;  %v6229_v46 = vld [vmem:[%s8202_s3 + $0xc] ss:$16 sps:$4 sm:$0xff]  }
  0xab   : > { %1886 = vmatmul.mubr.bf16.gmra.mrb[16].mxu0 %v451_v47  ;;  %2338 = vmatmul.mubr.bf16.gmra.mrb[16].mxu1 %v451_v47  ;;  %v327_v47 = vld [vmem:[%s6746_s20 + $0x90] sm:$0xff] }
  0xac   : > { %1943 = vmatpush1.bf16.msra.mxu0 %v6170_v50  ;;  %2395 = vmatpush1.bf16.msra.mxu1 %v6173_v51  ;;  %v349_v50 = vld [vmem:[%s6746_s20 + $0x140] sm:$0xff]  ;;  %v432_v51 = vpack.c.bf16 %v334_v48, %v327_v47 }
  0xad   : > { %1944 = vmatprep.subr.bf16.mxu0 %v6178_v52  ;;  %2396 = vmatprep.subr.bf16.mxu1 %v6181_v53  ;;  %v440_v52 = vpack.c.bf16 %v349_v50, %v342_v49  ;;  %v341_v53 = vld [vmem:[%s6746_s20 + $0x100] sm:$0xff]  ;;  %v6251_v49 = vld [vmem:[%s8202_s3 + $0x88] ss:$16 sps:$4 sm:$0xff]  }
  0xae   : > { %1895 = vmatprep.mubr.bf16.mxu0 %v459_v54  ;;  %2347 = vmatprep.mubr.bf16.mxu1 %v459_v54  ;;  %v348_v54 = vld [vmem:[%s6746_s20 + $0x138] sm:$0xff]  ;;  %v6248_v48 = vld [vmem:[%s8202_s3 + $0x80] ss:$16 sps:$4 sm:$0xff]   ;;  %v6256_v50 = vld [vmem:[%s8202_s3 + $0xa4] ss:$16 sps:$4 sm:$0xff]  }
  0xaf   : > { %v439_v57 = vpack.c.bf16 %v348_v54, %v341_v53  ;;  %v364_v53 = vld [vmem:[%s6746_s20 + $0x1b8] sm:$0xff]  ;;  %v6254_v54 = vld [vmem:[%s8202_s3 + $0xa0] ss:$16 sps:$4 sm:$0xff]  }
  0xb0   : > { %1945 = vmatpush1.bf16.msra.mxu0 %v6176_v55  ;;  %2397 = vmatpush1.bf16.msra.mxu1 %v6179_v56  ;;  %v356_v55 = vld [vmem:[%s6746_s20 + $0x178] sm:$0xff]  ;;  %v363_v56 = vld [vmem:[%s6746_s20 + $0x1b0] sm:$0xff] }
  0xb1   : > { %1946 = vmatprep.subr.bf16.mxu0 %v6184_v59  ;;  %2398 = vmatprep.subr.bf16.mxu1 %v6187_v60  ;;  %v447_v58 = vpack.c.bf16 %v363_v56, %v356_v55  ;;  %v355_v59 = vld [vmem:[%s6746_s20 + $0x170] sm:$0xff]  ;;  %v362_v60 = vld [vmem:[%s6746_s20 + $0x1a8] sm:$0xff] }
  0xb2   : > { %v446_v63 = vpack.c.bf16 %v362_v60, %v355_v59  ;;  %v6257_v55 = vld [vmem:[%s8202_s3 + $0xa8] ss:$16 sps:$4 sm:$0xff]   ;;  %v6262_v56 = vld [vmem:[%s8202_s3 + $0xc4] ss:$16 sps:$4 sm:$0xff]   ;;  %v6260_v59 = vld [vmem:[%s8202_s3 + $0xc0] ss:$16 sps:$4 sm:$0xff]  }
  0xb3   : > { %1896 = vmatmul.mubr.bf16.gmra.mrb[20].mxu0 %v458_v1  ;;  %2348 = vmatmul.mubr.bf16.gmra.mrb[20].mxu1 %v458_v1  ;;  %v369_v1 = vld [vmem:[%s6746_s20 + $0x1e0] sm:$0xff]  ;;  %v6263_v60 = vld [vmem:[%s8202_s3 + $0xc8] ss:$16 sps:$4 sm:$0xff]  }
  0xb4   : > { %1947 = vmatpush1.bf16.msra.mxu0 %v6182_v61  ;;  %2399 = vmatpush1.bf16.msra.mxu1 %v6185_v62  ;;  %v370_v61 = vld [vmem:[%s6746_s20 + $0x1e8] sm:$0xff]  ;;  %v377_v62 = vld [vmem:[%s6746_s20 + $0x220] sm:$0xff] }
  0xb5   : > { %1948 = vmatprep.subr.bf16.mxu0 %v6190_v2  ;;  %2400 = vmatprep.subr.bf16.mxu1 %v6193_v3  ;;  %v454_v0 = vpack.c.bf16 %v377_v62, %v370_v61  ;;  %v376_v2 = vld [vmem:[%s6746_s20 + $0x218] sm:$0xff]  ;;  %v6268_v61 = vld [vmem:[%s8202_s3 + $0xe4] ss:$16 sps:$4 sm:$0xff]  }
  0xb6   : > { %1905 = vmatprep.mubr.bf16.mxu0 %v466_v6  ;;  %2357 = vmatprep.mubr.bf16.mxu1 %v466_v6  ;;  %v384_v3 = vld [vmem:[%s6746_s20 + $0x258] sm:$0xff] }
  0xb7   : > { %v6271_v62 = vld [vmem:[%s8202_s3 + $0xec] ss:$16 sps:$4 sm:$0xff]  }
  0xb8   : > { %1949 = vmatpush1.bf16.msra.mxu0 %v6188_v4  ;;  %2401 = vmatpush1.bf16.msra.mxu1 %v6191_v5  ;;  %v391_v4 = vld [vmem:[%s6746_s20 + $0x290] sm:$0xff]  ;;  %v453_v5 = vpack.c.bf16 %v376_v2, %v369_v1  ;;  %v6269_v2 = vld [vmem:[%s8202_s3 + $0xe8] ss:$16 sps:$4 sm:$0xff]  }
  0xb9   : > { %1950 = vmatprep.subr.bf16.mxu0 %v6196_v9  ;;  %2402 = vmatprep.subr.bf16.mxu1 %v6199_v10  ;;  %v461_v6 = vpack.c.bf16 %v391_v4, %v384_v3  ;;  %v398_v9 = vld [vmem:[%s6746_s20 + $0x2c8] sm:$0xff]  ;;  %v405_v10 = vld [vmem:[%s6746_s20 + $0x300] sm:$0xff] }
  0xba   : > { %v468_v12 = vpack.c.bf16 %v405_v10, %v398_v9  ;;  %v6266_v1 = vld [vmem:[%s8202_s3 + $0xe0] ss:$16 sps:$4 sm:$0xff]   ;;  %v6274_v3 = vld [vmem:[%s8202_s3 + $0x104] ss:$16 sps:$4 sm:$0xff]   ;;  %v6277_v4 = vld [vmem:[%s8202_s3 + $0x10c] ss:$16 sps:$4 sm:$0xff]  }
  0xbb   : > { %1906 = vmatmul.mubr.bf16.gmra.mrb[24].mxu0 %v465_v15  ;;  %2358 = vmatmul.mubr.bf16.gmra.mrb[24].mxu1 %v465_v15  ;;  %v412_v15 = vld [vmem:[%s6746_s20 + $0x338] sm:$0xff]  ;;  %v385_v10 = vld [vmem:[%s6746_s20 + $0x260] sm:$0xff] }
  0xbc   : > { %1951 = vmatpush1.bf16.msra.mxu0 %v6194_v13  ;;  %2403 = vmatpush1.bf16.msra.mxu1 %v6197_v14  ;;  %v397_v13 = vld [vmem:[%s6746_s20 + $0x2c0] sm:$0xff]  ;;  %v404_v14 = vld [vmem:[%s6746_s20 + $0x2f8] sm:$0xff] }
  0xbd   : > { %1952 = vmatprep.subr.bf16.mxu0 %v6202_v16  ;;  %2404 = vmatprep.subr.bf16.mxu1 %v6205_v17  ;;  %v419_v16 = vld [vmem:[%s6746_s20 + $0x370] sm:$0xff]  ;;  %v467_v17 = vpack.c.bf16 %v404_v14, %v397_v13  ;;  %v6283_v9 = vld [vmem:[%s8202_s3 + $0x12c] ss:$16 sps:$4 sm:$0xff]   ;;  %v6281_v13 = vld [vmem:[%s8202_s3 + $0x128] ss:$16 sps:$4 sm:$0xff]  }
  0xbe   : > { %1915 = vmatprep.mubr.bf16.mxu0 %v473_v20  ;;  %2367 = vmatprep.mubr.bf16.mxu1 %v473_v20  ;;  %v418_v20 = vld [vmem:[%s6746_s20 + $0x368] sm:$0xff]  ;;  %v6286_v14 = vld [vmem:[%s8202_s3 + $0x144] ss:$16 sps:$4 sm:$0xff]  }
  0xc0   : > { %1953 = vmatpush1.bf16.msra.mxu0 %v6200_v18  ;;  %2405 = vmatpush1.bf16.msra.mxu1 %v6203_v19  ;;  %v475_v18 = vpack.c.bf16 %v419_v16, %v412_v15  ;;  %v411_v19 = vld [vmem:[%s6746_s20 + $0x330] sm:$0xff]  ;;  %v6289_v15 = vld [vmem:[%s8202_s3 + $0x14c] ss:$16 sps:$4 sm:$0xff]  }
  0xc1   : > { %1954 = vmatprep.subr.bf16.mxu0 %v6208_v23  ;;  %2406 = vmatprep.subr.bf16.mxu1 %v6211_v24  ;;  %v474_v21 = vpack.c.bf16 %v418_v20, %v411_v19  ;;  %v315_v23 = vld [vmem:[%s6746_s20 + $0x30] sm:$0xff]  ;;  %v322_v24 = vld [vmem:[%s6746_s20 + $0x68] sm:$0xff] }
  0xc2   : > { %v427_v25 = vpack.c.bf16 %v322_v24, %v315_v23  ;;  %v6292_v19 = vld [vmem:[%s8202_s3 + $0x164] ss:$16 sps:$4 sm:$0xff]   ;;  %v6295_v20 = vld [vmem:[%s8202_s3 + $0x16c] ss:$16 sps:$4 sm:$0xff]   ;;  %v6290_v24 = vld [vmem:[%s8202_s3 + $0x160] ss:$16 sps:$4 sm:$0xff]  }
  0xc3   : > { %1916 = vmatmul.mubr.bf16.gmra.mrb[28].mxu0 %v472_v29  ;;  %2368 = vmatmul.mubr.bf16.gmra.mrb[28].mxu1 %v472_v29  ;;  %v6235_v29 = vld [vmem:[%s8202_s3 + $0x2c] ss:$16 sps:$4 sm:$0xff]  }
  0xc4   : > { %1955 = vmatpush1.bf16.msra.mxu0 %v6206_v27  ;;  %2407 = vmatpush1.bf16.msra.mxu1 %v6209_v28  ;;  %v6227_v27 = vld [vmem:[%s8202_s3 + $0x8] ss:$16 sps:$4 sm:$0xff]   ;;  %v6232_v28 = vld [vmem:[%s8202_s3 + $0x24] ss:$16 sps:$4 sm:$0xff]  }
  0xc5   : > { %1956 = vmatprep.subr.bf16.mxu0 %v6214_v30  ;;  %2408 = vmatprep.subr.bf16.mxu1 %v6217_v31  ;;  %v329_v30 = vld [vmem:[%s6746_s20 + $0xa0] sm:$0xff]  ;;  %v336_v31 = vld [vmem:[%s6746_s20 + $0xd8] sm:$0xff]  ;;  %v406_v23 = vld [vmem:[%s6746_s20 + $0x308] sm:$0xff] }
  0xc6   : > { %1958 = vmatprep.mubr.bf16.mxu0 %v426_v32  ;;  %2410 = vmatprep.mubr.bf16.mxu1 %v426_v32  ;;  %v6230_v32 = vld [vmem:[%s8202_s3 + $0x20] ss:$16 sps:$4 sm:$0xff]   ;;  %v434_v36 = vpack.c.bf16 %v336_v31, %v329_v30  ;;  %v6299_v30 = vld [vmem:[%s8202_s3 + $0x188] ss:$16 sps:$4 sm:$0xff]   ;;  %v6304_v31 = vld [vmem:[%s8202_s3 + $0x1a4] ss:$16 sps:$4 sm:$0xff]  }
  0xc8   : > { %1957 = vmatpush1.bf16.msra.mxu0 %v6212_v33  ;;  %2409 = vmatpush1.bf16.msra.mxu1 %v6215_v34  ;;  %v6233_v33 = vld [vmem:[%s8202_s3 + $0x28] ss:$16 sps:$4 sm:$0xff]   ;;  %v6238_v34 = vld [vmem:[%s8202_s3 + $0x44] ss:$16 sps:$4 sm:$0xff]  }
  0xc9   : > { %2039 = vmatprep.subr.bf16.mxu0 %v6220_v37  ;;  %2491 = vmatprep.subr.bf16.mxu1 %v6223_v40  ;;  %v6236_v37 = vld [vmem:[%s8202_s3 + $0x40] ss:$16 sps:$4 sm:$0xff]   ;;  %v6247_v40 = vld [vmem:[%s8202_s3 + $0x6c] ss:$16 sps:$4 sm:$0xff]  }
  0xcb   : > { %1959 = vmatmul.mubr.bf16.vlgmr.msra.gmra.mrb[0].mxu0 %v425_v41  ;;  %2411 = vmatmul.mubr.bf16.vlgmr.msra.gmra.mrb[0].mxu1 %v425_v41  ;;  %v343_v41 = vld [vmem:[%s6746_s20 + $0x110] sm:$0xff] }
  0xcc   : > { %2040 = vmatpush1.bf16.msra.mxu0 %v6218_v42  ;;  %1968 = vmatprep.mubr.bf16.mxu0 %v433_v43  ;;  %v350_v42 = vld [vmem:[%s6746_s20 + $0x148] sm:$0xff] }
  0xcd   : > { %2420 = vmatprep.mubr.bf16.mxu1 %v433_v43  ;;  %2492 = vmatpush1.bf16.msra.mxu1 %v6221_v44  ;;  %v6242_v43 = vld [vmem:[%s8202_s3 + $0x60] ss:$16 sps:$4 sm:$0xff]   ;;  %v6245_v44 = vld [vmem:[%s8202_s3 + $0x68] ss:$16 sps:$4 sm:$0xff]   ;;  %v441_v47 = vpack.c.bf16 %v350_v42, %v343_v41  ;;  %v6316_v41 = vld [vmem:[%s8202_s3 + $0x1e4] ss:$16 sps:$4 sm:$0xff]  }
  0xce   : > { %3490 = vmatprep.subr.bf16.mxu0 %v6226_v45  ;;  %3716 = vmatprep.subr.bf16.mxu1 %v6229_v46  ;;  %v6250_v45 = vld [vmem:[%s8202_s3 + $0x84] ss:$16 sps:$4 sm:$0xff]   ;;  %v6253_v46 = vld [vmem:[%s8202_s3 + $0x8c] ss:$16 sps:$4 sm:$0xff]  }
  0xcf   : > { %v6319_v42 = vld [vmem:[%s8202_s3 + $0x1ec] ss:$16 sps:$4 sm:$0xff]  }
  0xd3   : > { %1969 = vmatmul.mubr.bf16.gmra.mrb[4].mxu0 %v432_v51  ;;  %2421 = vmatmul.mubr.bf16.gmra.mrb[4].mxu1 %v432_v51  ;;  %v6259_v51 = vld [vmem:[%s8202_s3 + $0xac] ss:$16 sps:$4 sm:$0xff]  }
  0xd4   : > { %1978 = vmatprep.mubr.bf16.mxu0 %v440_v52  ;;  %2430 = vmatprep.mubr.bf16.mxu1 %v440_v52  ;;  %v357_v52 = vld [vmem:[%s6746_s20 + $0x180] sm:$0xff] }
  0xdb   : > { %1979 = vmatmul.mubr.bf16.gmra.mrb[8].mxu0 %v439_v57  ;;  %2431 = vmatmul.mubr.bf16.gmra.mrb[8].mxu1 %v439_v57  ;;  %v6265_v57 = vld [vmem:[%s8202_s3 + $0xcc] ss:$16 sps:$4 sm:$0xff]  }
  0xdc   : > { %1988 = vmatprep.mubr.bf16.mxu0 %v447_v58  ;;  %2440 = vmatprep.mubr.bf16.mxu1 %v447_v58  ;;  %v448_v58 = vpack.c.bf16 %v364_v53, %v357_v52 }
  0xe3   : > { %1989 = vmatmul.mubr.bf16.gmra.mrb[12].mxu0 %v446_v63  ;;  %2441 = vmatmul.mubr.bf16.gmra.mrb[12].mxu1 %v446_v63  ;;  %v371_v63 = vld [vmem:[%s6746_s20 + $0x1f0] sm:$0xff] }
  0xe4   : > { %1998 = vmatprep.mubr.bf16.mxu0 %v454_v0  ;;  %2450 = vmatprep.mubr.bf16.mxu1 %v454_v0  ;;  %v378_v0 = vld [vmem:[%s6746_s20 + $0x228] sm:$0xff] }
  0xeb   : > { %1999 = vmatmul.mubr.bf16.gmra.mrb[16].mxu0 %v453_v5  ;;  %2451 = vmatmul.mubr.bf16.gmra.mrb[16].mxu1 %v453_v5  ;;  %v455_v5 = vpack.c.bf16 %v378_v0, %v371_v63 }
  0xec   : > { %2008 = vmatprep.mubr.bf16.mxu0 %v461_v6  ;;  %2460 = vmatprep.mubr.bf16.mxu1 %v461_v6  ;;  %v6272_v6 = vld [vmem:[%s8202_s3 + $0x100] ss:$16 sps:$4 sm:$0xff]  }
  0xf3   : > { %2009 = vmatmul.mubr.bf16.gmra.mrb[20].mxu0 %v460_v11  ;;  %2461 = vmatmul.mubr.bf16.gmra.mrb[20].mxu1 %v460_v11  ;;  %v392_v11 = vld [vmem:[%s6746_s20 + $0x298] sm:$0xff] }
  0xf4   : > { %2018 = vmatprep.mubr.bf16.mxu0 %v468_v12  ;;  %2470 = vmatprep.mubr.bf16.mxu1 %v468_v12  ;;  %v6278_v12 = vld [vmem:[%s8202_s3 + $0x120] ss:$16 sps:$4 sm:$0xff]   ;;  %v462_v16 = vpack.c.bf16 %v392_v11, %v385_v10 }
  0xfb   : > { %2019 = vmatmul.mubr.bf16.gmra.mrb[24].mxu0 %v467_v17  ;;  %2471 = vmatmul.mubr.bf16.gmra.mrb[24].mxu1 %v467_v17  ;;  %v6284_v17 = vld [vmem:[%s8202_s3 + $0x140] ss:$16 sps:$4 sm:$0xff]  }
  0xfc   : > { %2028 = vmatprep.mubr.bf16.mxu0 %v475_v18  ;;  %2480 = vmatprep.mubr.bf16.mxu1 %v475_v18  ;;  %v6287_v18 = vld [vmem:[%s8202_s3 + $0x148] ss:$16 sps:$4 sm:$0xff]  }
 0x103   : > { %2029 = vmatmul.mubr.bf16.gmra.mrb[28].mxu0 %v474_v21  ;;  %2481 = vmatmul.mubr.bf16.gmra.mrb[28].mxu1 %v474_v21  ;;  %v399_v21 = vld [vmem:[%s6746_s20 + $0x2d0] sm:$0xff] }
 0x104   : > { %2071 = vmatprep.mubr.bf16.mxu0 %v6536_v22  ;;  %2523 = vmatprep.mubr.bf16.mxu1 %v6536_v22 }
 0x10b   : > { %5052 = vmatmul.mubr.msk.bf16.vlgmr.msra.gmra.mrb[0].mxu0 %vm1675_vm0, %v427_v25  ;;  %5060 = vmatmul.mubr.msk.bf16.vlgmr.msra.gmra.mrb[0].mxu1 %vm1675_vm0, %v427_v25  ;;  %v6293_v25 = vld [vmem:[%s8202_s3 + $0x168] ss:$16 sps:$4 sm:$0xff]  }
 0x10c   : > { %2081 = vmatprep.mubr.bf16.mxu0 %v6536_v22  ;;  %2533 = vmatprep.mubr.bf16.mxu1 %v6536_v22 }
 0x10d   : > { %3491 = vmatpush1.bf16.msra.mxu0 %v6224_v26  ;;  %3717 = vmatpush1.bf16.msra.mxu1 %v6227_v27  ;;  %v6298_v26 = vld [vmem:[%s8202_s3 + $0x184] ss:$16 sps:$4 sm:$0xff]   ;;  %v6301_v27 = vld [vmem:[%s8202_s3 + $0x18c] ss:$16 sps:$4 sm:$0xff]  }
 0x10e   : > { %3492 = vmatprep.subr.bf16.mxu0 %v6232_v28  ;;  %3718 = vmatprep.subr.bf16.mxu1 %v6235_v29  ;;  %v469_v28 = vpack.c.bf16 %v406_v23, %v399_v21  ;;  %v6296_v29 = vld [vmem:[%s8202_s3 + $0x180] ss:$16 sps:$4 sm:$0xff]  }
 0x111   : > { %3493 = vmatpush1.bf16.msra.mxu0 %v6230_v32  ;;  %3719 = vmatpush1.bf16.msra.mxu1 %v6233_v33  ;;  %v6307_v32 = vld [vmem:[%s8202_s3 + $0x1ac] ss:$16 sps:$4 sm:$0xff]   ;;  %v413_v33 = vld [vmem:[%s6746_s20 + $0x340] sm:$0xff] }
 0x112   : > { %3494 = vmatprep.subr.bf16.mxu0 %v6238_v34  ;;  %3720 = vmatprep.subr.bf16.mxu1 %v6241_v35  ;;  %v420_v34 = vld [vmem:[%s6746_s20 + $0x378] sm:$0xff]  ;;  %v6302_v35 = vld [vmem:[%s8202_s3 + $0x1a0] ss:$16 sps:$4 sm:$0xff]  }
 0x113   : > { %5053 = vmatmul.mubr.msk.bf16.gmra.mrb[4].mxu0 %vm1675_vm0, %v434_v36  ;;  %5061 = vmatmul.mubr.msk.bf16.gmra.mrb[4].mxu1 %vm1675_vm0, %v434_v36  ;;  %v6305_v36 = vld [vmem:[%s8202_s3 + $0x1a8] ss:$16 sps:$4 sm:$0xff]  }
 0x114   : > { %2091 = vmatprep.mubr.bf16.mxu0 %v6536_v22  ;;  %2543 = vmatprep.mubr.bf16.mxu1 %v6536_v22 }
 0x115   : > { %3495 = vmatpush1.bf16.msra.mxu0 %v6236_v37  ;;  %3721 = vmatpush1.bf16.msra.mxu1 %v6239_v38  ;;  %v476_v37 = vpack.c.bf16 %v420_v34, %v413_v33  ;;  %v6313_v38 = vld [vmem:[%s8202_s3 + $0x1cc] ss:$16 sps:$4 sm:$0xff]  }
 0x116   : > { %3496 = vmatprep.subr.bf16.mxu0 %v6244_v39  ;;  %3722 = vmatprep.subr.bf16.mxu1 %v6247_v40  ;;  %v6308_v39 = vld [vmem:[%s8202_s3 + $0x1c0] ss:$16 sps:$4 sm:$0xff]   ;;  %v6311_v40 = vld [vmem:[%s8202_s3 + $0x1c8] ss:$16 sps:$4 sm:$0xff]  }
 0x119   : > { %3497 = vmatpush1.bf16.msra.mxu0 %v6242_v43  ;;  %3723 = vmatpush1.bf16.msra.mxu1 %v6245_v44  ;;  %v6314_v43 = vld [vmem:[%s8202_s3 + $0x1e0] ss:$16 sps:$4 sm:$0xff]   ;;  %v6317_v44 = vld [vmem:[%s8202_s3 + $0x1e8] ss:$16 sps:$4 sm:$0xff]  }
 0x11a   : > { %3498 = vmatprep.subr.bf16.mxu0 %v6250_v45  ;;  %3724 = vmatprep.subr.bf16.mxu1 %v6253_v46  ;;  %v6322_v45 = vld [vmem:[%s8202_s3 + $0x204] ss:$16 sps:$4 sm:$0xff]   ;;  %v6325_v46 = vld [vmem:[%s8202_s3 + $0x20c] ss:$16 sps:$4 sm:$0xff]  }
 0x11b   : > { %5054 = vmatmul.mubr.msk.bf16.gmra.mrb[8].mxu0 %vm1675_vm0, %v441_v47  ;;  %5062 = vmatmul.mubr.msk.bf16.gmra.mrb[8].mxu1 %vm1675_vm0, %v441_v47  ;;  %v675_v47 = vlaneseq }
 0x11c   : > { %2101 = vmatprep.mubr.bf16.mxu0 %v6536_v22  ;;  %2553 = vmatprep.mubr.bf16.mxu1 %v6536_v22 }
 0x11d   : > { %3499 = vmatpush1.bf16.msra.mxu0 %v6248_v48  ;;  %3725 = vmatpush1.bf16.msra.mxu1 %v6251_v49  ;;  %v7546_v48 = vshrl.u32 %v675_v47, 7 }
 0x11e   : > { %3500 = vmatprep.subr.bf16.mxu0 %v6256_v50  ;;  %3726 = vmatprep.subr.bf16.mxu1 %v6259_v51  ;;  %v673_v51 = vld [vmem:[%s8201_s2] sm:$0xf] }
 0x11f   : > { %v677_v49 = vsub.s32 0, %v7546_v48  ;;  %v685_v50 = vsub.s32 2, %v7546_v48  ;;  %v681_v52 = vsub.s32 1, %v7546_v48  ;;  %v689_v53 = vsub.s32 3, %v7546_v48 }
 0x121   : > { %3501 = vmatpush1.bf16.msra.mxu0 %v6254_v54  ;;  %3727 = vmatpush1.bf16.msra.mxu1 %v6257_v55  ;;  %v7557_v54 = vrot.slane %v673_v51, %v677_v49  ;;  %v7561_v55 = vrot.slane %v673_v51, %v685_v50 }
 0x122   : > { %3502 = vmatprep.subr.bf16.mxu0 %v6262_v56  ;;  %3728 = vmatprep.subr.bf16.mxu1 %v6265_v57  ;;  %v7565_v56 = vrot.slane %v673_v51, %v681_v52  ;;  %v7569_v57 = vrot.slane %v673_v51, %v689_v53 }
 0x123   : > { %5055 = vmatmul.mubr.msk.bf16.gmra.mrb[12].mxu0 %vm1675_vm0, %v448_v58  ;;  %5063 = vmatmul.mubr.msk.bf16.gmra.mrb[12].mxu1 %vm1675_vm0, %v448_v58 }
 0x124   : > { %2111 = vmatprep.mubr.bf16.mxu0 %v6536_v22  ;;  %2563 = vmatprep.mubr.bf16.mxu1 %v6536_v22 }
 0x125   : > { %3503 = vmatpush1.bf16.msra.mxu0 %v6260_v59  ;;  %3729 = vmatpush1.bf16.msra.mxu1 %v6263_v60 }
 0x126   : > { %3504 = vmatprep.subr.bf16.mxu0 %v6268_v61  ;;  %3730 = vmatprep.subr.bf16.mxu1 %v6271_v62 }
 0x129   : > { %3505 = vmatpush1.bf16.msra.mxu0 %v6266_v1  ;;  %3731 = vmatpush1.bf16.msra.mxu1 %v6269_v2 }
 0x12a   : > { %3506 = vmatprep.subr.bf16.mxu0 %v6274_v3  ;;  %3732 = vmatprep.subr.bf16.mxu1 %v6277_v4 }
 0x12b   : > { %5056 = vmatmul.mubr.msk.bf16.gmra.mrb[16].mxu0 %vm1675_vm0, %v455_v5  ;;  %5064 = vmatmul.mubr.msk.bf16.gmra.mrb[16].mxu1 %vm1675_vm0, %v455_v5 }
 0x12c   : > { %2121 = vmatprep.mubr.bf16.mxu0 %v6536_v22  ;;  %2573 = vmatprep.mubr.bf16.mxu1 %v6536_v22 }
 0x12d   : > { %3507 = vmatpush1.bf16.msra.mxu0 %v6272_v6  ;;  %3733 = vmatpush1.bf16.msra.mxu1 %v6275_v7 }
 0x12e   : > { %3508 = vmatprep.subr.bf16.mxu0 %v6280_v8  ;;  %3734 = vmatprep.subr.bf16.mxu1 %v6283_v9 }
 0x131   : > { %3509 = vmatpush1.bf16.msra.mxu0 %v6278_v12  ;;  %3735 = vmatpush1.bf16.msra.mxu1 %v6281_v13 }
 0x132   : > { %3510 = vmatprep.subr.bf16.mxu0 %v6286_v14  ;;  %3736 = vmatprep.subr.bf16.mxu1 %v6289_v15 }
 0x133   : > { %5057 = vmatmul.mubr.msk.bf16.gmra.mrb[20].mxu0 %vm1675_vm0, %v462_v16  ;;  %5065 = vmatmul.mubr.msk.bf16.gmra.mrb[20].mxu1 %vm1675_vm0, %v462_v16 }
 0x134   : > { %2131 = vmatprep.mubr.bf16.mxu0 %v6536_v22  ;;  %2583 = vmatprep.mubr.bf16.mxu1 %v6536_v22 }
 0x135   : > { %3511 = vmatpush1.bf16.msra.mxu0 %v6284_v17  ;;  %3737 = vmatpush1.bf16.msra.mxu1 %v6287_v18 }
 0x136   : > { %3512 = vmatprep.subr.bf16.mxu0 %v6292_v19  ;;  %3738 = vmatprep.subr.bf16.mxu1 %v6295_v20 }
 0x139   : > { %3513 = vmatpush1.bf16.msra.mxu0 %v6290_v24  ;;  %3739 = vmatpush1.bf16.msra.mxu1 %v6293_v25  ;;  %v6320_v25 = vld [vmem:[%s8202_s3 + $0x200] ss:$16 sps:$4 sm:$0xff]  }
 0x13a   : > { %3514 = vmatprep.subr.bf16.mxu0 %v6298_v26  ;;  %3740 = vmatprep.subr.bf16.mxu1 %v6301_v27  ;;  %v6323_v26 = vld [vmem:[%s8202_s3 + $0x208] ss:$16 sps:$4 sm:$0xff]  }
 0x13b   : > { %5058 = vmatmul.mubr.msk.bf16.gmra.mrb[24].mxu0 %vm1675_vm0, %v469_v28  ;;  %5066 = vmatmul.mubr.msk.bf16.gmra.mrb[24].mxu1 %vm1675_vm0, %v469_v28 }
 0x13c   : > { %2141 = vmatprep.mubr.bf16.mxu0 %v6536_v22  ;;  %2593 = vmatprep.mubr.bf16.mxu1 %v6536_v22  ;;  %v6310_v22 = vld [vmem:[%s8202_s3 + $0x1c4] ss:$16 sps:$4 sm:$0xff]  }
 0x13d   : > { %3515 = vmatpush1.bf16.msra.mxu0 %v6296_v29  ;;  %3741 = vmatpush1.bf16.msra.mxu1 %v6299_v30 }
 0x13e   : > { %3516 = vmatprep.subr.bf16.mxu0 %v6304_v31  ;;  %3742 = vmatprep.subr.bf16.mxu1 %v6307_v32  ;;  %v6328_v31 = vld [vmem:[%s8202_s3 + $0x224] ss:$16 sps:$4 sm:$0xff]   ;;  %v6331_v32 = vld [vmem:[%s8202_s3 + $0x22c] ss:$16 sps:$4 sm:$0xff]  }
 0x141   : > { %3517 = vmatpush1.bf16.msra.mxu0 %v6302_v35  ;;  %3743 = vmatpush1.bf16.msra.mxu1 %v6305_v36 }
 0x142   : > { %3518 = vmatprep.subr.bf16.mxu0 %v6310_v22  ;;  %3744 = vmatprep.subr.bf16.mxu1 %v6313_v38 }
 0x143   : > { %5059 = vmatmul.mubr.msk.bf16.gmra.mrb[28].mxu0 %vm1675_vm0, %v476_v37  ;;  %5067 = vmatmul.mubr.msk.bf16.gmra.mrb[28].mxu1 %vm1675_vm0, %v476_v37 }
 0x145   : > { %3519 = vmatpush1.bf16.msra.mxu0 %v6308_v39  ;;  %3745 = vmatpush1.bf16.msra.mxu1 %v6311_v40 }
 0x146   : > { %3520 = vmatprep.subr.bf16.mxu0 %v6316_v41  ;;  %3746 = vmatprep.subr.bf16.mxu1 %v6319_v42  ;;  %v6326_v42 = vld [vmem:[%s8202_s3 + $0x220] ss:$16 sps:$4 sm:$0xff]  }
 0x149   : > { %3521 = vmatpush1.bf16.msra.mxu0 %v6314_v43  ;;  %3747 = vmatpush1.bf16.msra.mxu1 %v6317_v44  ;;  %v6329_v43 = vld [vmem:[%s8202_s3 + $0x228] ss:$16 sps:$4 sm:$0xff]   ;;  %v6334_v44 = vld [vmem:[%s8202_s3 + $0x244] ss:$16 sps:$4 sm:$0xff]  }
 0x14a   : > { %3603 = vmatprep.subr.bf16.mxu0 %v6322_v45  ;;  %3829 = vmatprep.subr.bf16.mxu1 %v6325_v46 }
 0x1de   : > { %v2073_v58 = vpop.f32.mrb[0].mxu0  ;;  %v2525_v59 = vpop.f32.mrb[0].mxu1 }
 0x1df   : > { %v5456_v60 = vadd.f32 %v2073_v58, %v7557_v54  ;;  %v5488_v61 = vadd.f32 %v2525_v59, %v7561_v55  ;;  %v2075_v62 = vpop.f32.mrb[1].mxu0  ;;  %v2527_v63 = vpop.f32.mrb[1].mxu1  ;;  %v6337_v58 = vld [vmem:[%s8202_s3 + $0x24c] ss:$16 sps:$4 sm:$0xff]  }
 0x1e0   : > { %v5457_v0 = vadd.f32 %v2075_v62, %v7565_v56  ;;  %v5489_v1 = vadd.f32 %v2527_v63, %v7569_v57  ;;  %v2077_v2 = vpop.f32.mrb[2].mxu0  ;;  %v2529_v3 = vpop.f32.mrb[2].mxu1 }
 0x1e1   : > { %v5458_v4 = vadd.f32 %v2077_v2, %v7557_v54  ;;  %v5490_v5 = vadd.f32 %v2529_v3, %v7561_v55  ;;  %v2079_v6 = vpop.f32.mrb[3].mxu0  ;;  %v2531_v7 = vpop.f32.mrb[3].mxu1  ;;  %v2604_v10 = vmax.f32 %v5456_v60, 0.0  ;;  %v2606_v11 = vmax.f32 %v5488_v61, 0.0 }
 0x1e2   : > { %v5459_v8 = vadd.f32 %v2079_v6, %v7565_v56  ;;  %v5491_v9 = vadd.f32 %v2531_v7, %v7569_v57  ;;  %v2605_v14 = vmax.f32 %v5457_v0, 0.0  ;;  %v2607_v15 = vmax.f32 %v5489_v1, 0.0  ;;  %v6335_v6 = vld [vmem:[%s8202_s3 + $0x248] ss:$16 sps:$4 sm:$0xff]  }
 0x1e3   : > { %v2608_v12 = vmax.f32 %v5458_v4, 0.0  ;;  %v2610_v13 = vmax.f32 %v5490_v5, 0.0  ;;  %v6332_v5 = vld [vmem:[%s8202_s3 + $0x240] ss:$16 sps:$4 sm:$0xff]  }
 0x1e4   : > { %v2609_v16 = vmax.f32 %v5459_v8, 0.0  ;;  %v2611_v17 = vmax.f32 %v5491_v9, 0.0 }
 0x1e5   : > { %v2668_v18 = vpack.c.bf16 %v2608_v12, %v2604_v10  ;;  %v7579_v19 = vpack.c.bf16 %v2610_v13, %v2606_v11  ;;  %v6340_v11 = vld [vmem:[%s8202_s3 + $0x264] ss:$16 sps:$4 sm:$0xff]   ;;  %v6343_v12 = vld [vmem:[%s8202_s3 + $0x26c] ss:$16 sps:$4 sm:$0xff]  }
 0x1e6   : > { %v2669_v20 = vpack.c.bf16 %v2609_v16, %v2605_v14  ;;  %v7581_v21 = vpack.c.bf16 %v2611_v17, %v2607_v15  ;;  %v2083_v23 = vpop.f32.mrb[4].mxu0  ;;  %v2535_v24 = vpop.f32.mrb[4].mxu1 }
 0x1e7   : > { %v5460_v27 = vadd.f32 %v2083_v23, %v7557_v54  ;;  %v5492_v28 = vadd.f32 %v2535_v24, %v7561_v55  ;;  %v2085_v29 = vpop.f32.mrb[5].mxu0  ;;  %v2537_v30 = vpop.f32.mrb[5].mxu1 }
 0x1e8   : > { %v5461_v33 = vadd.f32 %v2085_v29, %v7565_v56  ;;  %v5493_v34 = vadd.f32 %v2537_v30, %v7569_v57  ;;  %v2087_v35 = vpop.f32.mrb[6].mxu0  ;;  %v2539_v36 = vpop.f32.mrb[6].mxu1  ;;  %3522 = vmatprep.mubr.bf16.mxu0 %v2669_v20  ;;  %3748 = vmatprep.mubr.bf16.mxu1 %v2669_v20 }
 0x1e9   : > { %v5462_v37 = vadd.f32 %v2087_v35, %v7557_v54  ;;  %v5494_v22 = vadd.f32 %v2539_v36, %v7561_v55  ;;  %v2089_v38 = vpop.f32.mrb[7].mxu0  ;;  %v2541_v39 = vpop.f32.mrb[7].mxu1  ;;  %3523 = vmatmul.mubr.bf16.vlgmr.msra.gmra.mrb[32].mxu0 %v2668_v18  ;;  %3749 = vmatmul.mubr.bf16.vlgmr.msra.gmra.mrb[32].mxu1 %v2668_v18  ;;  %v2612_v45 = vmax.f32 %v5460_v27, 0.0  ;;  %v2614_v46 = vmax.f32 %v5492_v28, 0.0  ;;  %v6341_v27 = vld [vmem:[%s8202_s3 + $0x268] ss:$16 sps:$4 sm:$0xff]  }
 0x1ea   : > { %v5463_v40 = vadd.f32 %v2089_v38, %v7565_v56  ;;  %v5495_v41 = vadd.f32 %v2541_v39, %v7569_v57  ;;  %3604 = vmatpush1.bf16.msra.mxu0 %v6320_v25  ;;  %3830 = vmatpush1.bf16.msra.mxu1 %v6323_v26  ;;  %v2613_v59 = vmax.f32 %v5461_v33, 0.0  ;;  %v2615_v60 = vmax.f32 %v5493_v34, 0.0  ;;  %v6338_v26 = vld [vmem:[%s8202_s3 + $0x260] ss:$16 sps:$4 sm:$0xff]   ;;  %v6346_v28 = vld [vmem:[%s8202_s3 + $0x284] ss:$16 sps:$4 sm:$0xff]  }
 0x1eb   : > { %v2616_v47 = vmax.f32 %v5462_v37, 0.0  ;;  %v2618_v51 = vmax.f32 %v5494_v22, 0.0  ;;  %3605 = vmatprep.subr.bf16.mxu0 %v6328_v31  ;;  %3831 = vmatprep.subr.bf16.mxu1 %v6331_v32  ;;  %v6349_v33 = vld [vmem:[%s8202_s3 + $0x28c] ss:$16 sps:$4 sm:$0xff]  }
 0x1ec   : > { %v2617_v61 = vmax.f32 %v5463_v40, 0.0  ;;  %v2619_v62 = vmax.f32 %v5495_v41, 0.0 }
 0x1ed   : > { %v2672_v63 = vpack.c.bf16 %v2616_v47, %v2612_v45  ;;  %v7615_v0 = vpack.c.bf16 %v2618_v51, %v2614_v46 }
 0x1ee   : > { %v2673_v1 = vpack.c.bf16 %v2617_v61, %v2613_v59  ;;  %v7617_v2 = vpack.c.bf16 %v2619_v62, %v2615_v60  ;;  %v2093_v3 = vpop.f32.mrb[8].mxu0  ;;  %v2545_v4 = vpop.f32.mrb[8].mxu1  ;;  %3606 = vmatpush1.bf16.msra.mxu0 %v6326_v42  ;;  %3832 = vmatpush1.bf16.msra.mxu1 %v6329_v43  ;;  %v6344_v43 = vld [vmem:[%s8202_s3 + $0x280] ss:$16 sps:$4 sm:$0xff]   ;;  %v6355_v59 = vld [vmem:[%s8202_s3 + $0x2ac] ss:$16 sps:$4 sm:$0xff]  }
 0x1ef   : > { %v5464_v7 = vadd.f32 %v2093_v3, %v7557_v54  ;;  %v5496_v8 = vadd.f32 %v2545_v4, %v7561_v55  ;;  %v2095_v9 = vpop.f32.mrb[9].mxu0  ;;  %v2547_v10 = vpop.f32.mrb[9].mxu1  ;;  %3607 = vmatprep.subr.bf16.mxu0 %v6334_v44  ;;  %3833 = vmatprep.subr.bf16.mxu1 %v6337_v58  ;;  %v6347_v44 = vld [vmem:[%s8202_s3 + $0x288] ss:$16 sps:$4 sm:$0xff]   ;;  %v6352_v58 = vld [vmem:[%s8202_s3 + $0x2a4] ss:$16 sps:$4 sm:$0xff]  }
 0x1f0   : > { %v5465_v13 = vadd.f32 %v2095_v9, %v7565_v56  ;;  %v5497_v14 = vadd.f32 %v2547_v10, %v7569_v57  ;;  %v2097_v15 = vpop.f32.mrb[10].mxu0  ;;  %v2549_v16 = vpop.f32.mrb[10].mxu1  ;;  %3532 = vmatprep.mubr.bf16.mxu0 %v2673_v1  ;;  %3758 = vmatprep.mubr.bf16.mxu1 %v2673_v1  ;;  %v6353_v9 = vld [vmem:[%s8202_s3 + $0x2a8] ss:$16 sps:$4 sm:$0xff]   ;;  %v6358_v10 = vld [vmem:[%s8202_s3 + $0x2c4] ss:$16 sps:$4 sm:$0xff]  }
 0x1f1   : > { %v5466_v17 = vadd.f32 %v2097_v15, %v7557_v54  ;;  %v5498_v18 = vadd.f32 %v2549_v16, %v7561_v55  ;;  %v2099_v20 = vpop.f32.mrb[11].mxu0  ;;  %v2551_v23 = vpop.f32.mrb[11].mxu1  ;;  %3533 = vmatmul.mubr.bf16.gmra.mrb[36].mxu0 %v2672_v63  ;;  %3759 = vmatmul.mubr.bf16.gmra.mrb[36].mxu1 %v2672_v63  ;;  %v2620_v29 = vmax.f32 %v5464_v7, 0.0  ;;  %v2622_v30 = vmax.f32 %v5496_v8, 0.0  ;;  %v6350_v8 = vld [vmem:[%s8202_s3 + $0x2a0] ss:$16 sps:$4 sm:$0xff]  }
 0x1f2   : > { %v5467_v24 = vadd.f32 %v2099_v20, %v7565_v56  ;;  %v5499_v25 = vadd.f32 %v2551_v23, %v7569_v57  ;;  %3608 = vmatpush1.bf16.msra.mxu0 %v6332_v5  ;;  %3834 = vmatpush1.bf16.msra.mxu1 %v6335_v6  ;;  %v2621_v34 = vmax.f32 %v5465_v13, 0.0  ;;  %v2623_v35 = vmax.f32 %v5497_v14, 0.0  ;;  %v6361_v15 = vld [vmem:[%s8202_s3 + $0x2cc] ss:$16 sps:$4 sm:$0xff]  }
 0x1f3   : > { %v2624_v31 = vmax.f32 %v5466_v17, 0.0  ;;  %v2626_v32 = vmax.f32 %v5498_v18, 0.0  ;;  %3609 = vmatprep.subr.bf16.mxu0 %v6340_v11  ;;  %3835 = vmatprep.subr.bf16.mxu1 %v6343_v12 }
 0x1f4   : > { %v2625_v36 = vmax.f32 %v5467_v24, 0.0  ;;  %v2627_v37 = vmax.f32 %v5499_v25, 0.0 }
 0x1f5   : > { %v2676_v22 = vpack.c.bf16 %v2624_v31, %v2620_v29  ;;  %v7651_v38 = vpack.c.bf16 %v2626_v32, %v2622_v30  ;;  %v6356_v29 = vld [vmem:[%s8202_s3 + $0x2c0] ss:$16 sps:$4 sm:$0xff]   ;;  %v6359_v30 = vld [vmem:[%s8202_s3 + $0x2c8] ss:$16 sps:$4 sm:$0xff]  }
 0x1f6   : > { %v2677_v39 = vpack.c.bf16 %v2625_v36, %v2621_v34  ;;  %v7653_v40 = vpack.c.bf16 %v2627_v37, %v2623_v35  ;;  %v2103_v41 = vpop.f32.mrb[12].mxu0  ;;  %v2555_v42 = vpop.f32.mrb[12].mxu1  ;;  %3610 = vmatpush1.bf16.msra.mxu0 %v6338_v26  ;;  %3836 = vmatpush1.bf16.msra.mxu1 %v6341_v27  ;;  %v6364_v35 = vld [vmem:[%s8202_s3 + $0x2e4] ss:$16 sps:$4 sm:$0xff]   ;;  %v6367_v36 = vld [vmem:[%s8202_s3 + $0x2ec] ss:$16 sps:$4 sm:$0xff]  }
 0x1f7   : > { %v5468_v45 = vadd.f32 %v2103_v41, %v7557_v54  ;;  %v5500_v46 = vadd.f32 %v2555_v42, %v7561_v55  ;;  %v2105_v47 = vpop.f32.mrb[13].mxu0  ;;  %v2557_v51 = vpop.f32.mrb[13].mxu1  ;;  %3611 = vmatprep.subr.bf16.mxu0 %v6346_v28  ;;  %3837 = vmatprep.subr.bf16.mxu1 %v6349_v33 }
 0x1f8   : > { %v5469_v60 = vadd.f32 %v2105_v47, %v7565_v56  ;;  %v5501_v61 = vadd.f32 %v2557_v51, %v7569_v57  ;;  %v2107_v62 = vpop.f32.mrb[14].mxu0  ;;  %v2559_v63 = vpop.f32.mrb[14].mxu1  ;;  %3542 = vmatprep.mubr.bf16.mxu0 %v2677_v39  ;;  %3768 = vmatprep.mubr.bf16.mxu1 %v2677_v39  ;;  %v6362_v51 = vld [vmem:[%s8202_s3 + $0x2e0] ss:$16 sps:$4 sm:$0xff]  }
 0x1f9   : > { %v5470_v1 = vadd.f32 %v2107_v62, %v7557_v54  ;;  %v5502_v3 = vadd.f32 %v2559_v63, %v7561_v55  ;;  %v2109_v4 = vpop.f32.mrb[15].mxu0  ;;  %v2561_v5 = vpop.f32.mrb[15].mxu1  ;;  %3543 = vmatmul.mubr.bf16.gmra.mrb[40].mxu0 %v2676_v22  ;;  %3769 = vmatmul.mubr.bf16.gmra.mrb[40].mxu1 %v2676_v22  ;;  %v2628_v11 = vmax.f32 %v5468_v45, 0.0  ;;  %v2630_v12 = vmax.f32 %v5500_v46, 0.0 }
 0x1fa   : > { %v5471_v6 = vadd.f32 %v2109_v4, %v7565_v56  ;;  %v5503_v7 = vadd.f32 %v2561_v5, %v7569_v57  ;;  %3612 = vmatpush1.bf16.msra.mxu0 %v6344_v43  ;;  %3838 = vmatpush1.bf16.msra.mxu1 %v6347_v44  ;;  %v2629_v16 = vmax.f32 %v5469_v60, 0.0  ;;  %v2631_v17 = vmax.f32 %v5501_v61, 0.0 }
 0x1fb   : > { %v2632_v13 = vmax.f32 %v5470_v1, 0.0  ;;  %v2634_v14 = vmax.f32 %v5502_v3, 0.0  ;;  %3613 = vmatprep.subr.bf16.mxu0 %v6352_v58  ;;  %3839 = vmatprep.subr.bf16.mxu1 %v6355_v59  ;;  %v6365_v58 = vld [vmem:[%s8202_s3 + $0x2e8] ss:$16 sps:$4 sm:$0xff]   ;;  %v6370_v59 = vld [vmem:[%s8202_s3 + $0x304] ss:$16 sps:$4 sm:$0xff]  }
 0x1fc   : > { %v2633_v18 = vmax.f32 %v5471_v6, 0.0  ;;  %v2635_v20 = vmax.f32 %v5503_v7, 0.0  ;;  %v6373_v1 = vld [vmem:[%s8202_s3 + $0x30c] ss:$16 sps:$4 sm:$0xff]  }
 0x1fd   : > { %v2680_v23 = vpack.c.bf16 %v2632_v13, %v2628_v11  ;;  %v7687_v24 = vpack.c.bf16 %v2634_v14, %v2630_v12  ;;  %v6368_v13 = vld [vmem:[%s8202_s3 + $0x300] ss:$16 sps:$4 sm:$0xff]   ;;  %v6371_v14 = vld [vmem:[%s8202_s3 + $0x308] ss:$16 sps:$4 sm:$0xff]  }
 0x1fe   : > { %v2681_v25 = vpack.c.bf16 %v2633_v18, %v2629_v16  ;;  %v7689_v26 = vpack.c.bf16 %v2635_v20, %v2631_v17  ;;  %v2113_v27 = vpop.f32.mrb[16].mxu0  ;;  %v2565_v28 = vpop.f32.mrb[16].mxu1  ;;  %3614 = vmatpush1.bf16.msra.mxu0 %v6350_v8  ;;  %3840 = vmatpush1.bf16.msra.mxu1 %v6353_v9  ;;  %v6376_v20 = vld [vmem:[%s8202_s3 + $0x324] ss:$16 sps:$4 sm:$0xff]  }
 0x1ff   : > { %v5472_v31 = vadd.f32 %v2113_v27, %v7557_v54  ;;  %v5504_v32 = vadd.f32 %v2565_v28, %v7561_v55  ;;  %v2115_v33 = vpop.f32.mrb[17].mxu0  ;;  %v2567_v34 = vpop.f32.mrb[17].mxu1  ;;  %3615 = vmatprep.subr.bf16.mxu0 %v6358_v10  ;;  %3841 = vmatprep.subr.bf16.mxu1 %v6361_v15 }
 0x200   : > { %v5473_v37 = vadd.f32 %v2115_v33, %v7565_v56  ;;  %v5505_v22 = vadd.f32 %v2567_v34, %v7569_v57  ;;  %v2117_v39 = vpop.f32.mrb[18].mxu0  ;;  %v2569_v41 = vpop.f32.mrb[18].mxu1  ;;  %3552 = vmatprep.mubr.bf16.mxu0 %v2681_v25  ;;  %3778 = vmatprep.mubr.bf16.mxu1 %v2681_v25 }
 0x201   : > { %v5474_v42 = vadd.f32 %v2117_v39, %v7557_v54  ;;  %v5506_v43 = vadd.f32 %v2569_v41, %v7561_v55  ;;  %v2119_v44 = vpop.f32.mrb[19].mxu0  ;;  %v2571_v45 = vpop.f32.mrb[19].mxu1  ;;  %3553 = vmatmul.mubr.bf16.gmra.mrb[44].mxu0 %v2680_v23  ;;  %3779 = vmatmul.mubr.bf16.gmra.mrb[44].mxu1 %v2680_v23  ;;  %v2636_v60 = vmax.f32 %v5472_v31, 0.0  ;;  %v2638_v61 = vmax.f32 %v5504_v32, 0.0  ;;  %v6379_v23 = vld [vmem:[%s8202_s3 + $0x32c] ss:$16 sps:$4 sm:$0xff]  }
 0x202   : > { %v5475_v46 = vadd.f32 %v2119_v44, %v7565_v56  ;;  %v5507_v47 = vadd.f32 %v2571_v45, %v7569_v57  ;;  %3616 = vmatpush1.bf16.msra.mxu0 %v6356_v29  ;;  %3842 = vmatpush1.bf16.msra.mxu1 %v6359_v30  ;;  %v2637_v3 = vmax.f32 %v5473_v37, 0.0  ;;  %v2639_v4 = vmax.f32 %v5505_v22, 0.0  ;;  %v6377_v37 = vld [vmem:[%s8202_s3 + $0x328] ss:$16 sps:$4 sm:$0xff]   ;;  %v6382_v22 = vld [vmem:[%s8202_s3 + $0x344] ss:$16 sps:$4 sm:$0xff]  }
 0x203   : > { %v2640_v62 = vmax.f32 %v5474_v42, 0.0  ;;  %v2642_v63 = vmax.f32 %v5506_v43, 0.0  ;;  %3617 = vmatprep.subr.bf16.mxu0 %v6364_v35  ;;  %3843 = vmatprep.subr.bf16.mxu1 %v6367_v36  ;;  %v6374_v36 = vld [vmem:[%s8202_s3 + $0x320] ss:$16 sps:$4 sm:$0xff]   ;;  %v6385_v44 = vld [vmem:[%s8202_s3 + $0x34c] ss:$16 sps:$4 sm:$0xff]  }
 0x204   : > { %v2641_v5 = vmax.f32 %v5475_v46, 0.0  ;;  %v2643_v6 = vmax.f32 %v5507_v47, 0.0 }
 0x205   : > { %v2684_v7 = vpack.c.bf16 %v2640_v62, %v2636_v60  ;;  %v7723_v8 = vpack.c.bf16 %v2642_v63, %v2638_v61 }
 0x206   : > { %v2685_v9 = vpack.c.bf16 %v2641_v5, %v2637_v3  ;;  %v7725_v10 = vpack.c.bf16 %v2643_v6, %v2639_v4  ;;  %v2123_v11 = vpop.f32.mrb[20].mxu0  ;;  %v2575_v12 = vpop.f32.mrb[20].mxu1  ;;  %3618 = vmatpush1.bf16.msra.mxu0 %v6362_v51  ;;  %3844 = vmatpush1.bf16.msra.mxu1 %v6365_v58  ;;  %v6383_v3 = vld [vmem:[%s8202_s3 + $0x348] ss:$16 sps:$4 sm:$0xff]  }
 0x207   : > { %v5476_v15 = vadd.f32 %v2123_v11, %v7557_v54  ;;  %v5508_v16 = vadd.f32 %v2575_v12, %v7561_v55  ;;  %v2125_v17 = vpop.f32.mrb[21].mxu0  ;;  %v2577_v18 = vpop.f32.mrb[21].mxu1  ;;  %3619 = vmatprep.subr.bf16.mxu0 %v6370_v59  ;;  %3845 = vmatprep.subr.bf16.mxu1 %v6373_v1  ;;  %v6380_v1 = vld [vmem:[%s8202_s3 + $0x340] ss:$16 sps:$4 sm:$0xff]   ;;  %v6391_v11 = vld [vmem:[%s8202_s3 + $0x36c] ss:$16 sps:$4 sm:$0xff]  }
 0x208   : > { %v5477_v25 = vadd.f32 %v2125_v17, %v7565_v56  ;;  %v5509_v27 = vadd.f32 %v2577_v18, %v7569_v57  ;;  %v2127_v28 = vpop.f32.mrb[22].mxu0  ;;  %v2579_v29 = vpop.f32.mrb[22].mxu1  ;;  %3562 = vmatprep.mubr.bf16.mxu0 %v2685_v9  ;;  %3788 = vmatprep.mubr.bf16.mxu1 %v2685_v9  ;;  %v6388_v9 = vld [vmem:[%s8202_s3 + $0x364] ss:$16 sps:$4 sm:$0xff]  }
 0x209   : > { %v5478_v30 = vadd.f32 %v2127_v28, %v7557_v54  ;;  %v5510_v31 = vadd.f32 %v2579_v29, %v7561_v55  ;;  %v2129_v32 = vpop.f32.mrb[23].mxu0  ;;  %v2581_v33 = vpop.f32.mrb[23].mxu1  ;;  %3563 = vmatmul.mubr.bf16.gmra.mrb[48].mxu0 %v2684_v7  ;;  %3789 = vmatmul.mubr.bf16.gmra.mrb[48].mxu1 %v2684_v7  ;;  %v2644_v39 = vmax.f32 %v5476_v15, 0.0  ;;  %v2646_v41 = vmax.f32 %v5508_v16, 0.0  ;;  %v6389_v28 = vld [vmem:[%s8202_s3 + $0x368] ss:$16 sps:$4 sm:$0xff]  }
 0x20a   : > { %v5479_v34 = vadd.f32 %v2129_v32, %v7565_v56  ;;  %v5511_v35 = vadd.f32 %v2581_v33, %v7569_v57  ;;  %3620 = vmatpush1.bf16.msra.mxu0 %v6368_v13  ;;  %3846 = vmatpush1.bf16.msra.mxu1 %v6371_v14  ;;  %v2645_v45 = vmax.f32 %v5477_v25, 0.0  ;;  %v2647_v46 = vmax.f32 %v5509_v27, 0.0  ;;  %v6386_v27 = vld [vmem:[%s8202_s3 + $0x360] ss:$16 sps:$4 sm:$0xff]   ;;  %v6394_v29 = vld [vmem:[%s8202_s3 + $0x384] ss:$16 sps:$4 sm:$0xff]  }
 0x20b   : > { %v2648_v42 = vmax.f32 %v5478_v30, 0.0  ;;  %v2650_v43 = vmax.f32 %v5510_v31, 0.0  ;;  %3621 = vmatprep.subr.bf16.mxu0 %v6376_v20  ;;  %3847 = vmatprep.subr.bf16.mxu1 %v6379_v23 }
 0x20c   : > { %v2649_v47 = vmax.f32 %v5479_v34, 0.0  ;;  %v2651_v51 = vmax.f32 %v5511_v35, 0.0  ;;  %v6397_v34 = vld [vmem:[%s8202_s3 + $0x38c] ss:$16 sps:$4 sm:$0xff]  }
 0x20d   : > { %v2688_v58 = vpack.c.bf16 %v2648_v42, %v2644_v39  ;;  %v7759_v59 = vpack.c.bf16 %v2650_v43, %v2646_v41 }
 0x20e   : > { %v2689_v60 = vpack.c.bf16 %v2649_v47, %v2645_v45  ;;  %v7761_v61 = vpack.c.bf16 %v2651_v51, %v2647_v46  ;;  %v2133_v62 = vpop.f32.mrb[24].mxu0  ;;  %v2585_v63 = vpop.f32.mrb[24].mxu1  ;;  %3622 = vmatpush1.bf16.msra.mxu0 %v6374_v36  ;;  %3848 = vmatpush1.bf16.msra.mxu1 %v6377_v37  ;;  %v6392_v46 = vld [vmem:[%s8202_s3 + $0x380] ss:$16 sps:$4 sm:$0xff]   ;;  %v6395_v47 = vld [vmem:[%s8202_s3 + $0x388] ss:$16 sps:$4 sm:$0xff]  }
 0x20f   : > { %v5480_v4 = vadd.f32 %v2133_v62, %v7557_v54  ;;  %v5512_v5 = vadd.f32 %v2585_v63, %v7561_v55  ;;  %v2135_v6 = vpop.f32.mrb[25].mxu0  ;;  %v2587_v7 = vpop.f32.mrb[25].mxu1  ;;  %3623 = vmatprep.subr.bf16.mxu0 %v6382_v22  ;;  %3849 = vmatprep.subr.bf16.mxu1 %v6385_v44  ;;  %v6400_v63 = vld [vmem:[%s8202_s3 + $0x3a4] ss:$16 sps:$4 sm:$0xff]  }
 0x210   : > { %v5481_v12 = vadd.f32 %v2135_v6, %v7565_v56  ;;  %v5513_v13 = vadd.f32 %v2587_v7, %v7569_v57  ;;  %v2137_v14 = vpop.f32.mrb[26].mxu0  ;;  %v2589_v15 = vpop.f32.mrb[26].mxu1  ;;  %3572 = vmatprep.mubr.bf16.mxu0 %v2689_v60  ;;  %3798 = vmatprep.mubr.bf16.mxu1 %v2689_v60 }
 0x211   : > { %v5482_v16 = vadd.f32 %v2137_v14, %v7557_v54  ;;  %v5514_v17 = vadd.f32 %v2589_v15, %v7561_v55  ;;  %v2139_v18 = vpop.f32.mrb[27].mxu0  ;;  %v2591_v20 = vpop.f32.mrb[27].mxu1  ;;  %3573 = vmatmul.mubr.bf16.gmra.mrb[52].mxu0 %v2688_v58  ;;  %3799 = vmatmul.mubr.bf16.gmra.mrb[52].mxu1 %v2688_v58  ;;  %v2652_v30 = vmax.f32 %v5480_v4, 0.0  ;;  %v2654_v31 = vmax.f32 %v5512_v5, 0.0  ;;  %v6398_v15 = vld [vmem:[%s8202_s3 + $0x3a0] ss:$16 sps:$4 sm:$0xff]  }
 0x212   : > { %v5483_v23 = vadd.f32 %v2139_v18, %v7565_v56  ;;  %v5515_v25 = vadd.f32 %v2591_v20, %v7569_v57  ;;  %3624 = vmatpush1.bf16.msra.mxu0 %v6380_v1  ;;  %3850 = vmatpush1.bf16.msra.mxu1 %v6383_v3  ;;  %v2653_v35 = vmax.f32 %v5481_v12, 0.0  ;;  %v2655_v36 = vmax.f32 %v5513_v13, 0.0  ;;  %v6403_v1 = vld [vmem:[%s8202_s3 + $0x3ac] ss:$16 sps:$4 sm:$0xff]  }
 0x213   : > { %v2656_v32 = vmax.f32 %v5482_v16, 0.0  ;;  %v2658_v33 = vmax.f32 %v5514_v17, 0.0  ;;  %3625 = vmatprep.subr.bf16.mxu0 %v6388_v9  ;;  %3851 = vmatprep.subr.bf16.mxu1 %v6391_v11 }
 0x214   : > { %v2657_v37 = vmax.f32 %v5483_v23, 0.0  ;;  %v2659_v22 = vmax.f32 %v5515_v25, 0.0 }
 0x215   : > { %v2692_v39 = vpack.c.bf16 %v2656_v32, %v2652_v30  ;;  %v7795_v41 = vpack.c.bf16 %v2658_v33, %v2654_v31  ;;  %v6404_v32 = vld [vmem:[%s8202_s3 + $0x3c0] ss:$16 sps:$4 sm:$0xff]   ;;  %v6407_v33 = vld [vmem:[%s8202_s3 + $0x3c8] ss:$16 sps:$4 sm:$0xff]  }
 0x216   : > { %v2693_v42 = vpack.c.bf16 %v2657_v37, %v2653_v35  ;;  %v7797_v43 = vpack.c.bf16 %v2659_v22, %v2655_v36  ;;  %v2143_v44 = vpop.f32.mrb[28].mxu0  ;;  %v2595_v45 = vpop.f32.mrb[28].mxu1  ;;  %3626 = vmatpush1.bf16.msra.mxu0 %v6386_v27  ;;  %3852 = vmatpush1.bf16.msra.mxu1 %v6389_v28  ;;  %v6415_v35 = vld [vmem:[%s8202_s3 + $0x3ec] ss:$16 sps:$4 sm:$0xff]   ;;  %v6410_v36 = vld [vmem:[%s8202_s3 + $0x3e0] ss:$16 sps:$4 sm:$0xff]  }
 0x217   : > { %v5484_v51 = vadd.f32 %v2143_v44, %v7557_v54  ;;  %v5516_v58 = vadd.f32 %v2595_v45, %v7561_v55  ;;  %v2145_v60 = vpop.f32.mrb[29].mxu0  ;;  %v2597_v62 = vpop.f32.mrb[29].mxu1  ;;  %3627 = vmatprep.subr.bf16.mxu0 %v6394_v29  ;;  %3853 = vmatprep.subr.bf16.mxu1 %v6397_v34  ;;  %v6412_v34 = vld [vmem:[%s8202_s3 + $0x3e4] ss:$16 sps:$4 sm:$0xff]   ;;  %v6413_v37 = vld [vmem:[%s8202_s3 + $0x3e8] ss:$16 sps:$4 sm:$0xff]  }
 0x218   : > { %v5485_v3 = vadd.f32 %v2145_v60, %v7565_v56  ;;  %v5517_v4 = vadd.f32 %v2597_v62, %v7569_v57  ;;  %v2147_v5 = vpop.f32.mrb[30].mxu0  ;;  %v2599_v6 = vpop.f32.mrb[30].mxu1  ;;  %3582 = vmatprep.mubr.bf16.mxu0 %v2693_v42  ;;  %3808 = vmatprep.mubr.bf16.mxu1 %v2693_v42  ;;  %v6416_v22 = vld [vmem:[%s8204_s5 + $0x40] sm:$0xff]   ;;  %v6420_v44 = vld [vmem:[%s8204_s5 + $0x48] sm:$0xff]   ;;  %v6428_v60 = vld [vmem:[%s8204_s5 + $0x58] sm:$0xff]  }
 0x219   : > { %v5486_v7 = vadd.f32 %v2147_v5, %v7557_v54  ;;  %v5518_v9 = vadd.f32 %v2599_v6, %v7561_v55  ;;  %v2149_v11 = vpop.f32.mrb[31].mxu0  ;;  %v2601_v12 = vpop.f32.mrb[31].mxu1  ;;  %3583 = vmatmul.mubr.bf16.gmra.mrb[56].mxu0 %v2692_v39  ;;  %3809 = vmatmul.mubr.bf16.gmra.mrb[56].mxu1 %v2692_v39  ;;  %v6401_v54 = vld [vmem:[%s8202_s3 + $0x3a8] ss:$16 sps:$4 sm:$0xff]   ;;  %v6406_v55 = vld [vmem:[%s8202_s3 + $0x3c4] ss:$16 sps:$4 sm:$0xff]  }
 0x21a   : > { %v5487_v13 = vadd.f32 %v2149_v11, %v7565_v56  ;;  %v5519_v14 = vadd.f32 %v2601_v12, %v7569_v57  ;;  %3628 = vmatpush1.bf16.msra.mxu0 %v6392_v46  ;;  %3854 = vmatpush1.bf16.msra.mxu1 %v6395_v47  ;;  %v2660_v16 = vmax.f32 %v5484_v51, 0.0  ;;  %v2662_v17 = vmax.f32 %v5516_v58, 0.0  ;;  %v6409_v57 = vld [vmem:[%s8202_s3 + $0x3cc] ss:$16 sps:$4 sm:$0xff]   ;;  %v6418_v39 = vld [vmem:[%s8204_s5 + $0xc0] sm:$0xff]   ;;  %v6424_v51 = vld [vmem:[%s8204_s5 + $0x50] sm:$0xff]  }
 0x21b   : > { %v2664_v18 = vmax.f32 %v5486_v7, 0.0  ;;  %v2666_v56 = vmax.f32 %v5518_v9, 0.0  ;;  %3629 = vmatprep.subr.bf16.mxu0 %v6400_v63  ;;  %3855 = vmatprep.subr.bf16.mxu1 %v6403_v1  ;;  %v2661_v20 = vmax.f32 %v5485_v3, 0.0  ;;  %v2663_v23 = vmax.f32 %v5517_v4, 0.0  ;;  %v6419_v42 = vld [vmem:[%s8204_s5 + $0x80] sm:$0xff]   ;;  %v6422_v45 = vld [vmem:[%s8204_s5 + $0xc8] sm:$0xff]  }
 0x21c   : > { %v2665_v25 = vmax.f32 %v5487_v13, 0.0  ;;  %v2667_v27 = vmax.f32 %v5519_v14, 0.0  ;;  %v6421_v46 = vld [vmem:[%s8204_s5 + $0x8] sm:$0xff]   ;;  %v6427_v58 = vld [vmem:[%s8204_s5 + $0x90] sm:$0xff]   ;;  %v6430_v62 = vld [vmem:[%s8204_s5 + $0xd8] sm:$0xff]  }
 0x21d   : > { %v2696_v28 = vpack.c.bf16 %v2664_v18, %v2660_v16  ;;  %v7831_v29 = vpack.c.bf16 %v2666_v56, %v2662_v17  ;;  %v6423_v47 = vld [vmem:[%s8204_s5 + $0x88] sm:$0xff]   ;;  %v6429_v63 = vld [vmem:[%s8204_s5 + $0x18] sm:$0xff]   ;;  %v6432_v3 = vld [vmem:[%s8204_s5 + $0x60] sm:$0xff]  }
 0x21e   : > { %v2697_v30 = vpack.c.bf16 %v2665_v25, %v2661_v20  ;;  %v7833_v31 = vpack.c.bf16 %v2667_v27, %v2663_v23  ;;  %3630 = vmatpush1.bf16.msra.mxu0 %v6398_v15  ;;  %3856 = vmatpush1.bf16.msra.mxu1 %v6401_v54  ;;  %v6431_v1 = vld [vmem:[%s8204_s5 + $0x98] sm:$0xff]   ;;  %v6435_v4 = vld [vmem:[%s8204_s5 + $0xa0] sm:$0xff]   ;;  %v6436_v5 = vld [vmem:[%s8204_s5 + $0x68] sm:$0xff]  }
 0x21f   : > { %3631 = vmatprep.subr.bf16.mxu0 %v6406_v55  ;;  %3857 = vmatprep.subr.bf16.mxu1 %v6409_v57  ;;  %v6438_v6 = vld [vmem:[%s8204_s5 + $0xe8] sm:$0xff]   ;;  %v6440_v11 = vld [vmem:[%s8204_s5 + $0x70] sm:$0xff]  }
 0x220   : > { %3592 = vmatprep.mubr.bf16.mxu0 %v2697_v30  ;;  %3818 = vmatprep.mubr.bf16.mxu1 %v2697_v30  ;;  %v6437_v7 = vld [vmem:[%s8204_s5 + $0x28] sm:$0xff]   ;;  %v6443_v12 = vld [vmem:[%s8204_s5 + $0xb0] sm:$0xff]  }
 0x221   : > { %3593 = vmatmul.mubr.bf16.gmra.mrb[60].mxu0 %v2696_v28  ;;  %3819 = vmatmul.mubr.bf16.gmra.mrb[60].mxu1 %v2696_v28  ;;  %v6439_v9 = vld [vmem:[%s8204_s5 + $0xa8] sm:$0xff]  }
 0x222   : > { %3632 = vmatpush1.bf16.msra.mxu0 %v6404_v32  ;;  %3635 = vmatprep.mubr.bf16.mxu0 %v7581_v21 }
 0x223   : > { %3858 = vmatpush1.bf16.msra.mxu1 %v6407_v33  ;;  %3861 = vmatprep.mubr.bf16.mxu1 %v7581_v21  ;;  %v6417_v21 = vld [vmem:[%s8204_s5] sm:$0xff]  }
 0x224   : > { %3633 = vmatprep.subr.bf16.mxu0 %v6412_v34  ;;  %3859 = vmatprep.subr.bf16.mxu1 %v6415_v35 }
 0x226   : > { %3634 = vmatpush1.bf16.msra.mxu0 %v6410_v36 }
 0x227   : > { %3860 = vmatpush1.bf16.msra.mxu1 %v6413_v37  ;;  %5328 = vmatprep.subr.bf16.mxu0 %v6416_v22 }
 0x228   : > { %5392 = vmatprep.subr.bf16.mxu1 %v6418_v39 }
 0x229   : > { %3636 = vmatmul.mubr.bf16.vlgmr.msra.gmra.mrb[32].mxu0 %v7579_v19 }
 0x22a   : > { %3862 = vmatmul.mubr.bf16.vlgmr.msra.gmra.mrb[32].mxu1 %v7579_v19  ;;  %3645 = vmatprep.mubr.bf16.mxu0 %v7617_v2  ;;  %v6426_v19 = vld [vmem:[%s8204_s5 + $0xd0] sm:$0xff]  }
 0x22b   : > { %3871 = vmatprep.mubr.bf16.mxu1 %v7617_v2  ;;  %5329 = vmatpush3.bf16.msra.mxu0 %v6417_v21  ;;  %v6425_v2 = vld [vmem:[%s8204_s5 + $0x10] sm:$0xff]  }
 0x22c   : > { %5393 = vmatpush3.bf16.msra.mxu1 %v6419_v42  ;;  %5330 = vmatprep.subr.bf16.mxu0 %v6420_v44 }
 0x22d   : > { %5394 = vmatprep.subr.bf16.mxu1 %v6422_v45 }
 0x22f   : > { %5331 = vmatpush3.bf16.msra.mxu0 %v6421_v46 }
 0x230   : > { %5395 = vmatpush3.bf16.msra.mxu1 %v6423_v47  ;;  %5332 = vmatprep.subr.bf16.mxu0 %v6424_v51 }
 0x231   : > { %3646 = vmatmul.mubr.bf16.gmra.mrb[36].mxu0 %v7615_v0  ;;  %5396 = vmatprep.subr.bf16.mxu1 %v6426_v19 }
 0x232   : > { %3872 = vmatmul.mubr.bf16.gmra.mrb[36].mxu1 %v7615_v0  ;;  %3655 = vmatprep.mubr.bf16.mxu0 %v7653_v40  ;;  %v6434_v0 = vld [vmem:[%s8204_s5 + $0xe0] sm:$0xff]  }
 0x233   : > { %3881 = vmatprep.mubr.bf16.mxu1 %v7653_v40  ;;  %5333 = vmatpush3.bf16.msra.mxu0 %v6425_v2  ;;  %v6433_v40 = vld [vmem:[%s8204_s5 + $0x20] sm:$0xff]  }
 0x234   : > { %5397 = vmatpush3.bf16.msra.mxu1 %v6427_v58  ;;  %5334 = vmatprep.subr.bf16.mxu0 %v6428_v60 }
 0x235   : > { %5398 = vmatprep.subr.bf16.mxu1 %v6430_v62 }
 0x237   : > { %5335 = vmatpush3.bf16.msra.mxu0 %v6429_v63 }
 0x238   : > { %5399 = vmatpush3.bf16.msra.mxu1 %v6431_v1  ;;  %5336 = vmatprep.subr.bf16.mxu0 %v6432_v3 }
 0x239   : > { %3656 = vmatmul.mubr.bf16.gmra.mrb[40].mxu0 %v7651_v38  ;;  %5400 = vmatprep.subr.bf16.mxu1 %v6434_v0 }
 0x23a   : > { %3882 = vmatmul.mubr.bf16.gmra.mrb[40].mxu1 %v7651_v38  ;;  %3665 = vmatprep.mubr.bf16.mxu0 %v7689_v26  ;;  %v6442_v38 = vld [vmem:[%s8204_s5 + $0xf0] sm:$0xff]  }
 0x23b   : > { %3891 = vmatprep.mubr.bf16.mxu1 %v7689_v26  ;;  %5337 = vmatpush3.bf16.msra.mxu0 %v6433_v40  ;;  %v6441_v26 = vld [vmem:[%s8204_s5 + $0x30] sm:$0xff]  }
 0x23c   : > { %5401 = vmatpush3.bf16.msra.mxu1 %v6435_v4  ;;  %5338 = vmatprep.subr.bf16.mxu0 %v6436_v5 }
 0x23d   : > { %5402 = vmatprep.subr.bf16.mxu1 %v6438_v6 }
 0x23f   : > { %5339 = vmatpush3.bf16.msra.mxu0 %v6437_v7 }
 0x240   : > { %5403 = vmatpush3.bf16.msra.mxu1 %v6439_v9  ;;  %5340 = vmatprep.subr.bf16.mxu0 %v6440_v11 }
 0x241   : > { %3666 = vmatmul.mubr.bf16.gmra.mrb[44].mxu0 %v7687_v24  ;;  %5404 = vmatprep.subr.bf16.mxu1 %v6442_v38 }
 0x242   : > { %3892 = vmatmul.mubr.bf16.gmra.mrb[44].mxu1 %v7687_v24  ;;  %3675 = vmatprep.mubr.bf16.mxu0 %v7725_v10  ;;  %v6444_v24 = vld [vmem:[%s8204_s5 + $0x78] sm:$0xff]  }
 0x243   : > { %3901 = vmatprep.mubr.bf16.mxu1 %v7725_v10  ;;  %5341 = vmatpush3.bf16.msra.mxu0 %v6441_v26  ;;  %v6445_v10 = vld [vmem:[%s8204_s5 + $0x38] sm:$0xff]  }
 0x244   : > { %5405 = vmatpush3.bf16.msra.mxu1 %v6443_v12  ;;  %5342 = vmatprep.subr.bf16.mxu0 %v6444_v24 }
 0x247   : > { %5343 = vmatpush3.bf16.msra.mxu0 %v6445_v10 }
 0x249   : > { %3676 = vmatmul.mubr.bf16.gmra.mrb[48].mxu0 %v7723_v8 }
 0x24a   : > { %3902 = vmatmul.mubr.bf16.gmra.mrb[48].mxu1 %v7723_v8  ;;  %3685 = vmatprep.mubr.bf16.mxu0 %v7761_v61  ;;  %v6446_v8 = vld [vmem:[%s8204_s5 + $0xf8] sm:$0xff]  }
 0x24b   : > { %3911 = vmatprep.mubr.bf16.mxu1 %v7761_v61  ;;  %5406 = vmatprep.subr.bf16.mxu1 %v6446_v8  ;;  %v2828_v61 = vld [vmem:[%s8203_s4] sm:$0xf] }
 0x24c   : > { %v7994_v13 = vrot.slane %v2828_v61, %v681_v52  ;;  %v7998_v14 = vrot.slane %v2828_v61, %v689_v53 }
 0x251   : > { %3686 = vmatmul.mubr.bf16.gmra.mrb[52].mxu0 %v7759_v59 }
 0x252   : > { %3912 = vmatmul.mubr.bf16.gmra.mrb[52].mxu1 %v7759_v59  ;;  %3695 = vmatprep.mubr.bf16.mxu0 %v7797_v43  ;;  %v6447_v59 = vld [vmem:[%s8204_s5 + $0xb8] sm:$0xff]  }
 0x253   : > { %3921 = vmatprep.mubr.bf16.mxu1 %v7797_v43  ;;  %5407 = vmatpush3.bf16.msra.mxu1 %v6447_v59  ;;  %v7990_v43 = vrot.slane %v2828_v61, %v685_v50 }
 0x259   : > { %3696 = vmatmul.mubr.bf16.gmra.mrb[56].mxu0 %v7795_v41 }
 0x25a   : > { %3922 = vmatmul.mubr.bf16.gmra.mrb[56].mxu1 %v7795_v41  ;;  %3705 = vmatprep.mubr.bf16.mxu0 %v7833_v31  ;;  %v7986_v41 = vrot.slane %v2828_v61, %v677_v49 }
 0x25b   : > { %3931 = vmatprep.mubr.bf16.mxu1 %v7833_v31 }
 0x261   : > { %3706 = vmatmul.mubr.bf16.gmra.mrb[60].mxu0 %v7831_v29 }
 0x262   : > { %3932 = vmatmul.mubr.bf16.gmra.mrb[60].mxu1 %v7831_v29 }
 0x2fc   : > { %v3637_v15 = vpop.f32.mrb[32].mxu0 }
 0x2fd   : > { %v5520_v54 = vadd.f32 %v3637_v15, %v7986_v41  ;;  %v3863_v55 = vpop.f32.mrb[32].mxu1  ;;  %v3639_v16 = vpop.f32.mrb[33].mxu0 }
 0x2fe   : > { %v5552_v49 = vadd.f32 %v3863_v55, %v7990_v43  ;;  %v5521_v17 = vadd.f32 %v3639_v16, %v7994_v13  ;;  %v3865_v18 = vpop.f32.mrb[33].mxu1  ;;  %v3641_v50 = vpop.f32.mrb[34].mxu0 }
 0x2ff   : > { %v5553_v56 = vadd.f32 %v3865_v18, %v7998_v14  ;;  %v5522_v52 = vadd.f32 %v3641_v50, %v7986_v41  ;;  %v3867_v57 = vpop.f32.mrb[34].mxu1  ;;  %v3643_v20 = vpop.f32.mrb[35].mxu0  ;;  %v3942_v25 = vmax.f32 %v5520_v54, 0.0 }
 0x300   : > { %v5554_v48 = vadd.f32 %v3867_v57, %v7990_v43  ;;  %v5523_v53 = vadd.f32 %v3643_v20, %v7994_v13  ;;  %v3869_v23 = vpop.f32.mrb[35].mxu1  ;;  %v3944_v29 = vmax.f32 %v5552_v49, 0.0  ;;  %v3943_v30 = vmax.f32 %v5521_v17, 0.0 }
 0x301   : > { %v3946_v27 = vmax.f32 %v5522_v52, 0.0  ;;  %v5555_v28 = vadd.f32 %v3869_v23, %v7998_v14  ;;  %v3945_v33 = vmax.f32 %v5553_v56, 0.0 }
 0x302   : > { %v3948_v31 = vmax.f32 %v5554_v48, 0.0  ;;  %v3947_v32 = vmax.f32 %v5523_v53, 0.0 }
 0x303   : > { %v4006_v34 = vpack.c.bf16 %v3946_v27, %v3942_v25  ;;  %v3949_v35 = vmax.f32 %v5555_v28, 0.0 }
 0x304   : > { %v4008_v36 = vpack.c.bf16 %v3948_v31, %v3944_v29  ;;  %v4007_v37 = vpack.c.bf16 %v3947_v32, %v3943_v30  ;;  %v3647_v22 = vpop.f32.mrb[36].mxu0 }
 0x305   : > { %v4009_v39 = vpack.c.bf16 %v3949_v35, %v3945_v33  ;;  %v5524_v21 = vadd.f32 %v3647_v22, %v7986_v41  ;;  %v3873_v42 = vpop.f32.mrb[36].mxu1  ;;  %v3649_v44 = vpop.f32.mrb[37].mxu0 }
 0x306   : > { %v5556_v45 = vadd.f32 %v3873_v42, %v7990_v43  ;;  %v5525_v46 = vadd.f32 %v3649_v44, %v7994_v13  ;;  %v3875_v47 = vpop.f32.mrb[37].mxu1  ;;  %v3651_v51 = vpop.f32.mrb[38].mxu0  ;;  %4333 = vmatprep.mubr.bf16.mxu0 %v4007_v37 }
 0x307   : > { %v5557_v19 = vadd.f32 %v3875_v47, %v7998_v14  ;;  %v5526_v2 = vadd.f32 %v3651_v51, %v7986_v41  ;;  %v3877_v58 = vpop.f32.mrb[38].mxu1  ;;  %4430 = vmatprep.mubr.bf16.mxu1 %v4009_v39  ;;  %v3653_v60 = vpop.f32.mrb[39].mxu0  ;;  %4334 = vmatmul.mubr.bf16.vlgmr.msra.gmra.mrb[64].mxu0 %v4006_v34  ;;  %v3950_v3 = vmax.f32 %v5524_v21, 0.0 }
 0x308   : > { %v5558_v62 = vadd.f32 %v3877_v58, %v7990_v43  ;;  %v5527_v63 = vadd.f32 %v3653_v60, %v7994_v13  ;;  %v3879_v1 = vpop.f32.mrb[39].mxu1  ;;  %4431 = vmatmul.mubr.bf16.vlgmr.msra.gmra.mrb[64].mxu1 %v4008_v36  ;;  %v3952_v4 = vmax.f32 %v5556_v45, 0.0  ;;  %v3951_v5 = vmax.f32 %v5525_v46, 0.0 }
 0x309   : > { %v3954_v0 = vmax.f32 %v5526_v2, 0.0  ;;  %v5559_v40 = vadd.f32 %v3879_v1, %v7998_v14  ;;  %v3953_v9 = vmax.f32 %v5557_v19, 0.0 }
 0x30a   : > { %v3956_v6 = vmax.f32 %v5558_v62, 0.0  ;;  %v3955_v7 = vmax.f32 %v5527_v63, 0.0 }
 0x30b   : > { %v4010_v11 = vpack.c.bf16 %v3954_v0, %v3950_v3  ;;  %v3957_v38 = vmax.f32 %v5559_v40, 0.0 }
 0x30c   : > { %v4012_v26 = vpack.c.bf16 %v3956_v6, %v3952_v4  ;;  %v4011_v12 = vpack.c.bf16 %v3955_v7, %v3951_v5  ;;  %v3657_v24 = vpop.f32.mrb[40].mxu0 }
 0x30d   : > { %v4013_v8 = vpack.c.bf16 %v3957_v38, %v3953_v9  ;;  %v5528_v10 = vadd.f32 %v3657_v24, %v7986_v41  ;;  %v3883_v59 = vpop.f32.mrb[40].mxu1  ;;  %v3659_v61 = vpop.f32.mrb[41].mxu0 }
 0x30e   : > { %v5560_v15 = vadd.f32 %v3883_v59, %v7990_v43  ;;  %v5529_v54 = vadd.f32 %v3659_v61, %v7994_v13  ;;  %v3885_v55 = vpop.f32.mrb[41].mxu1  ;;  %v3661_v16 = vpop.f32.mrb[42].mxu0  ;;  %4341 = vmatprep.mubr.bf16.mxu0 %v4011_v12 }
 0x30f   : > { %v5561_v49 = vadd.f32 %v3885_v55, %v7998_v14  ;;  %v5530_v17 = vadd.f32 %v3661_v16, %v7986_v41  ;;  %v3887_v18 = vpop.f32.mrb[42].mxu1  ;;  %4438 = vmatprep.mubr.bf16.mxu1 %v4013_v8  ;;  %v3663_v50 = vpop.f32.mrb[43].mxu0  ;;  %4342 = vmatmul.mubr.bf16.gmra.mrb[68].mxu0 %v4010_v11  ;;  %v3958_v20 = vmax.f32 %v5528_v10, 0.0 }
 0x310   : > { %v5562_v56 = vadd.f32 %v3887_v18, %v7990_v43  ;;  %v5531_v52 = vadd.f32 %v3663_v50, %v7994_v13  ;;  %v3889_v57 = vpop.f32.mrb[43].mxu1  ;;  %4439 = vmatmul.mubr.bf16.gmra.mrb[68].mxu1 %v4012_v26  ;;  %v3960_v23 = vmax.f32 %v5560_v15, 0.0  ;;  %v3959_v25 = vmax.f32 %v5529_v54, 0.0 }
 0x311   : > { %v3962_v48 = vmax.f32 %v5530_v17, 0.0  ;;  %v5563_v53 = vadd.f32 %v3889_v57, %v7998_v14  ;;  %v3961_v29 = vmax.f32 %v5561_v49, 0.0 }
 0x312   : > { %v3964_v27 = vmax.f32 %v5562_v56, 0.0  ;;  %v3963_v28 = vmax.f32 %v5531_v52, 0.0 }
 0x313   : > { %v4014_v30 = vpack.c.bf16 %v3962_v48, %v3958_v20  ;;  %v3965_v31 = vmax.f32 %v5563_v53, 0.0 }
 0x314   : > { %v4016_v32 = vpack.c.bf16 %v3964_v27, %v3960_v23  ;;  %v4015_v33 = vpack.c.bf16 %v3963_v28, %v3959_v25  ;;  %v3667_v34 = vpop.f32.mrb[44].mxu0 }
 0x315   : > { %v4017_v35 = vpack.c.bf16 %v3965_v31, %v3961_v29  ;;  %v5532_v36 = vadd.f32 %v3667_v34, %v7986_v41  ;;  %v3893_v37 = vpop.f32.mrb[44].mxu1  ;;  %v3669_v22 = vpop.f32.mrb[45].mxu0 }
 0x316   : > { %v5564_v39 = vadd.f32 %v3893_v37, %v7990_v43  ;;  %v5533_v21 = vadd.f32 %v3669_v22, %v7994_v13  ;;  %v3895_v42 = vpop.f32.mrb[45].mxu1  ;;  %v3671_v44 = vpop.f32.mrb[46].mxu0  ;;  %4349 = vmatprep.mubr.bf16.mxu0 %v4015_v33 }
 0x317   : > { %v5565_v45 = vadd.f32 %v3895_v42, %v7998_v14  ;;  %v5534_v46 = vadd.f32 %v3671_v44, %v7986_v41  ;;  %v3897_v47 = vpop.f32.mrb[46].mxu1  ;;  %4446 = vmatprep.mubr.bf16.mxu1 %v4017_v35  ;;  %v3673_v51 = vpop.f32.mrb[47].mxu0  ;;  %4350 = vmatmul.mubr.bf16.gmra.mrb[72].mxu0 %v4014_v30  ;;  %v3966_v60 = vmax.f32 %v5532_v36, 0.0 }
 0x318   : > { %v5566_v19 = vadd.f32 %v3897_v47, %v7990_v43  ;;  %v5535_v2 = vadd.f32 %v3673_v51, %v7994_v13  ;;  %v3899_v58 = vpop.f32.mrb[47].mxu1  ;;  %4447 = vmatmul.mubr.bf16.gmra.mrb[72].mxu1 %v4016_v32  ;;  %v3968_v1 = vmax.f32 %v5564_v39, 0.0  ;;  %v3967_v3 = vmax.f32 %v5533_v21, 0.0 }
 0x319   : > { %v3970_v62 = vmax.f32 %v5534_v46, 0.0  ;;  %v5567_v63 = vadd.f32 %v3899_v58, %v7998_v14  ;;  %v3969_v4 = vmax.f32 %v5565_v45, 0.0 }
 0x31a   : > { %v3972_v0 = vmax.f32 %v5566_v19, 0.0  ;;  %v3971_v40 = vmax.f32 %v5535_v2, 0.0 }
 0x31b   : > { %v4018_v5 = vpack.c.bf16 %v3970_v62, %v3966_v60  ;;  %v3973_v6 = vmax.f32 %v5567_v63, 0.0 }
 0x31c   : > { %v4020_v7 = vpack.c.bf16 %v3972_v0, %v3968_v1  ;;  %v4019_v9 = vpack.c.bf16 %v3971_v40, %v3967_v3  ;;  %v3677_v11 = vpop.f32.mrb[48].mxu0 }
 0x31d   : > { %v4021_v38 = vpack.c.bf16 %v3973_v6, %v3969_v4  ;;  %v5536_v26 = vadd.f32 %v3677_v11, %v7986_v41  ;;  %v3903_v12 = vpop.f32.mrb[48].mxu1  ;;  %v3679_v24 = vpop.f32.mrb[49].mxu0 }
 0x31e   : > { %v5568_v8 = vadd.f32 %v3903_v12, %v7990_v43  ;;  %v5537_v10 = vadd.f32 %v3679_v24, %v7994_v13  ;;  %v3905_v59 = vpop.f32.mrb[49].mxu1  ;;  %v3681_v61 = vpop.f32.mrb[50].mxu0  ;;  %4357 = vmatprep.mubr.bf16.mxu0 %v4019_v9 }
 0x31f   : > { %v5569_v15 = vadd.f32 %v3905_v59, %v7998_v14  ;;  %v5538_v54 = vadd.f32 %v3681_v61, %v7986_v41  ;;  %v3907_v55 = vpop.f32.mrb[50].mxu1  ;;  %4454 = vmatprep.mubr.bf16.mxu1 %v4021_v38  ;;  %v3683_v16 = vpop.f32.mrb[51].mxu0  ;;  %4358 = vmatmul.mubr.bf16.gmra.mrb[76].mxu0 %v4018_v5  ;;  %v3974_v50 = vmax.f32 %v5536_v26, 0.0 }
 0x320   : > { %v5570_v49 = vadd.f32 %v3907_v55, %v7990_v43  ;;  %v5539_v17 = vadd.f32 %v3683_v16, %v7994_v13  ;;  %v3909_v18 = vpop.f32.mrb[51].mxu1  ;;  %4455 = vmatmul.mubr.bf16.gmra.mrb[76].mxu1 %v4020_v7  ;;  %v3976_v57 = vmax.f32 %v5568_v8, 0.0  ;;  %v3975_v20 = vmax.f32 %v5537_v10, 0.0 }
 0x321   : > { %v3978_v56 = vmax.f32 %v5538_v54, 0.0  ;;  %v5571_v52 = vadd.f32 %v3909_v18, %v7998_v14  ;;  %v3977_v23 = vmax.f32 %v5569_v15, 0.0 }
 0x322   : > { %v3980_v48 = vmax.f32 %v5570_v49, 0.0  ;;  %v3979_v53 = vmax.f32 %v5539_v17, 0.0 }
 0x323   : > { %v4022_v25 = vpack.c.bf16 %v3978_v56, %v3974_v50  ;;  %v3981_v27 = vmax.f32 %v5571_v52, 0.0 }
 0x324   : > { %v4024_v28 = vpack.c.bf16 %v3980_v48, %v3976_v57  ;;  %v4023_v29 = vpack.c.bf16 %v3979_v53, %v3975_v20  ;;  %v3687_v30 = vpop.f32.mrb[52].mxu0 }
 0x325   : > { %v4025_v31 = vpack.c.bf16 %v3981_v27, %v3977_v23  ;;  %v5540_v32 = vadd.f32 %v3687_v30, %v7986_v41  ;;  %v3913_v33 = vpop.f32.mrb[52].mxu1  ;;  %v3689_v34 = vpop.f32.mrb[53].mxu0 }
 0x326   : > { %v5572_v35 = vadd.f32 %v3913_v33, %v7990_v43  ;;  %v5541_v36 = vadd.f32 %v3689_v34, %v7994_v13  ;;  %v3915_v37 = vpop.f32.mrb[53].mxu1  ;;  %v3691_v22 = vpop.f32.mrb[54].mxu0  ;;  %4365 = vmatprep.mubr.bf16.mxu0 %v4023_v29 }
 0x327   : > { %v5573_v39 = vadd.f32 %v3915_v37, %v7998_v14  ;;  %v5542_v21 = vadd.f32 %v3691_v22, %v7986_v41  ;;  %v3917_v42 = vpop.f32.mrb[54].mxu1  ;;  %4462 = vmatprep.mubr.bf16.mxu1 %v4025_v31  ;;  %v3693_v44 = vpop.f32.mrb[55].mxu0  ;;  %4366 = vmatmul.mubr.bf16.gmra.mrb[80].mxu0 %v4022_v25  ;;  %v3982_v51 = vmax.f32 %v5540_v32, 0.0 }
 0x328   : > { %v5574_v45 = vadd.f32 %v3917_v42, %v7990_v43  ;;  %v5543_v46 = vadd.f32 %v3693_v44, %v7994_v13  ;;  %v3919_v47 = vpop.f32.mrb[55].mxu1  ;;  %4463 = vmatmul.mubr.bf16.gmra.mrb[80].mxu1 %v4024_v28  ;;  %v3984_v58 = vmax.f32 %v5572_v35, 0.0  ;;  %v3983_v60 = vmax.f32 %v5541_v36, 0.0 }
 0x329   : > { %v3986_v19 = vmax.f32 %v5542_v21, 0.0  ;;  %v5575_v2 = vadd.f32 %v3919_v47, %v7998_v14  ;;  %v3985_v1 = vmax.f32 %v5573_v39, 0.0 }
 0x32a   : > { %v3988_v62 = vmax.f32 %v5574_v45, 0.0  ;;  %v3987_v63 = vmax.f32 %v5543_v46, 0.0 }
 0x32b   : > { %v4026_v3 = vpack.c.bf16 %v3986_v19, %v3982_v51  ;;  %v3989_v0 = vmax.f32 %v5575_v2, 0.0 }
 0x32c   : > { %v4028_v40 = vpack.c.bf16 %v3988_v62, %v3984_v58  ;;  %v4027_v4 = vpack.c.bf16 %v3987_v63, %v3983_v60  ;;  %v3697_v5 = vpop.f32.mrb[56].mxu0 }
 0x32d   : > { %v4029_v6 = vpack.c.bf16 %v3989_v0, %v3985_v1  ;;  %v5544_v7 = vadd.f32 %v3697_v5, %v7986_v41  ;;  %v3923_v9 = vpop.f32.mrb[56].mxu1  ;;  %v3699_v11 = vpop.f32.mrb[57].mxu0 }
 0x32e   : > { %v5576_v38 = vadd.f32 %v3923_v9, %v7990_v43  ;;  %v5545_v26 = vadd.f32 %v3699_v11, %v7994_v13  ;;  %v3925_v12 = vpop.f32.mrb[57].mxu1  ;;  %v3701_v24 = vpop.f32.mrb[58].mxu0  ;;  %4373 = vmatprep.mubr.bf16.mxu0 %v4027_v4 }
 0x32f   : > { %v5577_v8 = vadd.f32 %v3925_v12, %v7998_v14  ;;  %v5546_v10 = vadd.f32 %v3701_v24, %v7986_v41  ;;  %v3927_v59 = vpop.f32.mrb[58].mxu1  ;;  %4470 = vmatprep.mubr.bf16.mxu1 %v4029_v6  ;;  %v3703_v61 = vpop.f32.mrb[59].mxu0  ;;  %4374 = vmatmul.mubr.bf16.gmra.mrb[84].mxu0 %v4026_v3  ;;  %v3990_v16 = vmax.f32 %v5544_v7, 0.0 }
 0x330   : > { %v5578_v15 = vadd.f32 %v3927_v59, %v7990_v43  ;;  %v5547_v54 = vadd.f32 %v3703_v61, %v7994_v13  ;;  %v3929_v55 = vpop.f32.mrb[59].mxu1  ;;  %4471 = vmatmul.mubr.bf16.gmra.mrb[84].mxu1 %v4028_v40  ;;  %v3992_v18 = vmax.f32 %v5576_v38, 0.0  ;;  %v3991_v50 = vmax.f32 %v5545_v26, 0.0 }
 0x331   : > { %v3994_v49 = vmax.f32 %v5546_v10, 0.0  ;;  %v5579_v17 = vadd.f32 %v3929_v55, %v7998_v14  ;;  %v3993_v57 = vmax.f32 %v5577_v8, 0.0 }
 0x332   : > { %v3996_v56 = vmax.f32 %v5578_v15, 0.0  ;;  %v3995_v52 = vmax.f32 %v5547_v54, 0.0 }
 0x333   : > { %v4030_v20 = vpack.c.bf16 %v3994_v49, %v3990_v16  ;;  %v3997_v48 = vmax.f32 %v5579_v17, 0.0 }
 0x334   : > { %v4032_v53 = vpack.c.bf16 %v3996_v56, %v3992_v18  ;;  %v4031_v23 = vpack.c.bf16 %v3995_v52, %v3991_v50  ;;  %v3707_v25 = vpop.f32.mrb[60].mxu0 }
 0x335   : > { %v4033_v27 = vpack.c.bf16 %v3997_v48, %v3993_v57  ;;  %v5548_v28 = vadd.f32 %v3707_v25, %v7986_v41  ;;  %v3933_v29 = vpop.f32.mrb[60].mxu1  ;;  %v3709_v30 = vpop.f32.mrb[61].mxu0 }
 0x336   : > { %v5580_v31 = vadd.f32 %v3933_v29, %v7990_v43  ;;  %v5549_v32 = vadd.f32 %v3709_v30, %v7994_v13  ;;  %v3935_v33 = vpop.f32.mrb[61].mxu1  ;;  %v3711_v34 = vpop.f32.mrb[62].mxu0  ;;  %4381 = vmatprep.mubr.bf16.mxu0 %v4031_v23 }
 0x337   : > { %v5581_v35 = vadd.f32 %v3935_v33, %v7998_v14  ;;  %v5550_v36 = vadd.f32 %v3711_v34, %v7986_v41  ;;  %v3937_v37 = vpop.f32.mrb[62].mxu1  ;;  %4478 = vmatprep.mubr.bf16.mxu1 %v4033_v27  ;;  %v3713_v22 = vpop.f32.mrb[63].mxu0  ;;  %4382 = vmatmul.mubr.bf16.gmra.mrb[88].mxu0 %v4030_v20  ;;  %v3998_v44 = vmax.f32 %v5548_v28, 0.0 }
 0x338   : > { %v5582_v39 = vadd.f32 %v3937_v37, %v7990_v43  ;;  %v5551_v21 = vadd.f32 %v3713_v22, %v7994_v13  ;;  %v3939_v42 = vpop.f32.mrb[63].mxu1  ;;  %4479 = vmatmul.mubr.bf16.gmra.mrb[88].mxu1 %v4032_v53  ;;  %v4000_v47 = vmax.f32 %v5580_v31, 0.0  ;;  %v3999_v51 = vmax.f32 %v5549_v32, 0.0 }
 0x339   : > { %v4002_v45 = vmax.f32 %v5550_v36, 0.0  ;;  %v5583_v46 = vadd.f32 %v3939_v42, %v7998_v14  ;;  %v4001_v58 = vmax.f32 %v5581_v35, 0.0  ;;  %v8067_v14 = vld [vmem:[%s8205_s6] ss:$0 sm:$0xff] }
 0x33a   : > { %v4004_v19 = vmax.f32 %v5582_v39, 0.0  ;;  %v4003_v2 = vmax.f32 %v5551_v21, 0.0 }
 0x33b   : > { %v4034_v41 = vpack.c.bf16 %v4002_v45, %v3998_v44  ;;  %v4005_v60 = vmax.f32 %v5583_v46, 0.0 }
 0x33c   : > { %v4036_v62 = vpack.c.bf16 %v4004_v19, %v4000_v47  ;;  %v4035_v63 = vpack.c.bf16 %v4003_v2, %v3999_v51 }
 0x33d   : > { %v4037_v1 = vpack.c.bf16 %v4005_v60, %v4001_v58 }
 0x33e   : > { %4389 = vmatprep.mubr.bf16.mxu0 %v4035_v63 }
 0x33f   : > { %4486 = vmatprep.mubr.bf16.mxu1 %v4037_v1  ;;  %4390 = vmatmul.mubr.bf16.gmra.mrb[92].mxu0 %v4034_v41 }
 0x340   : > { %4487 = vmatmul.mubr.bf16.gmra.mrb[92].mxu1 %v4036_v62 }
 0x3da   : > { %v5344_v43 = vpop.f32.mrb[64].mxu0 }
 0x3db   : > { %v5408_v13 = vpop.f32.mrb[64].mxu1  ;;  %v5345_v3 = vpop.f32.mrb[65].mxu0 }
 0x3dc   : > { %v5346_v0 = vadd.f32 %v5345_v3, %v5344_v43  ;;  %v5409_v40 = vpop.f32.mrb[65].mxu1  ;;  %v5347_v4 = vpop.f32.mrb[66].mxu0 }
 0x3dd   : > { %v5410_v5 = vadd.f32 %v5409_v40, %v5408_v13  ;;  %v5411_v6 = vpop.f32.mrb[66].mxu1  ;;  %v5348_v7 = vpop.f32.mrb[67].mxu0 }
 0x3de   : > { %v4336_v9 = vadd.f32 %v5346_v0, %v8067_v14  ;;  %v5349_v11 = vadd.f32 %v5348_v7, %v5347_v4  ;;  %v5412_v38 = vpop.f32.mrb[67].mxu1 }
 0x3df   : > { %v5413_v26 = vadd.f32 %v5412_v38, %v5411_v6 }
 0x3e0   : > { %v4433_v12 = vadd.f32 %v5410_v5, %v4336_v9  ;;  %v4339_v24 = vadd.f32 %v5349_v11, %v8067_v14 }
 0x3e2   : > { %v4436_v8 = vadd.f32 %v5413_v26, %v4339_v24  ;;  %v5350_v10 = vpop.f32.mrb[68].mxu0 }
 0x3e3   : > { %v5414_v59 = vpop.f32.mrb[68].mxu1  ;;  %v5351_v61 = vpop.f32.mrb[69].mxu0 }
 0x3e4   : > { %v5284_v15 = vpack.c.bf16 %v4436_v8, %v4433_v12  ;;  %v5352_v54 = vadd.f32 %v5351_v61, %v5350_v10  ;;  %v5415_v55 = vpop.f32.mrb[69].mxu1  ;;  %v5353_v16 = vpop.f32.mrb[70].mxu0 }
 0x3e5   : > { %v5416_v49 = vadd.f32 %v5415_v55, %v5414_v59  ;;  %v5417_v17 = vpop.f32.mrb[70].mxu1  ;;  %v5354_v18 = vpop.f32.mrb[71].mxu0 }
 0x3e6   : > { %5285 = vst [vmem:[%s8072_s24] sm:$0xff] %v5284_v15   ;;  %v4344_v50 = vadd.f32 %v5352_v54, %v8067_v14  ;;  %v5355_v56 = vadd.f32 %v5354_v18, %v5353_v16  ;;  %v5418_v52 = vpop.f32.mrb[71].mxu1 }
 0x3e7   : > { %v5419_v57 = vadd.f32 %v5418_v52, %v5417_v17 }
 0x3e8   : > { %v4441_v20 = vadd.f32 %v5416_v49, %v4344_v50  ;;  %v4347_v48 = vadd.f32 %v5355_v56, %v8067_v14 }
 0x3ea   : > { %v4444_v53 = vadd.f32 %v5419_v57, %v4347_v48  ;;  %v5356_v23 = vpop.f32.mrb[72].mxu0 }
 0x3eb   : > { %v5420_v25 = vpop.f32.mrb[72].mxu1  ;;  %v5357_v27 = vpop.f32.mrb[73].mxu0 }
 0x3ec   : > { %v5289_v28 = vpack.c.bf16 %v4444_v53, %v4441_v20  ;;  %v5358_v29 = vadd.f32 %v5357_v27, %v5356_v23  ;;  %v5421_v30 = vpop.f32.mrb[73].mxu1  ;;  %v5359_v31 = vpop.f32.mrb[74].mxu0 }
 0x3ed   : > { %v5422_v32 = vadd.f32 %v5421_v30, %v5420_v25  ;;  %v5423_v33 = vpop.f32.mrb[74].mxu1  ;;  %v5360_v34 = vpop.f32.mrb[75].mxu0 }
 0x3ee   : > { %5321 = vst [vmem:[%s8072_s24 + $0x8] sm:$0xff] %v5289_v28   ;;  %v4352_v35 = vadd.f32 %v5358_v29, %v8067_v14  ;;  %v5361_v36 = vadd.f32 %v5360_v34, %v5359_v31  ;;  %v5424_v37 = vpop.f32.mrb[75].mxu1 }
 0x3ef   : > { %v5425_v22 = vadd.f32 %v5424_v37, %v5423_v33 }
 0x3f0   : > { %v4449_v39 = vadd.f32 %v5422_v32, %v4352_v35  ;;  %v4355_v21 = vadd.f32 %v5361_v36, %v8067_v14 }
 0x3f2   : > { %v4452_v42 = vadd.f32 %v5425_v22, %v4355_v21  ;;  %v5362_v44 = vpop.f32.mrb[76].mxu0 }
 0x3f3   : > { %v5426_v45 = vpop.f32.mrb[76].mxu1  ;;  %v5363_v46 = vpop.f32.mrb[77].mxu0 }
 0x3f4   : > { %v5294_v47 = vpack.c.bf16 %v4452_v42, %v4449_v39  ;;  %v5364_v51 = vadd.f32 %v5363_v46, %v5362_v44  ;;  %v5427_v19 = vpop.f32.mrb[77].mxu1  ;;  %v5365_v2 = vpop.f32.mrb[78].mxu0 }
 0x3f5   : > { %v5428_v58 = vadd.f32 %v5427_v19, %v5426_v45  ;;  %v5429_v41 = vpop.f32.mrb[78].mxu1  ;;  %v5366_v60 = vpop.f32.mrb[79].mxu0 }
 0x3f6   : > { %5322 = vst [vmem:[%s8072_s24 + $0x10] sm:$0xff] %v5294_v47   ;;  %v4360_v62 = vadd.f32 %v5364_v51, %v8067_v14  ;;  %v5367_v63 = vadd.f32 %v5366_v60, %v5365_v2  ;;  %v5430_v1 = vpop.f32.mrb[79].mxu1 }
 0x3f7   : > { %v5431_v43 = vadd.f32 %v5430_v1, %v5429_v41 }
 0x3f8   : > { %v4457_v13 = vadd.f32 %v5428_v58, %v4360_v62  ;;  %v4363_v3 = vadd.f32 %v5367_v63, %v8067_v14 }
 0x3fa   : > { %v4460_v0 = vadd.f32 %v5431_v43, %v4363_v3  ;;  %v5368_v40 = vpop.f32.mrb[80].mxu0 }
 0x3fb   : > { %v5432_v4 = vpop.f32.mrb[80].mxu1  ;;  %v5369_v5 = vpop.f32.mrb[81].mxu0 }
 0x3fc   : > { %v5299_v6 = vpack.c.bf16 %v4460_v0, %v4457_v13  ;;  %v5370_v7 = vadd.f32 %v5369_v5, %v5368_v40  ;;  %v5433_v9 = vpop.f32.mrb[81].mxu1  ;;  %v5371_v11 = vpop.f32.mrb[82].mxu0 }
 0x3fd   : > { %v5434_v38 = vadd.f32 %v5433_v9, %v5432_v4  ;;  %v5435_v26 = vpop.f32.mrb[82].mxu1  ;;  %v5372_v12 = vpop.f32.mrb[83].mxu0 }
 0x3fe   : > { %5323 = vst [vmem:[%s8072_s24 + $0x18] sm:$0xff] %v5299_v6   ;;  %v4368_v24 = vadd.f32 %v5370_v7, %v8067_v14  ;;  %v5373_v8 = vadd.f32 %v5372_v12, %v5371_v11  ;;  %v5436_v10 = vpop.f32.mrb[83].mxu1 }
 0x3ff   : > { %v5437_v59 = vadd.f32 %v5436_v10, %v5435_v26 }
 0x400   : > { %v4465_v61 = vadd.f32 %v5434_v38, %v4368_v24  ;;  %v4371_v15 = vadd.f32 %v5373_v8, %v8067_v14 }
 0x402   : > { %v4468_v54 = vadd.f32 %v5437_v59, %v4371_v15  ;;  %v5374_v55 = vpop.f32.mrb[84].mxu0 }
 0x403   : > { %v5438_v16 = vpop.f32.mrb[84].mxu1  ;;  %v5375_v49 = vpop.f32.mrb[85].mxu0 }
 0x404   : > { %v5304_v17 = vpack.c.bf16 %v4468_v54, %v4465_v61  ;;  %v5376_v18 = vadd.f32 %v5375_v49, %v5374_v55  ;;  %v5439_v50 = vpop.f32.mrb[85].mxu1  ;;  %v5377_v56 = vpop.f32.mrb[86].mxu0 }
 0x405   : > { %v5440_v52 = vadd.f32 %v5439_v50, %v5438_v16  ;;  %v5441_v57 = vpop.f32.mrb[86].mxu1  ;;  %v5378_v20 = vpop.f32.mrb[87].mxu0 }
 0x406   : > { %5324 = vst [vmem:[%s8072_s24 + $0x20] sm:$0xff] %v5304_v17   ;;  %v4376_v48 = vadd.f32 %v5376_v18, %v8067_v14  ;;  %v5379_v53 = vadd.f32 %v5378_v20, %v5377_v56  ;;  %v5442_v23 = vpop.f32.mrb[87].mxu1 }
 0x407   : > { %v5443_v25 = vadd.f32 %v5442_v23, %v5441_v57 }
 0x408   : > { %v4473_v27 = vadd.f32 %v5440_v52, %v4376_v48  ;;  %v4379_v28 = vadd.f32 %v5379_v53, %v8067_v14 }
 0x40a   : > { %v4476_v29 = vadd.f32 %v5443_v25, %v4379_v28  ;;  %v5380_v30 = vpop.f32.mrb[88].mxu0 }
 0x40b   : > { %v5444_v31 = vpop.f32.mrb[88].mxu1  ;;  %v5381_v32 = vpop.f32.mrb[89].mxu0 }
 0x40c   : > { %v5309_v33 = vpack.c.bf16 %v4476_v29, %v4473_v27  ;;  %v5382_v34 = vadd.f32 %v5381_v32, %v5380_v30  ;;  %v5445_v35 = vpop.f32.mrb[89].mxu1  ;;  %v5383_v36 = vpop.f32.mrb[90].mxu0 }
 0x40d   : > { %v5446_v37 = vadd.f32 %v5445_v35, %v5444_v31  ;;  %v5447_v22 = vpop.f32.mrb[90].mxu1  ;;  %v5384_v39 = vpop.f32.mrb[91].mxu0 }
 0x40e   : > { %5325 = vst [vmem:[%s8072_s24 + $0x28] sm:$0xff] %v5309_v33   ;;  %v4384_v21 = vadd.f32 %v5382_v34, %v8067_v14  ;;  %v5385_v42 = vadd.f32 %v5384_v39, %v5383_v36  ;;  %v5448_v44 = vpop.f32.mrb[91].mxu1 }
 0x40f   : > { %v5449_v45 = vadd.f32 %v5448_v44, %v5447_v22 }
 0x410   : > { %v4481_v46 = vadd.f32 %v5446_v37, %v4384_v21  ;;  %v4387_v47 = vadd.f32 %v5385_v42, %v8067_v14 }
 0x412   : > { %v4484_v51 = vadd.f32 %v5449_v45, %v4387_v47  ;;  %v5386_v19 = vpop.f32.mrb[92].mxu0 }
 0x413   : > { %v5450_v2 = vpop.f32.mrb[92].mxu1  ;;  %v5387_v58 = vpop.f32.mrb[93].mxu0 }
 0x414   : > { %v5314_v41 = vpack.c.bf16 %v4484_v51, %v4481_v46  ;;  %v5388_v60 = vadd.f32 %v5387_v58, %v5386_v19  ;;  %v5451_v62 = vpop.f32.mrb[93].mxu1  ;;  %v5389_v63 = vpop.f32.mrb[94].mxu0 }
 0x415   : > { %v5452_v1 = vadd.f32 %v5451_v62, %v5450_v2  ;;  %v5453_v43 = vpop.f32.mrb[94].mxu1  ;;  %v5390_v13 = vpop.f32.mrb[95].mxu0 }
 0x416   : > { %5326 = vst [vmem:[%s8072_s24 + $0x30] sm:$0xff] %v5314_v41   ;;  %v4392_v3 = vadd.f32 %v5388_v60, %v8067_v14  ;;  %v5391_v0 = vadd.f32 %v5390_v13, %v5389_v63  ;;  %v5454_v40 = vpop.f32.mrb[95].mxu1 }
 0x417   : > { %v5455_v4 = vadd.f32 %v5454_v40, %v5453_v43 }
 0x418   : > { %v4489_v5 = vadd.f32 %v5452_v1, %v4392_v3  ;;  %v4395_v6 = vadd.f32 %v5391_v0, %v8067_v14  ;;  %4581 = sbr.rel (!%p6602_p4) target bundleno = 1114 (0x45a), region = 52 }
 0x41a   : > { %v4492_v7 = vadd.f32 %v5455_v4, %v4395_v6 }
 0x41c   : > { %v5319_v9 = vpack.c.bf16 %v4492_v7, %v4489_v5 }
 0x41e   : > { %5327 = vst [vmem:[%s8072_s24 + $0x38] sm:$0xff] %v5319_v9  }
 0x41f   : > { %s8215_s29 = smov (!%p4584_p8, %s4583_s29), 16 }
 0x420   : > { %s5247_s12 = sshll.u32 %s8215_s29, 6 }
 0x421   : > { %p5250_p9 = scmp.eq.s32.totalorder %s5247_s12, 0 }
 0x422   : > { %s8109_s13 = sshrl.u32 (!%p5250_p9), %s8215_s29, 4 }
 0x423   : > { %4592 = sbr.rel (%p5250_p9) target bundleno = 1114 (0x45a), region = 56  ;;  %p5251_p10 = scmp.le.s32.totalorder (!%p5250_p9), %s8109_s13, 0 }
 0x42a   : > { %4805 = sbr.rel (%p5251_p10) target bundleno = 1093 (0x445), region = 128  ;;  %s8208_s27 = smov (!%p5251_p10), %s8103_s11 }
 0x42b   : > { %s8209_s9 = smov (!%p5251_p10), %s8072_s24  ;;  %s8118_s17 = smov (!%p5251_p10), 0  }
 0x42c   : > { %s8120_s14 = smov (!%p5251_p10), 0  }
 0x431 LB: >> { %v4608_v14 = vld [vmem:[%s6510_s9] sm:$0xf]  ;;  %v4610_v11 = vld [vmem:[%s6510_s9 + $0x4] sm:$0xf]  ;;  %v4612_v38 = vld [vmem:[%s6510_s9 + $0x8] sm:$0xf]  ;;  %s6518_s14 = sphi %s8120_s14, %s4602_s14   ;;  %s6514_s17 = sphi %s8118_s17, %s8210_s17   ;;  %s6510_s9 = sphi %s8209_s9, %s4645_s9   ;;  %s6506_s27 = sphi %s8208_s27, %s4646_s27  }
 0x432   : >> { %4609 = vst [vmem:[%s6506_s27] sm:$0xf] %v4608_v14  ;;  %4611 = vst [vmem:[%s6506_s27 + $0x4] sm:$0xf] %v4610_v11  ;;  %v4614_v26 = vld [vmem:[%s6510_s9 + $0xc] sm:$0xf]  ;;  %s4640_s20 = sadd.s32 1, %s6514_s17 }
 0x433   : >> { %4613 = vst [vmem:[%s6506_s27 + $0x8] sm:$0xf] %v4612_v38  ;;  %v4616_v12 = vld [vmem:[%s6510_s9 + $0x10] sm:$0xf]  ;;  %v4618_v24 = vld [vmem:[%s6510_s9 + $0x14] sm:$0xf]  ;;  %p4641_p11 = scmp.ge.s32.totalorder %s4640_s20, %s8109_s13 }
 0x434   : >> { %4615 = vst [vmem:[%s6506_s27 + $0xc] sm:$0xf] %v4614_v26  ;;  %4617 = vst [vmem:[%s6506_s27 + $0x10] sm:$0xf] %v4616_v12  ;;  %v4620_v8 = vld [vmem:[%s6510_s9 + $0x18] sm:$0xf] }
 0x435   : >> { %4619 = vst [vmem:[%s6506_s27 + $0x14] sm:$0xf] %v4618_v24  ;;  %v4622_v10 = vld [vmem:[%s6510_s9 + $0x1c] sm:$0xf]  ;;  %v4624_v59 = vld [vmem:[%s6510_s9 + $0x20] sm:$0xf] }
 0x436   : >> { %4621 = vst [vmem:[%s6506_s27 + $0x18] sm:$0xf] %v4620_v8  ;;  %4623 = vst [vmem:[%s6506_s27 + $0x1c] sm:$0xf] %v4622_v10  ;;  %v4626_v61 = vld [vmem:[%s6510_s9 + $0x24] sm:$0xf] }
 0x437   : >> { %4625 = vst [vmem:[%s6506_s27 + $0x20] sm:$0xf] %v4624_v59  ;;  %v4628_v15 = vld [vmem:[%s6510_s9 + $0x28] sm:$0xf]  ;;  %v4630_v54 = vld [vmem:[%s6510_s9 + $0x2c] sm:$0xf] }
 0x438   : >> { %4627 = vst [vmem:[%s6506_s27 + $0x24] sm:$0xf] %v4626_v61  ;;  %4629 = vst [vmem:[%s6506_s27 + $0x28] sm:$0xf] %v4628_v15  ;;  %v4632_v55 = vld [vmem:[%s6510_s9 + $0x30] sm:$0xf] }
 0x439   : >> { %4631 = vst [vmem:[%s6506_s27 + $0x2c] sm:$0xf] %v4630_v54  ;;  %v4634_v16 = vld [vmem:[%s6510_s9 + $0x34] sm:$0xf]  ;;  %v4636_v49 = vld [vmem:[%s6510_s9 + $0x38] sm:$0xf] }
 0x43a   : >> { %4633 = vst [vmem:[%s6506_s27 + $0x30] sm:$0xf] %v4632_v55  ;;  %4635 = vst [vmem:[%s6506_s27 + $0x34] sm:$0xf] %v4634_v16  ;;  %v4638_v17 = vld [vmem:[%s6510_s9 + $0x3c] sm:$0xf] }
 0x43b   : >> { %4637 = vst [vmem:[%s6506_s27 + $0x38] sm:$0xf] %v4636_v49  ;;  %4639 = vst [vmem:[%s6506_s27 + $0x3c] sm:$0xf] %v4638_v17  ;;  %s8217_s20 = smov (%p4641_p11, %s4640_s20), 0  ;;  %s4602_s14 = sadd.s32 1, %s6518_s14  }
 0x43c   : >> { %s5252_s15 = sshll.u32 %s8217_s20, 6  ;;  %p4601_p12 = scmp.ge.s32.totalorder %s4602_s14, %s8109_s13 }
 0x43d   : >> { %s4645_s9 = scalar_lea.vmem %s8072_s24, %s5252_s15 [#allocation2]   ;;  %s4646_s27 = scalar_lea.vmem %s8103_s11, %s5252_s15  }
 0x43e   : >> { %s8210_s17 = smov %s8217_s20  ;;  %4604 = sbr.rel (!%p4601_p12) target bundleno = 1073 (0x431), region = 134 }
 0x445 PF: > { %s8181_s16 = sand.u32 15, %s8215_s29   ;;  %s5279_s18 = sshll.u32 %s8109_s13, 6 }
 0x446   : > { %s4651_s19 = scalar_lea.vmem %s8072_s24, %s5279_s18 [#allocation2]   ;;  %s4653_s21 = scalar_lea.vmem %s8103_s11, %s5279_s18  }
 0x447   : > { %p5257_p13 = scmp.le.s32.totalorder %s8181_s16, 0 }
 0x448   : > { %s6520_s22 = smov (!%p5257_p13), %s4653_s21   ;;  %s6524_s26 = smov (!%p5257_p13), %s4651_s19  }
 0x449   : > { %4819 = sbr.rel (%p5257_p13) target bundleno = 1114 (0x45a), region = 139  ;;  %s6528_s30 = smov (!%p5257_p13), 0  }
 0x44a   : > { %s6532_s10 = smov (!%p5257_p13), 0  }
 0x450 LB: >> { %v4663_v18 = vld [vmem:[%s6526_s26] sm:$0xf]  ;;  %s4665_s29 = sadd.s32 1, %s6530_s30  ;;  %s4657_s10 = sadd.s32 1, %s6534_s10   ;;  %s6534_s10 = sphi %s6532_s10, %s4657_s10   ;;  %s6530_s30 = sphi %s6528_s30, %s6529_s30   ;;  %s6526_s26 = sphi %s6524_s26, %s4670_s26   ;;  %s6522_s22 = sphi %s6520_s22, %s4671_s22  }
 0x451   : >> { %4664 = vst [vmem:[%s6522_s22] sm:$0xf] %v4663_v18  ;;  %p4666_p0 = scmp.ge.s32.totalorder %s4665_s29, %s8181_s16  ;;  %p4656_p1 = scmp.ge.s32.totalorder %s4657_s10, %s8181_s16 }
 0x453   : >> { %s8219_s29 = smov (%p4666_p0, %s4665_s29), 0  ;;  %4659 = sbr.rel (!%p4656_p1) target bundleno = 1104 (0x450), region = 145 }
 0x454   : >> { %s5258_s24 = sshll.u32 %s8219_s29, 2  ;;  %s6529_s30 = smov %s8219_s29  }
 0x455   : >> { %s4670_s26 = scalar_lea.vmem %s4651_s19, %s5258_s24 [#allocation2]   ;;  %s4671_s22 = scalar_lea.vmem %s4653_s21, %s5258_s24  }
 0x45a PF: > { %p14_p2 = scmp.ge.s32.totalorder %s6592_s28, 4   ;;  %s8211_s24 = smov %s6498_s25 }
 0x45b   : > { %s8212_s25 = smov %s6600_s8  ;;  %s8213_s26 = smov %s6592_s28 }
 0x45c   :  { %16 = sbr.rel (!%p14_p2) target bundleno = 2 (0x2), region = 156 }

</bundles_post_ra>
